<compile_context>
chip_gen: v6e
topology: v6e:2x2x1
jax: 0.10.0
libtpu: 0.0.40
codegen_flags: <defaults>
</compile_context>

<pallas_src>
import functools

import jax
import jax.numpy as jnp
import numpy as np
from jax import lax
from jax.experimental import pallas as pl
from jax.experimental.pallas import tpu as pltpu

# ----------------------------- model hyper-params -----------------------------
BATCH = 2
CIN = 3
HIMG = 16
WIMG = 16
PATCH = 4
NTOK = (HIMG // PATCH) * (WIMG // PATCH)       # 16 tokens per image
PATCH_DIM = CIN * PATCH * PATCH                # 48
DMODEL = 32                                    # token embedding dim
EXPAND = 64                                    # mamba inner dim
NSTATE = 8                                     # SSM state size
DTRANK = 4                                     # delta low-rank (folded on host)
KCONV = 4                                      # causal depthwise conv kernel
KSYM = 16                                      # channel symbols per token


# ----------------------------- chip-aware batch mode ---------------------------
def _pick_batch_per_step():
    """Batch elements processed per grid step.

    v7x has two TensorCores per chip: keep one sample per grid step so
    grid=(BATCH,) + dimension_semantics=("parallel",) shards the batch across
    the cores.  Single-TC chips (v5e / v6e) pay the per-grid-step overhead and
    run every matmul at half M, so fold the whole batch into the matmul M
    dimension and use grid=(1,).  Either choice is functionally identical.
    """
    try:
        kind = jax.devices()[0].device_kind.lower()
    except Exception:
        kind = ""
    if "v7" in kind or "7x" in kind:
        return 1
    return BATCH


# ----------------------------- host-built structure ----------------------------
def _pad_lanes(a, lanes):
    a = np.asarray(a, np.float32)
    out = np.zeros((a.shape[0], lanes), np.float32)
    out[:, : a.shape[1]] = a
    return out


def _structural_np(gb):
    """0/1 structural matrices for a (gb*L, .) token layout (row m = b*L + t).

    Scan rows are ordered r = t*gb*N + b*N + n so one (gb*N, E) tile per time
    step advances every sample's (N, E) state in lock-step.
    """
    L, N, K = NTOK, NSTATE, KCONV
    gbl, rn = gb * L, gb * L * N
    r = np.arange(rn)
    t_of_r = r // (gb * N)
    b_of_r = (r // N) % gb
    n_of_r = r % N
    m_of_r = b_of_r * L + t_of_r                       # token row of scan row r
    rep = (m_of_r[:, None] == np.arange(gbl)[None, :]).astype(np.float32)
    selb = (n_of_r[:, None] == np.arange(2 * N)[None, :]).astype(np.float32)
    selc = ((n_of_r + N)[:, None] == np.arange(2 * N)[None, :]).astype(np.float32)
    gsum = (np.arange(gbl)[:, None] == m_of_r[None, :]).astype(np.float32)
    m = np.arange(gbl)
    shifts = []
    for k in range(K):                                 # causal, per-sample shifts
        d = K - 1 - k
        src = m - d
        ok = (src >= 0) & ((src // L) == (m // L))
        sh = np.zeros((gbl, gbl), np.float32)
        sh[m[ok], src[ok]] = 1.0
        shifts.append(sh)
    shifts = np.concatenate(shifts, axis=0)            # (K*gbl, gbl)
    psum = ((m[:, None] // L) == (m[None, :] // L)).astype(np.float32)
    return rep, selb, selc, gsum, shifts, psum


def _build_prepared(params, gb):
    """One-time packing of all weights / constants into two slabs (+ gsum)."""
    L, N, K, D, E = NTOK, NSTATE, KCONV, DMODEL, EXPAND
    gbl, rn = gb * L, gb * L * N
    rep, selb, selc, gsum, shifts, psum = _structural_np(gb)

    w_parts, w_off = [], {}                            # bf16 matmul-weight slab
    f_parts, f_off = [], {}                            # f32 structural/bias slab

    def add_w(name, arr):
        arr = np.asarray(arr, np.float32)
        assert arr.shape[0] % 16 == 0 and arr.shape[1] <= 128, (name, arr.shape)
        w_off[name] = (sum(p.shape[0] for p in w_parts), arr.shape[0], arr.shape[1])
        w_parts.append(_pad_lanes(arr, 128))

    def add_f(name, arr):
        arr = np.asarray(arr, np.float32)
        assert arr.shape[0] % 8 == 0 and arr.shape[1] <= E, (name, arr.shape)
        f_off[name] = (sum(p.shape[0] for p in f_parts), arr.shape[0], arr.shape[1])
        f_parts.append(_pad_lanes(arr, E))

    add_f("rep", rep)
    add_f("selb", selb)
    add_f("selc", selc)
    add_f("shifts", shifts)
    add_f("psum", psum)

    def add_stage(tag, w_head, b_head, mam, w_tail, b_tail):
        w_in = np.asarray(mam["W_in"], np.float32)
        b_in = np.asarray(mam["b_in"], np.float32)
        xproj = np.asarray(mam["W_xproj"], np.float32)
        dt_full = xproj[:, :DTRANK] @ np.asarray(mam["W_dt"], np.float32)  # folded
        a_ne = (-np.exp(np.asarray(mam["A_log"], np.float32))).T           # (N, E)

        add_w(tag + "_head", w_head)
        add_w(tag + "_in_x", w_in[:, :E])
        add_w(tag + "_in_z", w_in[:, E:])
        add_w(tag + "_dt", dt_full)
        add_w(tag + "_bc", xproj[:, DTRANK:])          # fused [B | C] projection
        add_w(tag + "_out", mam["W_out"])
        add_w(tag + "_tail", w_tail)

        add_f(tag + "_arep", a_ne[np.arange(rn) % N])  # A replicated to scan rows
        conv = np.zeros((8, E), np.float32)
        conv[:K] = np.asarray(mam["conv_w"], np.float32)
        add_f(tag + "_conv", conv)
        bias = np.zeros((8, E), np.float32)            # all (1, .) rows, one block
        bias[0, :D] = np.asarray(b_head, np.float32)
        bias[1, :] = b_in[:E]
        bias[2, :] = b_in[E:]
        bias[3, :] = np.asarray(mam["conv_b"], np.float32)
        bias[4, :] = np.asarray(mam["b_dt"], np.float32)
        bias[5, :] = np.asarray(mam["D_skip"], np.float32)
        bias[6, :D] = np.asarray(mam["b_out"], np.float32)
        dout = np.asarray(w_tail, np.float32).shape[1]
        bias[7, :dout] = np.asarray(b_tail, np.float32)
        add_f(tag + "_bias", bias)

    enc, dec = params["encoder"], params["decoder"]
    add_stage("enc", enc["W_embed"], enc["b_embed"], enc["mamba"], enc["W_ch"], enc["b_ch"])
    add_stage("dec", dec["W_dech"], dec["b_dech"], dec["mamba"],
              dec["W_unpatch"], dec["b_unpatch"])

    layout = dict(GB=gb, GBL=gbl, RN=rn, w_off=w_off, f_off=f_off)
    slabs = dict(
        slab_w=jnp.asarray(np.concatenate(w_parts, axis=0), jnp.bfloat16),
        slab_f=jnp.asarray(np.concatenate(f_parts, axis=0), jnp.float32),
        gsum=jnp.asarray(gsum, jnp.float32),
    )
    return layout, slabs


# ----------------------------- fused Pallas kernel -----------------------------
def _jscc_kernel(layout, x_ref, gates_ref, w_ref, f_ref, gsum_ref, out_ref,
                 da_scr, dbu_scr, h_scr):
    """Encoder + decoder for one batch group; everything stays in VMEM."""
    f32, bf16 = jnp.float32, jnp.bfloat16
    L, N, E, D, K = NTOK, NSTATE, EXPAND, DMODEL, KCONV
    GB, GBL = layout["GB"], layout["GBL"]
    w_off, f_off = layout["w_off"], layout["f_off"]

    def wsl(name):                                     # bf16 weight slice (static)
        off, rows, width = w_off[name]
        return w_ref[off:off + rows, 0:width]

    def fsl(name):                                     # f32 structural/bias slice
        off, rows, width = f_off[name]
        return f_ref[off:off + rows, 0:width]

    def mm(x, w_bf16):                                 # bf16 MXU matmul, f32 acc
        return jnp.dot(x.astype(bf16), w_bf16, preferred_element_type=f32)

    def stage(tag, tok, gate, dout, power_norm):
        bias = fsl(tag + "_bias")                      # (8, 64) f32, one load

        # ---- head embedding + SNR-adaptive gate ----
        x = (mm(tok, wsl(tag + "_head")) + bias[0:1, 0:D]) * gate        # (GBL, D)

        # ---- Mamba input projections (halves pre-split on host) ----
        x_in = mm(x, wsl(tag + "_in_x")) + bias[1:2, 0:E]                # (GBL, E)
        z = mm(x, wsl(tag + "_in_z")) + bias[2:3, 0:E]

        # ---- causal depthwise conv1d + SiLU via block-diagonal shift matmuls ----
        conv_w = fsl(tag + "_conv")
        sh_off = f_off["shifts"][0]
        acc = jnp.zeros((GBL, E), f32) + bias[3:4, 0:E]
        for k in range(K):                             # static unroll (K = 4)
            sh = f_ref[sh_off + k * GBL: sh_off + (k + 1) * GBL, 0:GBL]
            acc = acc + jnp.dot(sh, x_in, preferred_element_type=f32) * conv_w[k:k + 1, :]
        u = acc * jax.nn.sigmoid(acc)                  # SiLU, (GBL, E)

        # ---- SSM parameters (dt low-rank folded, B/C fused) ----
        dt = mm(u, wsl(tag + "_dt")) + bias[4:5, 0:E]
        dt = jnp.maximum(dt, 0.0) + jnp.log(1.0 + jnp.exp(-jnp.abs(dt)))  # softplus
        bc = mm(u, wsl(tag + "_bc"))                   # (GBL, 2N) = [B | C]

        # ---- vectorized precompute of dA / dB*u / C in (GBL*N, E) scan layout ----
        # Structural dots stay f32 (exp(dt*A) precision concern from review).
        rep = fsl("rep")                               # (RN, GBL) 0/1
        dt_rep = jnp.dot(rep, dt, preferred_element_type=f32)            # (RN, E)
        du_rep = jnp.dot(rep, dt * u, preferred_element_type=f32)        # (RN, E)
        bc_rep = jnp.dot(rep, bc, preferred_element_type=f32)            # (RN, 2N)
        ones_bc = jnp.ones((2 * N, E), f32)
        b_bc = jnp.dot(bc_rep * fsl("selb"), ones_bc, preferred_element_type=f32)
        c_bc = jnp.dot(bc_rep * fsl("selc"), ones_bc, preferred_element_type=f32)
        da_scr[...] = jnp.exp(dt_rep * fsl(tag + "_arep"))
        dbu_scr[...] = b_bc * du_rep

        # ---- serial scan: one aligned (GB*N, E) FMA tile per time step ----
        step = GB * N
        h = jnp.zeros((step, E), f32)
        for t in range(L):                             # static unroll (L = 16)
            r0 = t * step
            h = da_scr[r0:r0 + step, :] * h + dbu_scr[r0:r0 + step, :]
            h_scr[r0:r0 + step, :] = h

        # ---- C-weighted readout hoisted out of the scan (one group-sum matmul) ----
        y = jnp.dot(gsum_ref[...], c_bc * h_scr[...], preferred_element_type=f32)
        y = y + bias[5:6, 0:E] * u                     # D skip connection
        y = y * (z * jax.nn.sigmoid(z))                # gate by SiLU(z)
        xr = x + mm(y, wsl(tag + "_out")) + bias[6:7, 0:D]               # residual

        # ---- head-specific tail ----
        t_out = mm(xr, wsl(tag + "_tail")) + bias[7:8, 0:dout]
        if power_norm:                                 # encoder: per-sample avg power
            s = t_out * t_out
            grp = jnp.dot(fsl("psum"), s, preferred_element_type=f32)    # group row sums
            p_tot = jnp.dot(grp, jnp.ones((dout, dout), f32),
                            preferred_element_type=f32) * (1.0 / (L * dout))
            t_out = t_out * lax.rsqrt(p_tot + 1e-8)
        else:                                          # decoder: pixel sigmoid
            t_out = jax.nn.sigmoid(t_out)
        return t_out

    tok = x_ref[...]                                   # (GBL, PATCH_DIM)
    zc = stage("enc", tok, gates_ref[0:1, :], KSYM, True)
    # The PyTorch forward feeds encoder output straight into the decoder
    # (no channel noise in MobileMambaNet.forward): consume zc directly.
    y = stage("dec", zc, gates_ref[1:2, :], PATCH_DIM, False)
    out_ref[...] = y


def _forward_pallas(layout, slabs, tok, gates):
    GB, GBL, RN = layout["GB"], layout["GBL"], layout["RN"]
    kernel = functools.partial(_jscc_kernel, layout)
    rows = BATCH * NTOK

    def full(a):
        return pl.BlockSpec(tuple(a.shape), lambda b: (0,) * a.ndim)

    return pl.pallas_call(
        kernel,
        out_shape=jax.ShapeDtypeStruct((rows, PATCH_DIM), jnp.float32),
        grid=(BATCH // GB,),
        in_specs=[
            pl.BlockSpec((GBL, PATCH_DIM), lambda b: (b, 0)),   # tokens
            full(gates),                                        # SNR gates (2, D)
            full(slabs["slab_w"]),                              # bf16 weight slab
            full(slabs["slab_f"]),                              # f32 struct/bias slab
            full(slabs["gsum"]),                                # group-sum readout
        ],
        out_specs=pl.BlockSpec((GBL, PATCH_DIM), lambda b: (b, 0)),
        scratch_shapes=[
            pltpu.VMEM((RN, EXPAND), jnp.float32),              # dA
            pltpu.VMEM((RN, EXPAND), jnp.float32),              # dB*u
            pltpu.VMEM((RN, EXPAND), jnp.float32),              # all scan states h_t
        ],
        compiler_params=pltpu.CompilerParams(
            dimension_semantics=("parallel",)),
    )(tok, gates, slabs["slab_w"], slabs["slab_f"], slabs["gsum"])


# ----------------------------- host-side glue ---------------------------------
def _snr_gates(snr, enc_sp, dec_sp):
    # ~100 FLOPs total: plain JAX (a pallas_call here would be launch overhead).
    s = jnp.asarray(snr, jnp.float32).reshape(1, 1)

    def gate(sp):
        h = jnp.maximum(jnp.dot(s, sp["W_s1"]) + sp["b_s1"], 0.0)
        return jax.nn.sigmoid(jnp.dot(h, sp["W_s2"]) + sp["b_s2"])

    return jnp.concatenate([gate(enc_sp), gate(dec_sp)], axis=0)          # (2, D)


def build_mobile_mamba_net(params, batch_per_step=None):
    """Builds a jitted forward; all weight prep / packing happens once, here."""
    gb = batch_per_step if batch_per_step is not None else _pick_batch_per_step()
    assert BATCH % gb == 0
    layout, slabs = _build_prepared(params, gb)
    enc_snr, dec_snr = params["encoder"]["snr"], params["decoder"]["snr"]

    @jax.jit
    def forward(x_img, snr):
        b = x_img.shape[0]
        tok = x_img.astype(jnp.float32).reshape(
            b, CIN, HIMG // PATCH, PATCH, WIMG // PATCH, PATCH)
        tok = tok.transpose(0, 2, 4, 1, 3, 5).reshape(b * NTOK, PATCH_DIM)
        gates = _snr_gates(snr, enc_snr, dec_snr)
        y = _forward_pallas(layout, slabs, tok, gates)
        y = y.reshape(b, HIMG // PATCH, WIMG // PATCH, CIN, PATCH, PATCH)
        y = y.transpose(0, 3, 1, 4, 2, 5).reshape(b, CIN, HIMG, WIMG)
        return y

    return forward


# ----------------------------- deterministic init -----------------------------
def _init(key, shape, scale=0.1):
    return (scale * jax.random.normal(key, shape)).astype(jnp.float32)


def init_mamba_params(key):
    ks = jax.random.split(key, 6)
    return dict(
        W_in=_init(ks[0], (DMODEL, 2 * EXPAND)),
        b_in=jnp.zeros((2 * EXPAND,), jnp.float32),
        conv_w=_init(ks[1], (KCONV, EXPAND)),
        conv_b=jnp.zeros((EXPAND,), jnp.float32),
        W_xproj=_init(ks[2], (EXPAND, DTRANK + 2 * NSTATE)),
        W_dt=_init(ks[3], (DTRANK, EXPAND)),
        b_dt=_init(ks[4], (EXPAND,), scale=0.01),
        A_log=jnp.log(
            jnp.tile(jnp.arange(1, NSTATE + 1, dtype=jnp.float32)[None, :], (EXPAND, 1))
        ),
        D_skip=jnp.ones((EXPAND,), jnp.float32),
        W_out=_init(ks[5], (EXPAND, DMODEL)),
        b_out=jnp.zeros((DMODEL,), jnp.float32),
    )


def init_snr_params(key):
    k1, k2 = jax.random.split(key)
    return dict(
        W_s1=_init(k1, (1, 16)), b_s1=jnp.zeros((16,), jnp.float32),
        W_s2=_init(k2, (16, DMODEL)), b_s2=jnp.zeros((DMODEL,), jnp.float32),
    )


def init_params(key):
    ke, kd = jax.random.split(key)
    kes = jax.random.split(ke, 4)
    kds = jax.random.split(kd, 4)
    enc = dict(
        W_embed=_init(kes[0], (PATCH_DIM, DMODEL)),
        b_embed=jnp.zeros((DMODEL,), jnp.float32),
        snr=init_snr_params(kes[1]),
        mamba=init_mamba_params(kes[2]),
        W_ch=_init(kes[3], (DMODEL, KSYM)),
        b_ch=jnp.zeros((KSYM,), jnp.float32),
    )
    dec = dict(
        W_dech=_init(kds[0], (KSYM, DMODEL)),
        b_dech=jnp.zeros((DMODEL,), jnp.float32),
        snr=init_snr_params(kds[1]),
        mamba=init_mamba_params(kds[2]),
        W_unpatch=_init(kds[3], (DMODEL, PATCH_DIM)),
        b_unpatch=jnp.zeros((PATCH_DIM,), jnp.float32),
    )
    return dict(encoder=enc, decoder=dec)


# ----------------------------- main --------------------------------------------
if __name__ == "__main__":
    class _Channel:
        SNR = 10.0

    class _Config:
        CHANNEL = _Channel()

    config = _Config()

    key = jax.random.PRNGKey(0)
    k_param, k_input = jax.random.split(key)
    params = init_params(k_param)
    x = jax.random.normal(k_input, (BATCH, CIN, HIMG, WIMG), jnp.float32)

    fwd = build_mobile_mamba_net(params)
    y = jax.block_until_ready(fwd(x, config.CHANNEL.SNR))

    assert y.shape == (BATCH, CIN, HIMG, WIMG), y.shape
    assert jnp.all(jnp.isfinite(y)), "non-finite output"
    print("KERNEL_OK")
</pallas_src>

<mosaic_0001>
module attributes {stable_mosaic.version = 11 : i64} {
  func.func @_jscc_kernel(%arg0: i32, %arg1: memref<32x48xf32, #tpu.memory_space<vmem>>, %arg2: memref<2x32xf32, #tpu.memory_space<vmem>>, %arg3: memref<640x128xbf16, #tpu.memory_space<vmem>>, %arg4: memref<1472x64xf32, #tpu.memory_space<vmem>>, %arg5: memref<32x256xf32, #tpu.memory_space<vmem>>, %arg6: memref<32x48xf32, #tpu.memory_space<vmem>>, %arg7: memref<256x64xf32, #tpu.memory_space<vmem>>, %arg8: memref<256x64xf32, #tpu.memory_space<vmem>>, %arg9: memref<256x64xf32, #tpu.memory_space<vmem>>) attributes {dimension_semantics = [#tpu.dimension_semantics<parallel>], iteration_bounds = array<i64: 1>, scalar_prefetch = 0 : i64, scratch_operands = 3 : i64, tpu.core_type = #tpu.core_type<tc>, window_params = [{transform_indices = @transform_0, window_bounds = array<i64: 32, 48>}, {pipeline_mode = #tpu.pipeline_mode<synchronous>, transform_indices = @transform_1, window_bounds = array<i64: 2, 32>}, {pipeline_mode = #tpu.pipeline_mode<synchronous>, transform_indices = @transform_2, window_bounds = array<i64: 640, 128>}, {pipeline_mode = #tpu.pipeline_mode<synchronous>, transform_indices = @transform_3, window_bounds = array<i64: 1472, 64>}, {pipeline_mode = #tpu.pipeline_mode<synchronous>, transform_indices = @transform_4, window_bounds = array<i64: 32, 256>}, {transform_indices = @transform_5, window_bounds = array<i64: 32, 48>}]} {
    %c0 = arith.constant 0 : index
    %c0_0 = arith.constant 0 : index
    %0 = vector.load %arg1[%c0, %c0_0] : memref<32x48xf32, #tpu.memory_space<vmem>>, vector<32x48xf32>
    %c0_1 = arith.constant 0 : index
    %c0_2 = arith.constant 0 : index
    %1 = vector.load %arg2[%c0_1, %c0_2] : memref<2x32xf32, #tpu.memory_space<vmem>>, vector<1x32xf32>
    %c1192 = arith.constant 1192 : index
    %c0_3 = arith.constant 0 : index
    %2 = vector.load %arg4[%c1192, %c0_3] : memref<1472x64xf32, #tpu.memory_space<vmem>>, vector<8x64xf32>
    %c0_4 = arith.constant 0 : index
    %c0_5 = arith.constant 0 : index
    %3 = vector.load %arg3[%c0_4, %c0_5] : memref<640x128xbf16, #tpu.memory_space<vmem>>, vector<48x32xbf16>
    %4 = arith.truncf %0 : vector<32x48xf32> to vector<32x48xbf16>
    %cst = arith.constant dense<0.000000e+00> : vector<32x32xf32>
    %5 = tpu.matmul %4, %3, %cst {dimension_numbers = #tpu.dot_dimension_numbers<[1], [0], [0], [1], [0, 0, 1, 1], [], []>} : vector<32x48xbf16>, vector<48x32xbf16>, vector<32x32xf32> -> vector<32x32xf32>
    %6 = vector.extract_strided_slice %2 {offsets = [0, 0], sizes = [1, 32], strides = [1, 1]} : vector<8x64xf32> to vector<1x32xf32>
    %7 = vector.broadcast %6 : vector<1x32xf32> to vector<32x32xf32>
    %8 = arith.addf %5, %7 : vector<32x32xf32>
    %9 = vector.broadcast %1 : vector<1x32xf32> to vector<32x32xf32>
    %10 = arith.mulf %8, %9 : vector<32x32xf32>
    %c48 = arith.constant 48 : index
    %c0_6 = arith.constant 0 : index
    %11 = vector.load %arg3[%c48, %c0_6] : memref<640x128xbf16, #tpu.memory_space<vmem>>, vector<32x64xbf16>
    %12 = arith.truncf %10 : vector<32x32xf32> to vector<32x32xbf16>
    %cst_7 = arith.constant dense<0.000000e+00> : vector<32x64xf32>
    %13 = tpu.matmul %12, %11, %cst_7 {dimension_numbers = #tpu.dot_dimension_numbers<[1], [0], [0], [1], [0, 0, 1, 1], [], []>} : vector<32x32xbf16>, vector<32x64xbf16>, vector<32x64xf32> -> vector<32x64xf32>
    %14 = vector.extract_strided_slice %2 {offsets = [1, 0], sizes = [1, 64], strides = [1, 1]} : vector<8x64xf32> to vector<1x64xf32>
    %15 = vector.broadcast %14 : vector<1x64xf32> to vector<32x64xf32>
    %16 = arith.addf %13, %15 : vector<32x64xf32>
    %c80 = arith.constant 80 : index
    %c0_8 = arith.constant 0 : index
    %17 = vector.load %arg3[%c80, %c0_8] : memref<640x128xbf16, #tpu.memory_space<vmem>>, vector<32x64xbf16>
    %18 = arith.truncf %10 : vector<32x32xf32> to vector<32x32xbf16>
    %cst_9 = arith.constant dense<0.000000e+00> : vector<32x64xf32>
    %19 = tpu.matmul %18, %17, %cst_9 {dimension_numbers = #tpu.dot_dimension_numbers<[1], [0], [0], [1], [0, 0, 1, 1], [], []>} : vector<32x32xbf16>, vector<32x64xbf16>, vector<32x64xf32> -> vector<32x64xf32>
    %20 = vector.extract_strided_slice %2 {offsets = [2, 0], sizes = [1, 64], strides = [1, 1]} : vector<8x64xf32> to vector<1x64xf32>
    %21 = vector.broadcast %20 : vector<1x64xf32> to vector<32x64xf32>
    %22 = arith.addf %19, %21 : vector<32x64xf32>
    %c1184 = arith.constant 1184 : index
    %c0_10 = arith.constant 0 : index
    %23 = vector.load %arg4[%c1184, %c0_10] : memref<1472x64xf32, #tpu.memory_space<vmem>>, vector<8x64xf32>
    %cst_11 = arith.constant 0.000000e+00 : f32
    %24 = vector.broadcast %cst_11 : f32 to vector<32x64xf32>
    %25 = vector.extract_strided_slice %2 {offsets = [3, 0], sizes = [1, 64], strides = [1, 1]} : vector<8x64xf32> to vector<1x64xf32>
    %26 = vector.broadcast %25 : vector<1x64xf32> to vector<32x64xf32>
    %27 = arith.addf %24, %26 : vector<32x64xf32>
    %c768 = arith.constant 768 : index
    %c0_12 = arith.constant 0 : index
    %28 = vector.load %arg4[%c768, %c0_12] : memref<1472x64xf32, #tpu.memory_space<vmem>>, vector<32x32xf32>
    %cst_13 = arith.constant dense<0.000000e+00> : vector<32x64xf32>
    %29 = tpu.matmul %28, %16, %cst_13 {dimension_numbers = #tpu.dot_dimension_numbers<[1], [0], [0], [1], [0, 0, 1, 1], [], []>} : vector<32x32xf32>, vector<32x64xf32>, vector<32x64xf32> -> vector<32x64xf32>
    %30 = vector.extract_strided_slice %23 {offsets = [0, 0], sizes = [1, 64], strides = [1, 1]} : vector<8x64xf32> to vector<1x64xf32>
    %31 = vector.broadcast %30 : vector<1x64xf32> to vector<32x64xf32>
    %32 = arith.mulf %29, %31 : vector<32x64xf32>
    %33 = arith.addf %27, %32 : vector<32x64xf32>
    %c800 = arith.constant 800 : index
    %c0_14 = arith.constant 0 : index
    %34 = vector.load %arg4[%c800, %c0_14] : memref<1472x64xf32, #tpu.memory_space<vmem>>, vector<32x32xf32>
    %cst_15 = arith.constant dense<0.000000e+00> : vector<32x64xf32>
    %35 = tpu.matmul %34, %16, %cst_15 {dimension_numbers = #tpu.dot_dimension_numbers<[1], [0], [0], [1], [0, 0, 1, 1], [], []>} : vector<32x32xf32>, vector<32x64xf32>, vector<32x64xf32> -> vector<32x64xf32>
    %36 = vector.extract_strided_slice %23 {offsets = [1, 0], sizes = [1, 64], strides = [1, 1]} : vector<8x64xf32> to vector<1x64xf32>
    %37 = vector.broadcast %36 : vector<1x64xf32> to vector<32x64xf32>
    %38 = arith.mulf %35, %37 : vector<32x64xf32>
    %39 = arith.addf %33, %38 : vector<32x64xf32>
    %c832 = arith.constant 832 : index
    %c0_16 = arith.constant 0 : index
    %40 = vector.load %arg4[%c832, %c0_16] : memref<1472x64xf32, #tpu.memory_space<vmem>>, vector<32x32xf32>
    %cst_17 = arith.constant dense<0.000000e+00> : vector<32x64xf32>
    %41 = tpu.matmul %40, %16, %cst_17 {dimension_numbers = #tpu.dot_dimension_numbers<[1], [0], [0], [1], [0, 0, 1, 1], [], []>} : vector<32x32xf32>, vector<32x64xf32>, vector<32x64xf32> -> vector<32x64xf32>
    %42 = vector.extract_strided_slice %23 {offsets = [2, 0], sizes = [1, 64], strides = [1, 1]} : vector<8x64xf32> to vector<1x64xf32>
    %43 = vector.broadcast %42 : vector<1x64xf32> to vector<32x64xf32>
    %44 = arith.mulf %41, %43 : vector<32x64xf32>
    %45 = arith.addf %39, %44 : vector<32x64xf32>
    %c864 = arith.constant 864 : index
    %c0_18 = arith.constant 0 : index
    %46 = vector.load %arg4[%c864, %c0_18] : memref<1472x64xf32, #tpu.memory_space<vmem>>, vector<32x32xf32>
    %cst_19 = arith.constant dense<0.000000e+00> : vector<32x64xf32>
    %47 = tpu.matmul %46, %16, %cst_19 {dimension_numbers = #tpu.dot_dimension_numbers<[1], [0], [0], [1], [0, 0, 1, 1], [], []>} : vector<32x32xf32>, vector<32x64xf32>, vector<32x64xf32> -> vector<32x64xf32>
    %48 = vector.extract_strided_slice %23 {offsets = [3, 0], sizes = [1, 64], strides = [1, 1]} : vector<8x64xf32> to vector<1x64xf32>
    %49 = vector.broadcast %48 : vector<1x64xf32> to vector<32x64xf32>
    %50 = arith.mulf %47, %49 : vector<32x64xf32>
    %51 = arith.addf %45, %50 : vector<32x64xf32>
    %52 = arith.negf %51 : vector<32x64xf32>
    %53 = math.exp %52 : vector<32x64xf32>
    %cst_20 = arith.constant 1.000000e+00 : f32
    %54 = vector.broadcast %cst_20 : f32 to vector<32x64xf32>
    %55 = arith.addf %54, %53 : vector<32x64xf32>
    %56 = arith.divf %54, %55 : vector<32x64xf32>
    %57 = arith.mulf %51, %56 : vector<32x64xf32>
    %c112 = arith.constant 112 : index
    %c0_21 = arith.constant 0 : index
    %58 = vector.load %arg3[%c112, %c0_21] : memref<640x128xbf16, #tpu.memory_space<vmem>>, vector<64x64xbf16>
    %59 = arith.truncf %57 : vector<32x64xf32> to vector<32x64xbf16>
    %cst_22 = arith.constant dense<0.000000e+00> : vector<32x64xf32>
    %60 = tpu.matmul %59, %58, %cst_22 {dimension_numbers = #tpu.dot_dimension_numbers<[1], [0], [0], [1], [0, 0, 1, 1], [], []>} : vector<32x64xbf16>, vector<64x64xbf16>, vector<32x64xf32> -> vector<32x64xf32>
    %61 = vector.extract_strided_slice %2 {offsets = [4, 0], sizes = [1, 64], strides = [1, 1]} : vector<8x64xf32> to vector<1x64xf32>
    %62 = vector.broadcast %61 : vector<1x64xf32> to vector<32x64xf32>
    %63 = arith.addf %60, %62 : vector<32x64xf32>
    %cst_23 = arith.constant 0.000000e+00 : f32
    %64 = vector.broadcast %cst_23 : f32 to vector<32x64xf32>
    %65 = arith.maximumf %63, %64 : vector<32x64xf32>
    %66 = math.absf %63 : vector<32x64xf32>
    %cst_24 = arith.constant 0.000000e+00 : f32
    %67 = vector.broadcast %cst_24 : f32 to vector<32x64xf32>
    %68 = arith.subf %67, %66 : vector<32x64xf32>
    %69 = math.exp %68 : vector<32x64xf32>
    %cst_25 = arith.constant 1.000000e+00 : f32
    %70 = vector.broadcast %cst_25 : f32 to vector<32x64xf32>
    %71 = arith.addf %70, %69 : vector<32x64xf32>
    %72 = math.log %71 : vector<32x64xf32>
    %73 = arith.addf %65, %72 : vector<32x64xf32>
    %c176 = arith.constant 176 : index
    %c0_26 = arith.constant 0 : index
    %74 = vector.load %arg3[%c176, %c0_26] : memref<640x128xbf16, #tpu.memory_space<vmem>>, vector<64x16xbf16>
    %75 = arith.truncf %57 : vector<32x64xf32> to vector<32x64xbf16>
    %cst_27 = arith.constant dense<0.000000e+00> : vector<32x16xf32>
    %76 = tpu.matmul %75, %74, %cst_27 {dimension_numbers = #tpu.dot_dimension_numbers<[1], [0], [0], [1], [0, 0, 1, 1], [], []>} : vector<32x64xbf16>, vector<64x16xbf16>, vector<32x16xf32> -> vector<32x16xf32>
    %c0_28 = arith.constant 0 : index
    %c0_29 = arith.constant 0 : index
    %77 = vector.load %arg4[%c0_28, %c0_29] : memref<1472x64xf32, #tpu.memory_space<vmem>>, vector<256x32xf32>
    %cst_30 = arith.constant dense<0.000000e+00> : vector<256x64xf32>
    %78 = tpu.matmul %77, %73, %cst_30 {dimension_numbers = #tpu.dot_dimension_numbers<[1], [0], [0], [1], [0, 0, 1, 1], [], []>} : vector<256x32xf32>, vector<32x64xf32>, vector<256x64xf32> -> vector<256x64xf32>
    %79 = arith.mulf %73, %57 : vector<32x64xf32>
    %cst_31 = arith.constant dense<0.000000e+00> : vector<256x64xf32>
    %80 = tpu.matmul %77, %79, %cst_31 {dimension_numbers = #tpu.dot_dimension_numbers<[1], [0], [0], [1], [0, 0, 1, 1], [], []>} : vector<256x32xf32>, vector<32x64xf32>, vector<256x64xf32> -> vector<256x64xf32>
    %cst_32 = arith.constant dense<0.000000e+00> : vector<256x16xf32>
    %81 = tpu.matmul %77, %76, %cst_32 {dimension_numbers = #tpu.dot_dimension_numbers<[1], [0], [0], [1], [0, 0, 1, 1], [], []>} : vector<256x32xf32>, vector<32x16xf32>, vector<256x16xf32> -> vector<256x16xf32>
    %cst_33 = arith.constant 1.000000e+00 : f32
    %82 = vector.broadcast %cst_33 : f32 to vector<16x64xf32>
    %c256 = arith.constant 256 : index
    %c0_34 = arith.constant 0 : index
    %83 = vector.load %arg4[%c256, %c0_34] : memref<1472x64xf32, #tpu.memory_space<vmem>>, vector<256x16xf32>
    %84 = arith.mulf %81, %83 : vector<256x16xf32>
    %cst_35 = arith.constant dense<0.000000e+00> : vector<256x64xf32>
    %85 = tpu.matmul %84, %82, %cst_35 {dimension_numbers = #tpu.dot_dimension_numbers<[1], [0], [0], [1], [0, 0, 1, 1], [], []>} : vector<256x16xf32>, vector<16x64xf32>, vector<256x64xf32> -> vector<256x64xf32>
    %c512 = arith.constant 512 : index
    %c0_36 = arith.constant 0 : index
    %86 = vector.load %arg4[%c512, %c0_36] : memref<1472x64xf32, #tpu.memory_space<vmem>>, vector<256x16xf32>
    %87 = arith.mulf %81, %86 : vector<256x16xf32>
    %cst_37 = arith.constant dense<0.000000e+00> : vector<256x64xf32>
    %88 = tpu.matmul %87, %82, %cst_37 {dimension_numbers = #tpu.dot_dimension_numbers<[1], [0], [0], [1], [0, 0, 1, 1], [], []>} : vector<256x16xf32>, vector<16x64xf32>, vector<256x64xf32> -> vector<256x64xf32>
    %c928 = arith.constant 928 : index
    %c0_38 = arith.constant 0 : index
    %89 = vector.load %arg4[%c928, %c0_38] : memref<1472x64xf32, #tpu.memory_space<vmem>>, vector<256x64xf32>
    %90 = arith.mulf %78, %89 : vector<256x64xf32>
    %91 = math.exp %90 : vector<256x64xf32>
    %c0_39 = arith.constant 0 : index
    %c0_40 = arith.constant 0 : index
    %92 = vector.load %arg7[%c0_39, %c0_40] : memref<256x64xf32, #tpu.memory_space<vmem>>, vector<256x64xf32>
    tpu.vector_store %arg7[%c0_39, %c0_40], %91 {strides = array<i32>} : memref<256x64xf32, #tpu.memory_space<vmem>>, vector<256x64xf32>,
    %93 = arith.mulf %85, %80 : vector<256x64xf32>
    %c0_41 = arith.constant 0 : index
    %c0_42 = arith.constant 0 : index
    %94 = vector.load %arg8[%c0_41, %c0_42] : memref<256x64xf32, #tpu.memory_space<vmem>>, vector<256x64xf32>
    tpu.vector_store %arg8[%c0_41, %c0_42], %93 {strides = array<i32>} : memref<256x64xf32, #tpu.memory_space<vmem>>, vector<256x64xf32>,
    %cst_43 = arith.constant 0.000000e+00 : f32
    %95 = vector.broadcast %cst_43 : f32 to vector<16x64xf32>
    %c0_44 = arith.constant 0 : index
    %c0_45 = arith.constant 0 : index
    %96 = vector.load %arg7[%c0_44, %c0_45] : memref<256x64xf32, #tpu.memory_space<vmem>>, vector<16x64xf32>
    %97 = arith.mulf %96, %95 : vector<16x64xf32>
    %c0_46 = arith.constant 0 : index
    %c0_47 = arith.constant 0 : index
    %98 = vector.load %arg8[%c0_46, %c0_47] : memref<256x64xf32, #tpu.memory_space<vmem>>, vector<16x64xf32>
    %99 = arith.addf %97, %98 : vector<16x64xf32>
    %c0_48 = arith.constant 0 : index
    %c0_49 = arith.constant 0 : index
    %100 = vector.load %arg9[%c0_48, %c0_49] : memref<256x64xf32, #tpu.memory_space<vmem>>, vector<16x64xf32>
    tpu.vector_store %arg9[%c0_48, %c0_49], %99 {strides = array<i32>} : memref<256x64xf32, #tpu.memory_space<vmem>>, vector<16x64xf32>,
    %c16 = arith.constant 16 : index
    %c0_50 = arith.constant 0 : index
    %101 = vector.load %arg7[%c16, %c0_50] : memref<256x64xf32, #tpu.memory_space<vmem>>, vector<16x64xf32>
    %102 = arith.mulf %101, %99 : vector<16x64xf32>
    %c16_51 = arith.constant 16 : index
    %c0_52 = arith.constant 0 : index
    %103 = vector.load %arg8[%c16_51, %c0_52] : memref<256x64xf32, #tpu.memory_space<vmem>>, vector<16x64xf32>
    %104 = arith.addf %102, %103 : vector<16x64xf32>
    %c16_53 = arith.constant 16 : index
    %c0_54 = arith.constant 0 : index
    %105 = vector.load %arg9[%c16_53, %c0_54] : memref<256x64xf32, #tpu.memory_space<vmem>>, vector<16x64xf32>
    tpu.vector_store %arg9[%c16_53, %c0_54], %104 {strides = array<i32>} : memref<256x64xf32, #tpu.memory_space<vmem>>, vector<16x64xf32>,
    %c32 = arith.constant 32 : index
    %c0_55 = arith.constant 0 : index
    %106 = vector.load %arg7[%c32, %c0_55] : memref<256x64xf32, #tpu.memory_space<vmem>>, vector<16x64xf32>
    %107 = arith.mulf %106, %104 : vector<16x64xf32>
    %c32_56 = arith.constant 32 : index
    %c0_57 = arith.constant 0 : index
    %108 = vector.load %arg8[%c32_56, %c0_57] : memref<256x64xf32, #tpu.memory_space<vmem>>, vector<16x64xf32>
    %109 = arith.addf %107, %108 : vector<16x64xf32>
    %c32_58 = arith.constant 32 : index
    %c0_59 = arith.constant 0 : index
    %110 = vector.load %arg9[%c32_58, %c0_59] : memref<256x64xf32, #tpu.memory_space<vmem>>, vector<16x64xf32>
    tpu.vector_store %arg9[%c32_58, %c0_59], %109 {strides = array<i32>} : memref<256x64xf32, #tpu.memory_space<vmem>>, vector<16x64xf32>,
    %c48_60 = arith.constant 48 : index
    %c0_61 = arith.constant 0 : index
    %111 = vector.load %arg7[%c48_60, %c0_61] : memref<256x64xf32, #tpu.memory_space<vmem>>, vector<16x64xf32>
    %112 = arith.mulf %111, %109 : vector<16x64xf32>
    %c48_62 = arith.constant 48 : index
    %c0_63 = arith.constant 0 : index
    %113 = vector.load %arg8[%c48_62, %c0_63] : memref<256x64xf32, #tpu.memory_space<vmem>>, vector<16x64xf32>
    %114 = arith.addf %112, %113 : vector<16x64xf32>
    %c48_64 = arith.constant 48 : index
    %c0_65 = arith.constant 0 : index
    %115 = vector.load %arg9[%c48_64, %c0_65] : memref<256x64xf32, #tpu.memory_space<vmem>>, vector<16x64xf32>
    tpu.vector_store %arg9[%c48_64, %c0_65], %114 {strides = array<i32>} : memref<256x64xf32, #tpu.memory_space<vmem>>, vector<16x64xf32>,
    %c64 = arith.constant 64 : index
    %c0_66 = arith.constant 0 : index
    %116 = vector.load %arg7[%c64, %c0_66] : memref<256x64xf32, #tpu.memory_space<vmem>>, vector<16x64xf32>
    %117 = arith.mulf %116, %114 : vector<16x64xf32>
    %c64_67 = arith.constant 64 : index
    %c0_68 = arith.constant 0 : index
    %118 = vector.load %arg8[%c64_67, %c0_68] : memref<256x64xf32, #tpu.memory_space<vmem>>, vector<16x64xf32>
    %119 = arith.addf %117, %118 : vector<16x64xf32>
    %c64_69 = arith.constant 64 : index
    %c0_70 = arith.constant 0 : index
    %120 = vector.load %arg9[%c64_69, %c0_70] : memref<256x64xf32, #tpu.memory_space<vmem>>, vector<16x64xf32>
    tpu.vector_store %arg9[%c64_69, %c0_70], %119 {strides = array<i32>} : memref<256x64xf32, #tpu.memory_space<vmem>>, vector<16x64xf32>,
    %c80_71 = arith.constant 80 : index
    %c0_72 = arith.constant 0 : index
    %121 = vector.load %arg7[%c80_71, %c0_72] : memref<256x64xf32, #tpu.memory_space<vmem>>, vector<16x64xf32>
    %122 = arith.mulf %121, %119 : vector<16x64xf32>
    %c80_73 = arith.constant 80 : index
    %c0_74 = arith.constant 0 : index
    %123 = vector.load %arg8[%c80_73, %c0_74] : memref<256x64xf32, #tpu.memory_space<vmem>>, vector<16x64xf32>
    %124 = arith.addf %122, %123 : vector<16x64xf32>
    %c80_75 = arith.constant 80 : index
    %c0_76 = arith.constant 0 : index
    %125 = vector.load %arg9[%c80_75, %c0_76] : memref<256x64xf32, #tpu.memory_space<vmem>>, vector<16x64xf32>
    tpu.vector_store %arg9[%c80_75, %c0_76], %124 {strides = array<i32>} : memref<256x64xf32, #tpu.memory_space<vmem>>, vector<16x64xf32>,
    %c96 = arith.constant 96 : index
    %c0_77 = arith.constant 0 : index
    %126 = vector.load %arg7[%c96, %c0_77] : memref<256x64xf32, #tpu.memory_space<vmem>>, vector<16x64xf32>
    %127 = arith.mulf %126, %124 : vector<16x64xf32>
    %c96_78 = arith.constant 96 : index
    %c0_79 = arith.constant 0 : index
    %128 = vector.load %arg8[%c96_78, %c0_79] : memref<256x64xf32, #tpu.memory_space<vmem>>, vector<16x64xf32>
    %129 = arith.addf %127, %128 : vector<16x64xf32>
    %c96_80 = arith.constant 96 : index
    %c0_81 = arith.constant 0 : index
    %130 = vector.load %arg9[%c96_80, %c0_81] : memref<256x64xf32, #tpu.memory_space<vmem>>, vector<16x64xf32>
    tpu.vector_store %arg9[%c96_80, %c0_81], %129 {strides = array<i32>} : memref<256x64xf32, #tpu.memory_space<vmem>>, vector<16x64xf32>,
    %c112_82 = arith.constant 112 : index
    %c0_83 = arith.constant 0 : index
    %131 = vector.load %arg7[%c112_82, %c0_83] : memref<256x64xf32, #tpu.memory_space<vmem>>, vector<16x64xf32>
    %132 = arith.mulf %131, %129 : vector<16x64xf32>
    %c112_84 = arith.constant 112 : index
    %c0_85 = arith.constant 0 : index
    %133 = vector.load %arg8[%c112_84, %c0_85] : memref<256x64xf32, #tpu.memory_space<vmem>>, vector<16x64xf32>
    %134 = arith.addf %132, %133 : vector<16x64xf32>
    %c112_86 = arith.constant 112 : index
    %c0_87 = arith.constant 0 : index
    %135 = vector.load %arg9[%c112_86, %c0_87] : memref<256x64xf32, #tpu.memory_space<vmem>>, vector<16x64xf32>
    tpu.vector_store %arg9[%c112_86, %c0_87], %134 {strides = array<i32>} : memref<256x64xf32, #tpu.memory_space<vmem>>, vector<16x64xf32>,
    %c128 = arith.constant 128 : index
    %c0_88 = arith.constant 0 : index
    %136 = vector.load %arg7[%c128, %c0_88] : memref<256x64xf32, #tpu.memory_space<vmem>>, vector<16x64xf32>
    %137 = arith.mulf %136, %134 : vector<16x64xf32>
    %c128_89 = arith.constant 128 : index
    %c0_90 = arith.constant 0 : index
    %138 = vector.load %arg8[%c128_89, %c0_90] : memref<256x64xf32, #tpu.memory_space<vmem>>, vector<16x64xf32>
    %139 = arith.addf %137, %138 : vector<16x64xf32>
    %c128_91 = arith.constant 128 : index
    %c0_92 = arith.constant 0 : index
    %140 = vector.load %arg9[%c128_91, %c0_92] : memref<256x64xf32, #tpu.memory_space<vmem>>, vector<16x64xf32>
    tpu.vector_store %arg9[%c128_91, %c0_92], %139 {strides = array<i32>} : memref<256x64xf32, #tpu.memory_space<vmem>>, vector<16x64xf32>,
    %c144 = arith.constant 144 : index
    %c0_93 = arith.constant 0 : index
    %141 = vector.load %arg7[%c144, %c0_93] : memref<256x64xf32, #tpu.memory_space<vmem>>, vector<16x64xf32>
    %142 = arith.mulf %141, %139 : vector<16x64xf32>
    %c144_94 = arith.constant 144 : index
    %c0_95 = arith.constant 0 : index
    %143 = vector.load %arg8[%c144_94, %c0_95] : memref<256x64xf32, #tpu.memory_space<vmem>>, vector<16x64xf32>
    %144 = arith.addf %142, %143 : vector<16x64xf32>
    %c144_96 = arith.constant 144 : index
    %c0_97 = arith.constant 0 : index
    %145 = vector.load %arg9[%c144_96, %c0_97] : memref<256x64xf32, #tpu.memory_space<vmem>>, vector<16x64xf32>
    tpu.vector_store %arg9[%c144_96, %c0_97], %144 {strides = array<i32>} : memref<256x64xf32, #tpu.memory_space<vmem>>, vector<16x64xf32>,
    %c160 = arith.constant 160 : index
    %c0_98 = arith.constant 0 : index
    %146 = vector.load %arg7[%c160, %c0_98] : memref<256x64xf32, #tpu.memory_space<vmem>>, vector<16x64xf32>
    %147 = arith.mulf %146, %144 : vector<16x64xf32>
    %c160_99 = arith.constant 160 : index
    %c0_100 = arith.constant 0 : index
    %148 = vector.load %arg8[%c160_99, %c0_100] : memref<256x64xf32, #tpu.memory_space<vmem>>, vector<16x64xf32>
    %149 = arith.addf %147, %148 : vector<16x64xf32>
    %c160_101 = arith.constant 160 : index
    %c0_102 = arith.constant 0 : index
    %150 = vector.load %arg9[%c160_101, %c0_102] : memref<256x64xf32, #tpu.memory_space<vmem>>, vector<16x64xf32>
    tpu.vector_store %arg9[%c160_101, %c0_102], %149 {strides = array<i32>} : memref<256x64xf32, #tpu.memory_space<vmem>>, vector<16x64xf32>,
    %c176_103 = arith.constant 176 : index
    %c0_104 = arith.constant 0 : index
    %151 = vector.load %arg7[%c176_103, %c0_104] : memref<256x64xf32, #tpu.memory_space<vmem>>, vector<16x64xf32>
    %152 = arith.mulf %151, %149 : vector<16x64xf32>
    %c176_105 = arith.constant 176 : index
    %c0_106 = arith.constant 0 : index
    %153 = vector.load %arg8[%c176_105, %c0_106] : memref<256x64xf32, #tpu.memory_space<vmem>>, vector<16x64xf32>
    %154 = arith.addf %152, %153 : vector<16x64xf32>
    %c176_107 = arith.constant 176 : index
    %c0_108 = arith.constant 0 : index
    %155 = vector.load %arg9[%c176_107, %c0_108] : memref<256x64xf32, #tpu.memory_space<vmem>>, vector<16x64xf32>
    tpu.vector_store %arg9[%c176_107, %c0_108], %154 {strides = array<i32>} : memref<256x64xf32, #tpu.memory_space<vmem>>, vector<16x64xf32>,
    %c192 = arith.constant 192 : index
    %c0_109 = arith.constant 0 : index
    %156 = vector.load %arg7[%c192, %c0_109] : memref<256x64xf32, #tpu.memory_space<vmem>>, vector<16x64xf32>
    %157 = arith.mulf %156, %154 : vector<16x64xf32>
    %c192_110 = arith.constant 192 : index
    %c0_111 = arith.constant 0 : index
    %158 = vector.load %arg8[%c192_110, %c0_111] : memref<256x64xf32, #tpu.memory_space<vmem>>, vector<16x64xf32>
    %159 = arith.addf %157, %158 : vector<16x64xf32>
    %c192_112 = arith.constant 192 : index
    %c0_113 = arith.constant 0 : index
    %160 = vector.load %arg9[%c192_112, %c0_113] : memref<256x64xf32, #tpu.memory_space<vmem>>, vector<16x64xf32>
    tpu.vector_store %arg9[%c192_112, %c0_113], %159 {strides = array<i32>} : memref<256x64xf32, #tpu.memory_space<vmem>>, vector<16x64xf32>,
    %c208 = arith.constant 208 : index
    %c0_114 = arith.constant 0 : index
    %161 = vector.load %arg7[%c208, %c0_114] : memref<256x64xf32, #tpu.memory_space<vmem>>, vector<16x64xf32>
    %162 = arith.mulf %161, %159 : vector<16x64xf32>
    %c208_115 = arith.constant 208 : index
    %c0_116 = arith.constant 0 : index
    %163 = vector.load %arg8[%c208_115, %c0_116] : memref<256x64xf32, #tpu.memory_space<vmem>>, vector<16x64xf32>
    %164 = arith.addf %162, %163 : vector<16x64xf32>
    %c208_117 = arith.constant 208 : index
    %c0_118 = arith.constant 0 : index
    %165 = vector.load %arg9[%c208_117, %c0_118] : memref<256x64xf32, #tpu.memory_space<vmem>>, vector<16x64xf32>
    tpu.vector_store %arg9[%c208_117, %c0_118], %164 {strides = array<i32>} : memref<256x64xf32, #tpu.memory_space<vmem>>, vector<16x64xf32>,
    %c224 = arith.constant 224 : index
    %c0_119 = arith.constant 0 : index
    %166 = vector.load %arg7[%c224, %c0_119] : memref<256x64xf32, #tpu.memory_space<vmem>>, vector<16x64xf32>
    %167 = arith.mulf %166, %164 : vector<16x64xf32>
    %c224_120 = arith.constant 224 : index
    %c0_121 = arith.constant 0 : index
    %168 = vector.load %arg8[%c224_120, %c0_121] : memref<256x64xf32, #tpu.memory_space<vmem>>, vector<16x64xf32>
    %169 = arith.addf %167, %168 : vector<16x64xf32>
    %c224_122 = arith.constant 224 : index
    %c0_123 = arith.constant 0 : index
    %170 = vector.load %arg9[%c224_122, %c0_123] : memref<256x64xf32, #tpu.memory_space<vmem>>, vector<16x64xf32>
    tpu.vector_store %arg9[%c224_122, %c0_123], %169 {strides = array<i32>} : memref<256x64xf32, #tpu.memory_space<vmem>>, vector<16x64xf32>,
    %c240 = arith.constant 240 : index
    %c0_124 = arith.constant 0 : index
    %171 = vector.load %arg7[%c240, %c0_124] : memref<256x64xf32, #tpu.memory_space<vmem>>, vector<16x64xf32>
    %172 = arith.mulf %171, %169 : vector<16x64xf32>
    %c240_125 = arith.constant 240 : index
    %c0_126 = arith.constant 0 : index
    %173 = vector.load %arg8[%c240_125, %c0_126] : memref<256x64xf32, #tpu.memory_space<vmem>>, vector<16x64xf32>
    %174 = arith.addf %172, %173 : vector<16x64xf32>
    %c240_127 = arith.constant 240 : index
    %c0_128 = arith.constant 0 : index
    %175 = vector.load %arg9[%c240_127, %c0_128] : memref<256x64xf32, #tpu.memory_space<vmem>>, vector<16x64xf32>
    tpu.vector_store %arg9[%c240_127, %c0_128], %174 {strides = array<i32>} : memref<256x64xf32, #tpu.memory_space<vmem>>, vector<16x64xf32>,
    %c0_129 = arith.constant 0 : index
    %c0_130 = arith.constant 0 : index
    %176 = vector.load %arg5[%c0_129, %c0_130] : memref<32x256xf32, #tpu.memory_space<vmem>>, vector<32x256xf32>
    %c0_131 = arith.constant 0 : index
    %c0_132 = arith.constant 0 : index
    %177 = vector.load %arg9[%c0_131, %c0_132] : memref<256x64xf32, #tpu.memory_space<vmem>>, vector<256x64xf32>
    %178 = arith.mulf %88, %177 : vector<256x64xf32>
    %cst_133 = arith.constant dense<0.000000e+00> : vector<32x64xf32>
    %179 = tpu.matmul %176, %178, %cst_133 {dimension_numbers = #tpu.dot_dimension_numbers<[1], [0], [0], [1], [0, 0, 1, 1], [], []>} : vector<32x256xf32>, vector<256x64xf32>, vector<32x64xf32> -> vector<32x64xf32>
    %180 = vector.extract_strided_slice %2 {offsets = [5, 0], sizes = [1, 64], strides = [1, 1]} : vector<8x64xf32> to vector<1x64xf32>
    %181 = vector.broadcast %180 : vector<1x64xf32> to vector<32x64xf32>
    %182 = arith.mulf %181, %57 : vector<32x64xf32>
    %183 = arith.addf %179, %182 : vector<32x64xf32>
    %184 = arith.negf %22 : vector<32x64xf32>
    %185 = math.exp %184 : vector<32x64xf32>
    %cst_134 = arith.constant 1.000000e+00 : f32
    %186 = vector.broadcast %cst_134 : f32 to vector<32x64xf32>
    %187 = arith.addf %186, %185 : vector<32x64xf32>
    %188 = arith.divf %186, %187 : vector<32x64xf32>
    %189 = arith.mulf %22, %188 : vector<32x64xf32>
    %190 = arith.mulf %183, %189 : vector<32x64xf32>
    %c240_135 = arith.constant 240 : index
    %c0_136 = arith.constant 0 : index
    %191 = vector.load %arg3[%c240_135, %c0_136] : memref<640x128xbf16, #tpu.memory_space<vmem>>, vector<64x32xbf16>
    %192 = arith.truncf %190 : vector<32x64xf32> to vector<32x64xbf16>
    %cst_137 = arith.constant dense<0.000000e+00> : vector<32x32xf32>
    %193 = tpu.matmul %192, %191, %cst_137 {dimension_numbers = #tpu.dot_dimension_numbers<[1], [0], [0], [1], [0, 0, 1, 1], [], []>} : vector<32x64xbf16>, vector<64x32xbf16>, vector<32x32xf32> -> vector<32x32xf32>
    %194 = arith.addf %10, %193 : vector<32x32xf32>
    %195 = vector.extract_strided_slice %2 {offsets = [6, 0], sizes = [1, 32], strides = [1, 1]} : vector<8x64xf32> to vector<1x32xf32>
    %196 = vector.broadcast %195 : vector<1x32xf32> to vector<32x32xf32>
    %197 = arith.addf %194, %196 : vector<32x32xf32>
    %c304 = arith.constant 304 : index
    %c0_138 = arith.constant 0 : index
    %198 = vector.load %arg3[%c304, %c0_138] : memref<640x128xbf16, #tpu.memory_space<vmem>>, vector<32x16xbf16>
    %199 = arith.truncf %197 : vector<32x32xf32> to vector<32x32xbf16>
    %cst_139 = arith.constant dense<0.000000e+00> : vector<32x16xf32>
    %200 = tpu.matmul %199, %198, %cst_139 {dimension_numbers = #tpu.dot_dimension_numbers<[1], [0], [0], [1], [0, 0, 1, 1], [], []>} : vector<32x32xbf16>, vector<32x16xbf16>, vector<32x16xf32> -> vector<32x16xf32>
    %201 = vector.extract_strided_slice %2 {offsets = [7, 0], sizes = [1, 16], strides = [1, 1]} : vector<8x64xf32> to vector<1x16xf32>
    %202 = vector.broadcast %201 : vector<1x16xf32> to vector<32x16xf32>
    %203 = arith.addf %200, %202 : vector<32x16xf32>
    %204 = arith.mulf %203, %203 : vector<32x16xf32>
    %c896 = arith.constant 896 : index
    %c0_140 = arith.constant 0 : index
    %205 = vector.load %arg4[%c896, %c0_140] : memref<1472x64xf32, #tpu.memory_space<vmem>>, vector<32x32xf32>
    %cst_141 = arith.constant dense<0.000000e+00> : vector<32x16xf32>
    %206 = tpu.matmul %205, %204, %cst_141 {dimension_numbers = #tpu.dot_dimension_numbers<[1], [0], [0], [1], [0, 0, 1, 1], [], []>} : vector<32x32xf32>, vector<32x16xf32>, vector<32x16xf32> -> vector<32x16xf32>
    %cst_142 = arith.constant 1.000000e+00 : f32
    %207 = vector.broadcast %cst_142 : f32 to vector<16x16xf32>
    %cst_143 = arith.constant dense<0.000000e+00> : vector<32x16xf32>
    %208 = tpu.matmul %206, %207, %cst_143 {dimension_numbers = #tpu.dot_dimension_numbers<[1], [0], [0], [1], [0, 0, 1, 1], [], []>} : vector<32x16xf32>, vector<16x16xf32>, vector<32x16xf32> -> vector<32x16xf32>
    %cst_144 = arith.constant 3.906250e-03 : f32
    %209 = vector.broadcast %cst_144 : f32 to vector<32x16xf32>
    %210 = arith.mulf %208, %209 : vector<32x16xf32>
    %cst_145 = arith.constant 9.99999993E-9 : f32
    %211 = vector.broadcast %cst_145 : f32 to vector<32x16xf32>
    %212 = arith.addf %210, %211 : vector<32x16xf32>
    %213 = math.rsqrt %212 : vector<32x16xf32>
    %214 = arith.mulf %203, %213 : vector<32x16xf32>
    %c1 = arith.constant 1 : index
    %c0_146 = arith.constant 0 : index
    %215 = vector.load %arg2[%c1, %c0_146] : memref<2x32xf32, #tpu.memory_space<vmem>>, vector<1x32xf32>
    %c1464 = arith.constant 1464 : index
    %c0_147 = arith.constant 0 : index
    %216 = vector.load %arg4[%c1464, %c0_147] : memref<1472x64xf32, #tpu.memory_space<vmem>>, vector<8x64xf32>
    %c336 = arith.constant 336 : index
    %c0_148 = arith.constant 0 : index
    %217 = vector.load %arg3[%c336, %c0_148] : memref<640x128xbf16, #tpu.memory_space<vmem>>, vector<16x32xbf16>
    %218 = arith.truncf %214 : vector<32x16xf32> to vector<32x16xbf16>
    %cst_149 = arith.constant dense<0.000000e+00> : vector<32x32xf32>
    %219 = tpu.matmul %218, %217, %cst_149 {dimension_numbers = #tpu.dot_dimension_numbers<[1], [0], [0], [1], [0, 0, 1, 1], [], []>} : vector<32x16xbf16>, vector<16x32xbf16>, vector<32x32xf32> -> vector<32x32xf32>
    %220 = vector.extract_strided_slice %216 {offsets = [0, 0], sizes = [1, 32], strides = [1, 1]} : vector<8x64xf32> to vector<1x32xf32>
    %221 = vector.broadcast %220 : vector<1x32xf32> to vector<32x32xf32>
    %222 = arith.addf %219, %221 : vector<32x32xf32>
    %223 = vector.broadcast %215 : vector<1x32xf32> to vector<32x32xf32>
    %224 = arith.mulf %222, %223 : vector<32x32xf32>
    %c352 = arith.constant 352 : index
    %c0_150 = arith.constant 0 : index
    %225 = vector.load %arg3[%c352, %c0_150] : memref<640x128xbf16, #tpu.memory_space<vmem>>, vector<32x64xbf16>
    %226 = arith.truncf %224 : vector<32x32xf32> to vector<32x32xbf16>
    %cst_151 = arith.constant dense<0.000000e+00> : vector<32x64xf32>
    %227 = tpu.matmul %226, %225, %cst_151 {dimension_numbers = #tpu.dot_dimension_numbers<[1], [0], [0], [1], [0, 0, 1, 1], [], []>} : vector<32x32xbf16>, vector<32x64xbf16>, vector<32x64xf32> -> vector<32x64xf32>
    %228 = vector.extract_strided_slice %216 {offsets = [1, 0], sizes = [1, 64], strides = [1, 1]} : vector<8x64xf32> to vector<1x64xf32>
    %229 = vector.broadcast %228 : vector<1x64xf32> to vector<32x64xf32>
    %230 = arith.addf %227, %229 : vector<32x64xf32>
    %c384 = arith.constant 384 : index
    %c0_152 = arith.constant 0 : index
    %231 = vector.load %arg3[%c384, %c0_152] : memref<640x128xbf16, #tpu.memory_space<vmem>>, vector<32x64xbf16>
    %232 = arith.truncf %224 : vector<32x32xf32> to vector<32x32xbf16>
    %cst_153 = arith.constant dense<0.000000e+00> : vector<32x64xf32>
    %233 = tpu.matmul %232, %231, %cst_153 {dimension_numbers = #tpu.dot_dimension_numbers<[1], [0], [0], [1], [0, 0, 1, 1], [], []>} : vector<32x32xbf16>, vector<32x64xbf16>, vector<32x64xf32> -> vector<32x64xf32>
    %234 = vector.extract_strided_slice %216 {offsets = [2, 0], sizes = [1, 64], strides = [1, 1]} : vector<8x64xf32> to vector<1x64xf32>
    %235 = vector.broadcast %234 : vector<1x64xf32> to vector<32x64xf32>
    %236 = arith.addf %233, %235 : vector<32x64xf32>
    %c1456 = arith.constant 1456 : index
    %c0_154 = arith.constant 0 : index
    %237 = vector.load %arg4[%c1456, %c0_154] : memref<1472x64xf32, #tpu.memory_space<vmem>>, vector<8x64xf32>
    %cst_155 = arith.constant 0.000000e+00 : f32
    %238 = vector.broadcast %cst_155 : f32 to vector<32x64xf32>
    %239 = vector.extract_strided_slice %216 {offsets = [3, 0], sizes = [1, 64], strides = [1, 1]} : vector<8x64xf32> to vector<1x64xf32>
    %240 = vector.broadcast %239 : vector<1x64xf32> to vector<32x64xf32>
    %241 = arith.addf %238, %240 : vector<32x64xf32>
    %c768_156 = arith.constant 768 : index
    %c0_157 = arith.constant 0 : index
    %242 = vector.load %arg4[%c768_156, %c0_157] : memref<1472x64xf32, #tpu.memory_space<vmem>>, vector<32x32xf32>
    %cst_158 = arith.constant dense<0.000000e+00> : vector<32x64xf32>
    %243 = tpu.matmul %242, %230, %cst_158 {dimension_numbers = #tpu.dot_dimension_numbers<[1], [0], [0], [1], [0, 0, 1, 1], [], []>} : vector<32x32xf32>, vector<32x64xf32>, vector<32x64xf32> -> vector<32x64xf32>
    %244 = vector.extract_strided_slice %237 {offsets = [0, 0], sizes = [1, 64], strides = [1, 1]} : vector<8x64xf32> to vector<1x64xf32>
    %245 = vector.broadcast %244 : vector<1x64xf32> to vector<32x64xf32>
    %246 = arith.mulf %243, %245 : vector<32x64xf32>
    %247 = arith.addf %241, %246 : vector<32x64xf32>
    %c800_159 = arith.constant 800 : index
    %c0_160 = arith.constant 0 : index
    %248 = vector.load %arg4[%c800_159, %c0_160] : memref<1472x64xf32, #tpu.memory_space<vmem>>, vector<32x32xf32>
    %cst_161 = arith.constant dense<0.000000e+00> : vector<32x64xf32>
    %249 = tpu.matmul %248, %230, %cst_161 {dimension_numbers = #tpu.dot_dimension_numbers<[1], [0], [0], [1], [0, 0, 1, 1], [], []>} : vector<32x32xf32>, vector<32x64xf32>, vector<32x64xf32> -> vector<32x64xf32>
    %250 = vector.extract_strided_slice %237 {offsets = [1, 0], sizes = [1, 64], strides = [1, 1]} : vector<8x64xf32> to vector<1x64xf32>
    %251 = vector.broadcast %250 : vector<1x64xf32> to vector<32x64xf32>
    %252 = arith.mulf %249, %251 : vector<32x64xf32>
    %253 = arith.addf %247, %252 : vector<32x64xf32>
    %c832_162 = arith.constant 832 : index
    %c0_163 = arith.constant 0 : index
    %254 = vector.load %arg4[%c832_162, %c0_163] : memref<1472x64xf32, #tpu.memory_space<vmem>>, vector<32x32xf32>
    %cst_164 = arith.constant dense<0.000000e+00> : vector<32x64xf32>
    %255 = tpu.matmul %254, %230, %cst_164 {dimension_numbers = #tpu.dot_dimension_numbers<[1], [0], [0], [1], [0, 0, 1, 1], [], []>} : vector<32x32xf32>, vector<32x64xf32>, vector<32x64xf32> -> vector<32x64xf32>
    %256 = vector.extract_strided_slice %237 {offsets = [2, 0], sizes = [1, 64], strides = [1, 1]} : vector<8x64xf32> to vector<1x64xf32>
    %257 = vector.broadcast %256 : vector<1x64xf32> to vector<32x64xf32>
    %258 = arith.mulf %255, %257 : vector<32x64xf32>
    %259 = arith.addf %253, %258 : vector<32x64xf32>
    %c864_165 = arith.constant 864 : index
    %c0_166 = arith.constant 0 : index
    %260 = vector.load %arg4[%c864_165, %c0_166] : memref<1472x64xf32, #tpu.memory_space<vmem>>, vector<32x32xf32>
    %cst_167 = arith.constant dense<0.000000e+00> : vector<32x64xf32>
    %261 = tpu.matmul %260, %230, %cst_167 {dimension_numbers = #tpu.dot_dimension_numbers<[1], [0], [0], [1], [0, 0, 1, 1], [], []>} : vector<32x32xf32>, vector<32x64xf32>, vector<32x64xf32> -> vector<32x64xf32>
    %262 = vector.extract_strided_slice %237 {offsets = [3, 0], sizes = [1, 64], strides = [1, 1]} : vector<8x64xf32> to vector<1x64xf32>
    %263 = vector.broadcast %262 : vector<1x64xf32> to vector<32x64xf32>
    %264 = arith.mulf %261, %263 : vector<32x64xf32>
    %265 = arith.addf %259, %264 : vector<32x64xf32>
    %266 = arith.negf %265 : vector<32x64xf32>
    %267 = math.exp %266 : vector<32x64xf32>
    %cst_168 = arith.constant 1.000000e+00 : f32
    %268 = vector.broadcast %cst_168 : f32 to vector<32x64xf32>
    %269 = arith.addf %268, %267 : vector<32x64xf32>
    %270 = arith.divf %268, %269 : vector<32x64xf32>
    %271 = arith.mulf %265, %270 : vector<32x64xf32>
    %c416 = arith.constant 416 : index
    %c0_169 = arith.constant 0 : index
    %272 = vector.load %arg3[%c416, %c0_169] : memref<640x128xbf16, #tpu.memory_space<vmem>>, vector<64x64xbf16>
    %273 = arith.truncf %271 : vector<32x64xf32> to vector<32x64xbf16>
    %cst_170 = arith.constant dense<0.000000e+00> : vector<32x64xf32>
    %274 = tpu.matmul %273, %272, %cst_170 {dimension_numbers = #tpu.dot_dimension_numbers<[1], [0], [0], [1], [0, 0, 1, 1], [], []>} : vector<32x64xbf16>, vector<64x64xbf16>, vector<32x64xf32> -> vector<32x64xf32>
    %275 = vector.extract_strided_slice %216 {offsets = [4, 0], sizes = [1, 64], strides = [1, 1]} : vector<8x64xf32> to vector<1x64xf32>
    %276 = vector.broadcast %275 : vector<1x64xf32> to vector<32x64xf32>
    %277 = arith.addf %274, %276 : vector<32x64xf32>
    %cst_171 = arith.constant 0.000000e+00 : f32
    %278 = vector.broadcast %cst_171 : f32 to vector<32x64xf32>
    %279 = arith.maximumf %277, %278 : vector<32x64xf32>
    %280 = math.absf %277 : vector<32x64xf32>
    %cst_172 = arith.constant 0.000000e+00 : f32
    %281 = vector.broadcast %cst_172 : f32 to vector<32x64xf32>
    %282 = arith.subf %281, %280 : vector<32x64xf32>
    %283 = math.exp %282 : vector<32x64xf32>
    %cst_173 = arith.constant 1.000000e+00 : f32
    %284 = vector.broadcast %cst_173 : f32 to vector<32x64xf32>
    %285 = arith.addf %284, %283 : vector<32x64xf32>
    %286 = math.log %285 : vector<32x64xf32>
    %287 = arith.addf %279, %286 : vector<32x64xf32>
    %c480 = arith.constant 480 : index
    %c0_174 = arith.constant 0 : index
    %288 = vector.load %arg3[%c480, %c0_174] : memref<640x128xbf16, #tpu.memory_space<vmem>>, vector<64x16xbf16>
    %289 = arith.truncf %271 : vector<32x64xf32> to vector<32x64xbf16>
    %cst_175 = arith.constant dense<0.000000e+00> : vector<32x16xf32>
    %290 = tpu.matmul %289, %288, %cst_175 {dimension_numbers = #tpu.dot_dimension_numbers<[1], [0], [0], [1], [0, 0, 1, 1], [], []>} : vector<32x64xbf16>, vector<64x16xbf16>, vector<32x16xf32> -> vector<32x16xf32>
    %c0_176 = arith.constant 0 : index
    %c0_177 = arith.constant 0 : index
    %291 = vector.load %arg4[%c0_176, %c0_177] : memref<1472x64xf32, #tpu.memory_space<vmem>>, vector<256x32xf32>
    %cst_178 = arith.constant dense<0.000000e+00> : vector<256x64xf32>
    %292 = tpu.matmul %291, %287, %cst_178 {dimension_numbers = #tpu.dot_dimension_numbers<[1], [0], [0], [1], [0, 0, 1, 1], [], []>} : vector<256x32xf32>, vector<32x64xf32>, vector<256x64xf32> -> vector<256x64xf32>
    %293 = arith.mulf %287, %271 : vector<32x64xf32>
    %cst_179 = arith.constant dense<0.000000e+00> : vector<256x64xf32>
    %294 = tpu.matmul %291, %293, %cst_179 {dimension_numbers = #tpu.dot_dimension_numbers<[1], [0], [0], [1], [0, 0, 1, 1], [], []>} : vector<256x32xf32>, vector<32x64xf32>, vector<256x64xf32> -> vector<256x64xf32>
    %cst_180 = arith.constant dense<0.000000e+00> : vector<256x16xf32>
    %295 = tpu.matmul %291, %290, %cst_180 {dimension_numbers = #tpu.dot_dimension_numbers<[1], [0], [0], [1], [0, 0, 1, 1], [], []>} : vector<256x32xf32>, vector<32x16xf32>, vector<256x16xf32> -> vector<256x16xf32>
    %cst_181 = arith.constant 1.000000e+00 : f32
    %296 = vector.broadcast %cst_181 : f32 to vector<16x64xf32>
    %c256_182 = arith.constant 256 : index
    %c0_183 = arith.constant 0 : index
    %297 = vector.load %arg4[%c256_182, %c0_183] : memref<1472x64xf32, #tpu.memory_space<vmem>>, vector<256x16xf32>
    %298 = arith.mulf %295, %297 : vector<256x16xf32>
    %cst_184 = arith.constant dense<0.000000e+00> : vector<256x64xf32>
    %299 = tpu.matmul %298, %296, %cst_184 {dimension_numbers = #tpu.dot_dimension_numbers<[1], [0], [0], [1], [0, 0, 1, 1], [], []>} : vector<256x16xf32>, vector<16x64xf32>, vector<256x64xf32> -> vector<256x64xf32>
    %c512_185 = arith.constant 512 : index
    %c0_186 = arith.constant 0 : index
    %300 = vector.load %arg4[%c512_185, %c0_186] : memref<1472x64xf32, #tpu.memory_space<vmem>>, vector<256x16xf32>
    %301 = arith.mulf %295, %300 : vector<256x16xf32>
    %cst_187 = arith.constant dense<0.000000e+00> : vector<256x64xf32>
    %302 = tpu.matmul %301, %296, %cst_187 {dimension_numbers = #tpu.dot_dimension_numbers<[1], [0], [0], [1], [0, 0, 1, 1], [], []>} : vector<256x16xf32>, vector<16x64xf32>, vector<256x64xf32> -> vector<256x64xf32>
    %c1200 = arith.constant 1200 : index
    %c0_188 = arith.constant 0 : index
    %303 = vector.load %arg4[%c1200, %c0_188] : memref<1472x64xf32, #tpu.memory_space<vmem>>, vector<256x64xf32>
    %304 = arith.mulf %292, %303 : vector<256x64xf32>
    %305 = math.exp %304 : vector<256x64xf32>
    %c0_189 = arith.constant 0 : index
    %c0_190 = arith.constant 0 : index
    %306 = vector.load %arg7[%c0_189, %c0_190] : memref<256x64xf32, #tpu.memory_space<vmem>>, vector<256x64xf32>
    tpu.vector_store %arg7[%c0_189, %c0_190], %305 {strides = array<i32>} : memref<256x64xf32, #tpu.memory_space<vmem>>, vector<256x64xf32>,
    %307 = arith.mulf %299, %294 : vector<256x64xf32>
    %c0_191 = arith.constant 0 : index
    %c0_192 = arith.constant 0 : index
    %308 = vector.load %arg8[%c0_191, %c0_192] : memref<256x64xf32, #tpu.memory_space<vmem>>, vector<256x64xf32>
    tpu.vector_store %arg8[%c0_191, %c0_192], %307 {strides = array<i32>} : memref<256x64xf32, #tpu.memory_space<vmem>>, vector<256x64xf32>,
    %cst_193 = arith.constant 0.000000e+00 : f32
    %309 = vector.broadcast %cst_193 : f32 to vector<16x64xf32>
    %c0_194 = arith.constant 0 : index
    %c0_195 = arith.constant 0 : index
    %310 = vector.load %arg7[%c0_194, %c0_195] : memref<256x64xf32, #tpu.memory_space<vmem>>, vector<16x64xf32>
    %311 = arith.mulf %310, %309 : vector<16x64xf32>
    %c0_196 = arith.constant 0 : index
    %c0_197 = arith.constant 0 : index
    %312 = vector.load %arg8[%c0_196, %c0_197] : memref<256x64xf32, #tpu.memory_space<vmem>>, vector<16x64xf32>
    %313 = arith.addf %311, %312 : vector<16x64xf32>
    %c0_198 = arith.constant 0 : index
    %c0_199 = arith.constant 0 : index
    %314 = vector.load %arg9[%c0_198, %c0_199] : memref<256x64xf32, #tpu.memory_space<vmem>>, vector<16x64xf32>
    tpu.vector_store %arg9[%c0_198, %c0_199], %313 {strides = array<i32>} : memref<256x64xf32, #tpu.memory_space<vmem>>, vector<16x64xf32>,
    %c16_200 = arith.constant 16 : index
    %c0_201 = arith.constant 0 : index
    %315 = vector.load %arg7[%c16_200, %c0_201] : memref<256x64xf32, #tpu.memory_space<vmem>>, vector<16x64xf32>
    %316 = arith.mulf %315, %313 : vector<16x64xf32>
    %c16_202 = arith.constant 16 : index
    %c0_203 = arith.constant 0 : index
    %317 = vector.load %arg8[%c16_202, %c0_203] : memref<256x64xf32, #tpu.memory_space<vmem>>, vector<16x64xf32>
    %318 = arith.addf %316, %317 : vector<16x64xf32>
    %c16_204 = arith.constant 16 : index
    %c0_205 = arith.constant 0 : index
    %319 = vector.load %arg9[%c16_204, %c0_205] : memref<256x64xf32, #tpu.memory_space<vmem>>, vector<16x64xf32>
    tpu.vector_store %arg9[%c16_204, %c0_205], %318 {strides = array<i32>} : memref<256x64xf32, #tpu.memory_space<vmem>>, vector<16x64xf32>,
    %c32_206 = arith.constant 32 : index
    %c0_207 = arith.constant 0 : index
    %320 = vector.load %arg7[%c32_206, %c0_207] : memref<256x64xf32, #tpu.memory_space<vmem>>, vector<16x64xf32>
    %321 = arith.mulf %320, %318 : vector<16x64xf32>
    %c32_208 = arith.constant 32 : index
    %c0_209 = arith.constant 0 : index
    %322 = vector.load %arg8[%c32_208, %c0_209] : memref<256x64xf32, #tpu.memory_space<vmem>>, vector<16x64xf32>
    %323 = arith.addf %321, %322 : vector<16x64xf32>
    %c32_210 = arith.constant 32 : index
    %c0_211 = arith.constant 0 : index
    %324 = vector.load %arg9[%c32_210, %c0_211] : memref<256x64xf32, #tpu.memory_space<vmem>>, vector<16x64xf32>
    tpu.vector_store %arg9[%c32_210, %c0_211], %323 {strides = array<i32>} : memref<256x64xf32, #tpu.memory_space<vmem>>, vector<16x64xf32>,
    %c48_212 = arith.constant 48 : index
    %c0_213 = arith.constant 0 : index
    %325 = vector.load %arg7[%c48_212, %c0_213] : memref<256x64xf32, #tpu.memory_space<vmem>>, vector<16x64xf32>
    %326 = arith.mulf %325, %323 : vector<16x64xf32>
    %c48_214 = arith.constant 48 : index
    %c0_215 = arith.constant 0 : index
    %327 = vector.load %arg8[%c48_214, %c0_215] : memref<256x64xf32, #tpu.memory_space<vmem>>, vector<16x64xf32>
    %328 = arith.addf %326, %327 : vector<16x64xf32>
    %c48_216 = arith.constant 48 : index
    %c0_217 = arith.constant 0 : index
    %329 = vector.load %arg9[%c48_216, %c0_217] : memref<256x64xf32, #tpu.memory_space<vmem>>, vector<16x64xf32>
    tpu.vector_store %arg9[%c48_216, %c0_217], %328 {strides = array<i32>} : memref<256x64xf32, #tpu.memory_space<vmem>>, vector<16x64xf32>,
    %c64_218 = arith.constant 64 : index
    %c0_219 = arith.constant 0 : index
    %330 = vector.load %arg7[%c64_218, %c0_219] : memref<256x64xf32, #tpu.memory_space<vmem>>, vector<16x64xf32>
    %331 = arith.mulf %330, %328 : vector<16x64xf32>
    %c64_220 = arith.constant 64 : index
    %c0_221 = arith.constant 0 : index
    %332 = vector.load %arg8[%c64_220, %c0_221] : memref<256x64xf32, #tpu.memory_space<vmem>>, vector<16x64xf32>
    %333 = arith.addf %331, %332 : vector<16x64xf32>
    %c64_222 = arith.constant 64 : index
    %c0_223 = arith.constant 0 : index
    %334 = vector.load %arg9[%c64_222, %c0_223] : memref<256x64xf32, #tpu.memory_space<vmem>>, vector<16x64xf32>
    tpu.vector_store %arg9[%c64_222, %c0_223], %333 {strides = array<i32>} : memref<256x64xf32, #tpu.memory_space<vmem>>, vector<16x64xf32>,
    %c80_224 = arith.constant 80 : index
    %c0_225 = arith.constant 0 : index
    %335 = vector.load %arg7[%c80_224, %c0_225] : memref<256x64xf32, #tpu.memory_space<vmem>>, vector<16x64xf32>
    %336 = arith.mulf %335, %333 : vector<16x64xf32>
    %c80_226 = arith.constant 80 : index
    %c0_227 = arith.constant 0 : index
    %337 = vector.load %arg8[%c80_226, %c0_227] : memref<256x64xf32, #tpu.memory_space<vmem>>, vector<16x64xf32>
    %338 = arith.addf %336, %337 : vector<16x64xf32>
    %c80_228 = arith.constant 80 : index
    %c0_229 = arith.constant 0 : index
    %339 = vector.load %arg9[%c80_228, %c0_229] : memref<256x64xf32, #tpu.memory_space<vmem>>, vector<16x64xf32>
    tpu.vector_store %arg9[%c80_228, %c0_229], %338 {strides = array<i32>} : memref<256x64xf32, #tpu.memory_space<vmem>>, vector<16x64xf32>,
    %c96_230 = arith.constant 96 : index
    %c0_231 = arith.constant 0 : index
    %340 = vector.load %arg7[%c96_230, %c0_231] : memref<256x64xf32, #tpu.memory_space<vmem>>, vector<16x64xf32>
    %341 = arith.mulf %340, %338 : vector<16x64xf32>
    %c96_232 = arith.constant 96 : index
    %c0_233 = arith.constant 0 : index
    %342 = vector.load %arg8[%c96_232, %c0_233] : memref<256x64xf32, #tpu.memory_space<vmem>>, vector<16x64xf32>
    %343 = arith.addf %341, %342 : vector<16x64xf32>
    %c96_234 = arith.constant 96 : index
    %c0_235 = arith.constant 0 : index
    %344 = vector.load %arg9[%c96_234, %c0_235] : memref<256x64xf32, #tpu.memory_space<vmem>>, vector<16x64xf32>
    tpu.vector_store %arg9[%c96_234, %c0_235], %343 {strides = array<i32>} : memref<256x64xf32, #tpu.memory_space<vmem>>, vector<16x64xf32>,
    %c112_236 = arith.constant 112 : index
    %c0_237 = arith.constant 0 : index
    %345 = vector.load %arg7[%c112_236, %c0_237] : memref<256x64xf32, #tpu.memory_space<vmem>>, vector<16x64xf32>
    %346 = arith.mulf %345, %343 : vector<16x64xf32>
    %c112_238 = arith.constant 112 : index
    %c0_239 = arith.constant 0 : index
    %347 = vector.load %arg8[%c112_238, %c0_239] : memref<256x64xf32, #tpu.memory_space<vmem>>, vector<16x64xf32>
    %348 = arith.addf %346, %347 : vector<16x64xf32>
    %c112_240 = arith.constant 112 : index
    %c0_241 = arith.constant 0 : index
    %349 = vector.load %arg9[%c112_240, %c0_241] : memref<256x64xf32, #tpu.memory_space<vmem>>, vector<16x64xf32>
    tpu.vector_store %arg9[%c112_240, %c0_241], %348 {strides = array<i32>} : memref<256x64xf32, #tpu.memory_space<vmem>>, vector<16x64xf32>,
    %c128_242 = arith.constant 128 : index
    %c0_243 = arith.constant 0 : index
    %350 = vector.load %arg7[%c128_242, %c0_243] : memref<256x64xf32, #tpu.memory_space<vmem>>, vector<16x64xf32>
    %351 = arith.mulf %350, %348 : vector<16x64xf32>
    %c128_244 = arith.constant 128 : index
    %c0_245 = arith.constant 0 : index
    %352 = vector.load %arg8[%c128_244, %c0_245] : memref<256x64xf32, #tpu.memory_space<vmem>>, vector<16x64xf32>
    %353 = arith.addf %351, %352 : vector<16x64xf32>
    %c128_246 = arith.constant 128 : index
    %c0_247 = arith.constant 0 : index
    %354 = vector.load %arg9[%c128_246, %c0_247] : memref<256x64xf32, #tpu.memory_space<vmem>>, vector<16x64xf32>
    tpu.vector_store %arg9[%c128_246, %c0_247], %353 {strides = array<i32>} : memref<256x64xf32, #tpu.memory_space<vmem>>, vector<16x64xf32>,
    %c144_248 = arith.constant 144 : index
    %c0_249 = arith.constant 0 : index
    %355 = vector.load %arg7[%c144_248, %c0_249] : memref<256x64xf32, #tpu.memory_space<vmem>>, vector<16x64xf32>
    %356 = arith.mulf %355, %353 : vector<16x64xf32>
    %c144_250 = arith.constant 144 : index
    %c0_251 = arith.constant 0 : index
    %357 = vector.load %arg8[%c144_250, %c0_251] : memref<256x64xf32, #tpu.memory_space<vmem>>, vector<16x64xf32>
    %358 = arith.addf %356, %357 : vector<16x64xf32>
    %c144_252 = arith.constant 144 : index
    %c0_253 = arith.constant 0 : index
    %359 = vector.load %arg9[%c144_252, %c0_253] : memref<256x64xf32, #tpu.memory_space<vmem>>, vector<16x64xf32>
    tpu.vector_store %arg9[%c144_252, %c0_253], %358 {strides = array<i32>} : memref<256x64xf32, #tpu.memory_space<vmem>>, vector<16x64xf32>,
    %c160_254 = arith.constant 160 : index
    %c0_255 = arith.constant 0 : index
    %360 = vector.load %arg7[%c160_254, %c0_255] : memref<256x64xf32, #tpu.memory_space<vmem>>, vector<16x64xf32>
    %361 = arith.mulf %360, %358 : vector<16x64xf32>
    %c160_256 = arith.constant 160 : index
    %c0_257 = arith.constant 0 : index
    %362 = vector.load %arg8[%c160_256, %c0_257] : memref<256x64xf32, #tpu.memory_space<vmem>>, vector<16x64xf32>
    %363 = arith.addf %361, %362 : vector<16x64xf32>
    %c160_258 = arith.constant 160 : index
    %c0_259 = arith.constant 0 : index
    %364 = vector.load %arg9[%c160_258, %c0_259] : memref<256x64xf32, #tpu.memory_space<vmem>>, vector<16x64xf32>
    tpu.vector_store %arg9[%c160_258, %c0_259], %363 {strides = array<i32>} : memref<256x64xf32, #tpu.memory_space<vmem>>, vector<16x64xf32>,
    %c176_260 = arith.constant 176 : index
    %c0_261 = arith.constant 0 : index
    %365 = vector.load %arg7[%c176_260, %c0_261] : memref<256x64xf32, #tpu.memory_space<vmem>>, vector<16x64xf32>
    %366 = arith.mulf %365, %363 : vector<16x64xf32>
    %c176_262 = arith.constant 176 : index
    %c0_263 = arith.constant 0 : index
    %367 = vector.load %arg8[%c176_262, %c0_263] : memref<256x64xf32, #tpu.memory_space<vmem>>, vector<16x64xf32>
    %368 = arith.addf %366, %367 : vector<16x64xf32>
    %c176_264 = arith.constant 176 : index
    %c0_265 = arith.constant 0 : index
    %369 = vector.load %arg9[%c176_264, %c0_265] : memref<256x64xf32, #tpu.memory_space<vmem>>, vector<16x64xf32>
    tpu.vector_store %arg9[%c176_264, %c0_265], %368 {strides = array<i32>} : memref<256x64xf32, #tpu.memory_space<vmem>>, vector<16x64xf32>,
    %c192_266 = arith.constant 192 : index
    %c0_267 = arith.constant 0 : index
    %370 = vector.load %arg7[%c192_266, %c0_267] : memref<256x64xf32, #tpu.memory_space<vmem>>, vector<16x64xf32>
    %371 = arith.mulf %370, %368 : vector<16x64xf32>
    %c192_268 = arith.constant 192 : index
    %c0_269 = arith.constant 0 : index
    %372 = vector.load %arg8[%c192_268, %c0_269] : memref<256x64xf32, #tpu.memory_space<vmem>>, vector<16x64xf32>
    %373 = arith.addf %371, %372 : vector<16x64xf32>
    %c192_270 = arith.constant 192 : index
    %c0_271 = arith.constant 0 : index
    %374 = vector.load %arg9[%c192_270, %c0_271] : memref<256x64xf32, #tpu.memory_space<vmem>>, vector<16x64xf32>
    tpu.vector_store %arg9[%c192_270, %c0_271], %373 {strides = array<i32>} : memref<256x64xf32, #tpu.memory_space<vmem>>, vector<16x64xf32>,
    %c208_272 = arith.constant 208 : index
    %c0_273 = arith.constant 0 : index
    %375 = vector.load %arg7[%c208_272, %c0_273] : memref<256x64xf32, #tpu.memory_space<vmem>>, vector<16x64xf32>
    %376 = arith.mulf %375, %373 : vector<16x64xf32>
    %c208_274 = arith.constant 208 : index
    %c0_275 = arith.constant 0 : index
    %377 = vector.load %arg8[%c208_274, %c0_275] : memref<256x64xf32, #tpu.memory_space<vmem>>, vector<16x64xf32>
    %378 = arith.addf %376, %377 : vector<16x64xf32>
    %c208_276 = arith.constant 208 : index
    %c0_277 = arith.constant 0 : index
    %379 = vector.load %arg9[%c208_276, %c0_277] : memref<256x64xf32, #tpu.memory_space<vmem>>, vector<16x64xf32>
    tpu.vector_store %arg9[%c208_276, %c0_277], %378 {strides = array<i32>} : memref<256x64xf32, #tpu.memory_space<vmem>>, vector<16x64xf32>,
    %c224_278 = arith.constant 224 : index
    %c0_279 = arith.constant 0 : index
    %380 = vector.load %arg7[%c224_278, %c0_279] : memref<256x64xf32, #tpu.memory_space<vmem>>, vector<16x64xf32>
    %381 = arith.mulf %380, %378 : vector<16x64xf32>
    %c224_280 = arith.constant 224 : index
    %c0_281 = arith.constant 0 : index
    %382 = vector.load %arg8[%c224_280, %c0_281] : memref<256x64xf32, #tpu.memory_space<vmem>>, vector<16x64xf32>
    %383 = arith.addf %381, %382 : vector<16x64xf32>
    %c224_282 = arith.constant 224 : index
    %c0_283 = arith.constant 0 : index
    %384 = vector.load %arg9[%c224_282, %c0_283] : memref<256x64xf32, #tpu.memory_space<vmem>>, vector<16x64xf32>
    tpu.vector_store %arg9[%c224_282, %c0_283], %383 {strides = array<i32>} : memref<256x64xf32, #tpu.memory_space<vmem>>, vector<16x64xf32>,
    %c240_284 = arith.constant 240 : index
    %c0_285 = arith.constant 0 : index
    %385 = vector.load %arg7[%c240_284, %c0_285] : memref<256x64xf32, #tpu.memory_space<vmem>>, vector<16x64xf32>
    %386 = arith.mulf %385, %383 : vector<16x64xf32>
    %c240_286 = arith.constant 240 : index
    %c0_287 = arith.constant 0 : index
    %387 = vector.load %arg8[%c240_286, %c0_287] : memref<256x64xf32, #tpu.memory_space<vmem>>, vector<16x64xf32>
    %388 = arith.addf %386, %387 : vector<16x64xf32>
    %c240_288 = arith.constant 240 : index
    %c0_289 = arith.constant 0 : index
    %389 = vector.load %arg9[%c240_288, %c0_289] : memref<256x64xf32, #tpu.memory_space<vmem>>, vector<16x64xf32>
    tpu.vector_store %arg9[%c240_288, %c0_289], %388 {strides = array<i32>} : memref<256x64xf32, #tpu.memory_space<vmem>>, vector<16x64xf32>,
    %c0_290 = arith.constant 0 : index
    %c0_291 = arith.constant 0 : index
    %390 = vector.load %arg5[%c0_290, %c0_291] : memref<32x256xf32, #tpu.memory_space<vmem>>, vector<32x256xf32>
    %c0_292 = arith.constant 0 : index
    %c0_293 = arith.constant 0 : index
    %391 = vector.load %arg9[%c0_292, %c0_293] : memref<256x64xf32, #tpu.memory_space<vmem>>, vector<256x64xf32>
    %392 = arith.mulf %302, %391 : vector<256x64xf32>
    %cst_294 = arith.constant dense<0.000000e+00> : vector<32x64xf32>
    %393 = tpu.matmul %390, %392, %cst_294 {dimension_numbers = #tpu.dot_dimension_numbers<[1], [0], [0], [1], [0, 0, 1, 1], [], []>} : vector<32x256xf32>, vector<256x64xf32>, vector<32x64xf32> -> vector<32x64xf32>
    %394 = vector.extract_strided_slice %216 {offsets = [5, 0], sizes = [1, 64], strides = [1, 1]} : vector<8x64xf32> to vector<1x64xf32>
    %395 = vector.broadcast %394 : vector<1x64xf32> to vector<32x64xf32>
    %396 = arith.mulf %395, %271 : vector<32x64xf32>
    %397 = arith.addf %393, %396 : vector<32x64xf32>
    %398 = arith.negf %236 : vector<32x64xf32>
    %399 = math.exp %398 : vector<32x64xf32>
    %cst_295 = arith.constant 1.000000e+00 : f32
    %400 = vector.broadcast %cst_295 : f32 to vector<32x64xf32>
    %401 = arith.addf %400, %399 : vector<32x64xf32>
    %402 = arith.divf %400, %401 : vector<32x64xf32>
    %403 = arith.mulf %236, %402 : vector<32x64xf32>
    %404 = arith.mulf %397, %403 : vector<32x64xf32>
    %c544 = arith.constant 544 : index
    %c0_296 = arith.constant 0 : index
    %405 = vector.load %arg3[%c544, %c0_296] : memref<640x128xbf16, #tpu.memory_space<vmem>>, vector<64x32xbf16>
    %406 = arith.truncf %404 : vector<32x64xf32> to vector<32x64xbf16>
    %cst_297 = arith.constant dense<0.000000e+00> : vector<32x32xf32>
    %407 = tpu.matmul %406, %405, %cst_297 {dimension_numbers = #tpu.dot_dimension_numbers<[1], [0], [0], [1], [0, 0, 1, 1], [], []>} : vector<32x64xbf16>, vector<64x32xbf16>, vector<32x32xf32> -> vector<32x32xf32>
    %408 = arith.addf %224, %407 : vector<32x32xf32>
    %409 = vector.extract_strided_slice %216 {offsets = [6, 0], sizes = [1, 32], strides = [1, 1]} : vector<8x64xf32> to vector<1x32xf32>
    %410 = vector.broadcast %409 : vector<1x32xf32> to vector<32x32xf32>
    %411 = arith.addf %408, %410 : vector<32x32xf32>
    %c608 = arith.constant 608 : index
    %c0_298 = arith.constant 0 : index
    %412 = vector.load %arg3[%c608, %c0_298] : memref<640x128xbf16, #tpu.memory_space<vmem>>, vector<32x48xbf16>
    %413 = arith.truncf %411 : vector<32x32xf32> to vector<32x32xbf16>
    %cst_299 = arith.constant dense<0.000000e+00> : vector<32x48xf32>
    %414 = tpu.matmul %413, %412, %cst_299 {dimension_numbers = #tpu.dot_dimension_numbers<[1], [0], [0], [1], [0, 0, 1, 1], [], []>} : vector<32x32xbf16>, vector<32x48xbf16>, vector<32x48xf32> -> vector<32x48xf32>
    %415 = vector.extract_strided_slice %216 {offsets = [7, 0], sizes = [1, 48], strides = [1, 1]} : vector<8x64xf32> to vector<1x48xf32>
    %416 = vector.broadcast %415 : vector<1x48xf32> to vector<32x48xf32>
    %417 = arith.addf %414, %416 : vector<32x48xf32>
    %418 = arith.negf %417 : vector<32x48xf32>
    %419 = math.exp %418 : vector<32x48xf32>
    %cst_300 = arith.constant 1.000000e+00 : f32
    %420 = vector.broadcast %cst_300 : f32 to vector<32x48xf32>
    %421 = arith.addf %420, %419 : vector<32x48xf32>
    %422 = arith.divf %420, %421 : vector<32x48xf32>
    %c0_301 = arith.constant 0 : index
    %c0_302 = arith.constant 0 : index
    %423 = vector.load %arg6[%c0_301, %c0_302] : memref<32x48xf32, #tpu.memory_space<vmem>>, vector<32x48xf32>
    tpu.vector_store %arg6[%c0_301, %c0_302], %422 {strides = array<i32>} : memref<32x48xf32, #tpu.memory_space<vmem>>, vector<32x48xf32>,
    return
  }
  func.func @transform_0(%arg0: i32) -> (i32, i32) {
    %c0_i32 = arith.constant 0 : i32
    %c0_i32_0 = arith.constant 0 : i32
    return %arg0, %c0_i32 : i32, i32
  }
  func.func @transform_1(%arg0: i32) -> (i32, i32) {
    %c0_i32 = arith.constant 0 : i32
    %c0_i32_0 = arith.constant 0 : i32
    %c0_i32_1 = arith.constant 0 : i32
    return %c0_i32, %c0_i32_0 : i32, i32
  }
  func.func @transform_2(%arg0: i32) -> (i32, i32) {
    %c0_i32 = arith.constant 0 : i32
    %c0_i32_0 = arith.constant 0 : i32
    %c0_i32_1 = arith.constant 0 : i32
    return %c0_i32, %c0_i32_0 : i32, i32
  }
  func.func @transform_3(%arg0: i32) -> (i32, i32) {
    %c0_i32 = arith.constant 0 : i32
    %c0_i32_0 = arith.constant 0 : i32
    %c0_i32_1 = arith.constant 0 : i32
    return %c0_i32, %c0_i32_0 : i32, i32
  }
  func.func @transform_4(%arg0: i32) -> (i32, i32) {
    %c0_i32 = arith.constant 0 : i32
    %c0_i32_0 = arith.constant 0 : i32
    %c0_i32_1 = arith.constant 0 : i32
    return %c0_i32, %c0_i32_0 : i32, i32
  }
  func.func @transform_5(%arg0: i32) -> (i32, i32) {
    %c0_i32 = arith.constant 0 : i32
    %c0_i32_0 = arith.constant 0 : i32
    return %arg0, %c0_i32 : i32, i32
  }
}

</mosaic_0001>

<bundles_post_ra>
// kernel: forward.1
= control target key start
LH: loop header
LB: loop body
LE: loop exit
PB: predicated region body
PF: predicated region fallthrough
CT: control target
= control target key end

     0   :  { %10 = vsyncpa [#allocation6], 0  ;;  %s8992_s18 = smov [#allocation5]   ;;  %s11297_s0 = inlined_call_operand.vmem [shape: f32[32,48], index: 0, kind: input, shape index: {}]   ;;  %s11298_s1 = inlined_call_operand.vmem [shape: f32[2,32], index: 1, kind: input, shape index: {}]   ;;  %s11299_s2 = inlined_call_operand.hbm [shape: bf16[640,128], index: 2, kind: input, shape index: {}]   ;;  %s11300_s3 = inlined_call_operand.vmem [shape: f32[1472,64], index: 3, kind: input, shape index: {}]   ;;  %s11301_s4 = inlined_call_operand.vmem [shape: f32[32,256], index: 4, kind: input, shape index: {}]   ;;  %s11302_s5 = inlined_call_operand.vmem [shape: f32[32,48], index: 5, kind: output, shape index: {}]  }
   0x1   :  { %s20_s19 = sshll.u32 %s8992_s18, 4  ;;  %s21_s19 = int_to_ptr.vmem [resolvable:$true] %s20_s19 }
   0x2   :  { %s8978_s20 = scalar_lea.vmem %s21_s19, 5120  ;;  %p8983_p1 = scmp.lt.s32.totalorder %s21_s19, %s21_s19 }
   0x3   :  { %p8979_p0 = scmp.ne.s32.totalorder %s21_s19, %s8978_s20  ;;  %p8984_p2 = scmp.lt.s32.totalorder %s8978_s20, %s8978_s20 }
   0x5   :  { %p8985_p3 = por %p8984_p2, %p8983_p1 }
   0x7   :  { %p8986_p4 = pnand %p8985_p3, %p8979_p0 }
   0x9   :  { %8989 = shalt.err (!%p8986_p4)
}
   0xa   :  { %s8993_s21 = smov 64   ;;  %s8994_s22 = smov 4  }
   0xb   :  { %26 = dma.hbm_to_vmem [thread:$0]  %s11299_s2, 5120, %s21_s19, [#allocation6], %s8993_s21, %s8993_s21, %s8994_s22  }
   0xc   :  { %8990 = dma.done.wait [#allocation6], 5120  }
   0xd   :  { %8991 = vsyncadd [#allocation6], 4294962176  ;;  %v8680_v0 = vld [vmem:[#allocation5 + $0x10] sm:$0xff]   ;;  %v8681_v1 = vld [vmem:[#allocation5 + $0x8] sm:$0xff]   ;;  %vm71_vm0 = vcmask 392192   ;;  %v49_v12 = vlaneseq  ;;  %vm157_vm1 = vcmask 261120  }
   0xe   :  { %7860 = vmatprep.subr.bf16.mxu0 %v8680_v0  ;;  %v35_v2 = vld [vmem:[%s11297_s0] sm:$0xff]  ;;  %v36_v3 = vld [vmem:[%s11297_s0 + $0x8] sm:$0xff]  ;;  %v37_v6 = vld [vmem:[%s11297_s0 + $0x10] sm:$0xff]  ;;  %vm806_vm2 = vcmask 523264   ;;  %vm1850_vm3 = vcmask 130048  }
   0xf   :  { %7861 = vmatpush3.bf16.msra.mxu0 %v8680_v0  ;;  %v8682_v4 = vld [vmem:[#allocation5] sm:$0xff]   ;;  %v47_v5 = vpack.c.bf16 %v36_v3, %v35_v2  ;;  %v38_v7 = vld [vmem:[%s11297_s0 + $0x18] sm:$0xff]  ;;  %v8685_v11 = vld [vmem:[#allocation5 + $0x30] sm:$0xff]   ;;  %v9043_v13 = vshrl.u32 %v49_v12, 7 }
  0x10   :  { %7862 = vmatprep.subr.bf16.mxu0 %v8681_v1  ;;  %v48_v8 = vpack.c.bf16 %v38_v7, %v37_v6  ;;  %v8683_v9 = vld [vmem:[#allocation5 + $0x20] sm:$0xff]   ;;  %v8684_v10 = vld [vmem:[#allocation5 + $0x18] sm:$0xff]   ;;  %v9051_v15 = vld [vmem:[%s11300_s3 + $0x4a8] sm:$0xff] }
  0x11   :  { %7866 = vmatprep.mubr.msk.bf16.mxu0 %vm71_vm0, %v47_v5  ;;  %7870 = vmatprep.subr.bf16.mxu1 %v8683_v9  ;;  %v9046_v14 = vsub.s32 0, %v9043_v13  ;;  %v6829_v24 = vld [vmem:[%s11298_s1] ss:$0 sm:$0xff]  ;;  %v8686_v32 = vld [vmem:[#allocation5 + $0x28] sm:$0xff]   ;;  %v9083_v35 = vsub.s32 1, %v9043_v13  ;;  %v290_v47 = vld [vmem:[%s11300_s3 + $0x310] sm:$0xff] }
  0x12   :  { %7871 = vmatpush3.bf16.msra.mxu1 %v8683_v9  ;;  %v288_v33 = vld [vmem:[%s11300_s3 + $0x300] sm:$0xff]  ;;  %v289_v45 = vld [vmem:[%s11300_s3 + $0x308] sm:$0xff]  ;;  %v403_v48 = vld [vmem:[%s11300_s3 + $0x330] sm:$0xff]  ;;  %v9158_v7 = vsub.s32 3, %v9043_v13 }
  0x13   :  { %7863 = vmatpush3.bf16.msra.mxu0 %v8681_v1  ;;  %7872 = vmatprep.subr.bf16.mxu1 %v8684_v10  ;;  %11317 = vst [vmem:[#allocation8_spill] sm:$0xff] %v9046_v14  ;;  %v52_v17 = vrot.slane %v9051_v15, %v9046_v14  ;;  %v401_v34 = vld [vmem:[%s11300_s3 + $0x320] sm:$0xff]  ;;  %11319 = vst [vmem:[#allocation10_spill] sm:$0xff] %v9083_v35  ;;  %v144_v38 = vrot.slane %v9051_v15, %v9083_v35  ;;  %v402_v46 = vld [vmem:[%s11300_s3 + $0x328] sm:$0xff] }
  0x14   :  { %7864 = vmatprep.subr.bf16.mxu0 %v8682_v4  ;;  %v291_v49 = vld [vmem:[%s11300_s3 + $0x318] sm:$0xff]  ;;  %v514_v51 = vld [vmem:[%s11300_s3 + $0x340] sm:$0xff]  ;;  %v515_v53 = vld [vmem:[%s11300_s3 + $0x348] sm:$0xff]  ;;  %11320 = vst [vmem:[#allocation11_spill] sm:$0xff] %v9158_v7 }
  0x15   :  { %v404_v50 = vld [vmem:[%s11300_s3 + $0x338] sm:$0xff]  ;;  %v627_v52 = vld [vmem:[%s11300_s3 + $0x360] sm:$0xff]  ;;  %v628_v54 = vld [vmem:[%s11300_s3 + $0x368] sm:$0xff] }
  0x16   :  { %7873 = vmatpush3.bf16.msra.mxu1 %v8684_v10  ;;  %v516_v55 = vld [vmem:[%s11300_s3 + $0x350] sm:$0xff]  ;;  %v517_v57 = vld [vmem:[%s11300_s3 + $0x358] sm:$0xff]  ;;  %v8688_v60 = vld [vmem:[#allocation5 + $0x48] sm:$0xff]  }
  0x17   :  { %7865 = vmatpush3.bf16.msra.mxu0 %v8682_v4  ;;  %7878 = vmatprep.subr.bf16.mxu1 %v8685_v11  ;;  %v629_v56 = vld [vmem:[%s11300_s3 + $0x370] sm:$0xff]  ;;  %v630_v58 = vld [vmem:[%s11300_s3 + $0x378] sm:$0xff]  ;;  %v8689_v61 = vld [vmem:[#allocation5 + $0x40] sm:$0xff]  }
  0x18   :  { %v8687_v59 = vld [vmem:[#allocation5 + $0x50] sm:$0xff]   ;;  %v8690_v62 = vld [vmem:[#allocation5 + $0x38] sm:$0xff]   ;;  %v282_v4 = vld [vmem:[%s11300_s3 + $0x4a0] sm:$0xff] }
  0x19   :  { %v9143_v63 = vld [vmem:[#allocation5 + $0x70] sm:$0xff]  }
  0x1a   :  { %7867 = vmatmul.mubr.msk.bf16.vlgmr.msra.gmra.mxu0 %vm71_vm0, %v48_v8  ;;  %v392_v8 = vrot.slane %v282_v4, %v9046_v14 }
  0x1b   :  { %7894 = vmatprep.mubr.msk.f32.mxu0 %vm157_vm1, %v288_v33 }
  0xda   :  { %v7868_v16 = vpop.f32.mrf.mxu0 }
  0xdb   :  { %v121_v22 = vadd.f32 %v7868_v16, %v52_v17  ;;  %v505_v16 = vrot.slane %v282_v4, %v9083_v35 }
  0xdc   :  { %v112_v18 = vpop.f32.mrf.mxu0 }
  0xdd   :  { %v113_v20 = vadd.f32 %v112_v18, %v52_v17  ;;  %v9064_v29 = vmul.f32 %v6829_v24, %v121_v22 }
  0xde   :  { %v7869_v19 = vpop.f32.mrf.mxu0 }
  0xdf   :  { %v124_v21 = vadd.f32 %v7869_v19, %v52_v17  ;;  %v9060_v27 = vmul.f32 %v6829_v24, %v113_v20  ;;  %v9165_v19 = vsub.s32 2, %v9043_v13 }
  0xe0   :  { %v115_v23 = vpop.f32.mrf.mxu0 }
  0xe1   :  { %v116_v25 = vadd.f32 %v115_v23, %v52_v17  ;;  %v9058_v26 = vmul.f32 %v6829_v24, %v124_v21 }
  0xe3   :  { %v9062_v28 = vmul.f32 %v6829_v24, %v116_v25  ;;  %v140_v31 = vpack.c.bf16 %v9058_v26, %v9064_v29 }
  0xe5   :  { %11318 = vst [vmem:[#allocation9_spill] sm:$0xff] %v9062_v28  ;;  %v139_v30 = vpack.c.bf16 %v9062_v28, %v9060_v27 }
  0xe7   :  { %7874 = vmatprep.mubr.msk.bf16.mxu1 %vm157_vm1, %v139_v30 }
  0xe8   :  { %7875 = vmatmul.mubr.msk.bf16.vlgmr.msra.gmra.mxu1 %vm157_vm1, %v140_v31 }
  0xe9   :  { %7879 = vmatpush3.bf16.msra.mxu1 %v8685_v11  ;;  %7882 = vmatprep.mubr.msk.bf16.mxu1 %vm157_vm1, %v139_v30  ;;  %v286_v11 = vrot.slane %v9051_v15, %v9158_v7  ;;  %v618_v30 = vrot.slane %v282_v4, %v9165_v19 }
  0xea   :  { %7880 = vmatprep.subr.bf16.mxu1 %v8686_v32 }
  0xed   :  { %7881 = vmatpush3.bf16.msra.mxu1 %v8686_v32 }
  0xf0   :  { %7883 = vmatmul.mubr.msk.bf16.vlgmr.msra.gmra.mxu1 %vm157_vm1, %v140_v31  ;;  %v731_v31 = vrot.slane %v282_v4, %v9158_v7 }
  0xf1   :  { %7908 = vmatprep.mubr.msk.f32.mxu1 %vm157_vm1, %v401_v34 }
 0x1a8   :  { %v7876_v36 = vpop.f32.mrf.mxu1 }
 0x1a9   :  { %v207_v42 = vadd.f32 %v7876_v36, %v144_v38 }
 0x1aa   :  { %v198_v37 = vpop.f32.mrf.mxu1 }
 0x1ab   :  { %v199_v44 = vadd.f32 %v198_v37, %v144_v38 }
 0x1ac   :  { %v7877_v39 = vpop.f32.mrf.mxu1 }
 0x1ad   :  { %v210_v40 = vadd.f32 %v7877_v39, %v144_v38 }
 0x1ae   :  { %v201_v41 = vpop.f32.mrf.mxu1 }
 0x1af   :  { %7886 = vmatprep.subr.mxu0 %v210_v40  ;;  %7900 = vmatprep.subr.mxu1 %v210_v40  ;;  %v202_v43 = vadd.f32 %v201_v41, %v144_v38 }
 0x1b0   :  { %7887 = vmatpush3.msra.mxu0 %v210_v40  ;;  %7901 = vmatpush3.msra.mxu1 %v210_v40  ;;  %v9146_v0 = vpop.f32.mrf.mxu1 }
 0x1b1   :  { %7888 = vmatprep.subr.mxu0 %v207_v42  ;;  %7902 = vmatprep.subr.mxu1 %v207_v42 }
 0x1b2   :  { %7889 = vmatpush3.msra.mxu0 %v207_v42  ;;  %7903 = vmatpush3.msra.mxu1 %v207_v42  ;;  %v9148_v1 = vpop.f32.mrf.mxu1 }
 0x1b3   :  { %7890 = vmatprep.subr.mxu0 %v202_v43  ;;  %7904 = vmatprep.subr.mxu1 %v202_v43 }
 0x1b4   :  { %7891 = vmatpush3.msra.mxu0 %v202_v43  ;;  %7905 = vmatpush3.msra.mxu1 %v202_v43  ;;  %v9150_v2 = vpop.f32.mrf.mxu1 }
 0x1b5   :  { %7892 = vmatprep.subr.mxu0 %v199_v44  ;;  %7906 = vmatprep.subr.mxu1 %v199_v44 }
 0x1b6   :  { %7893 = vmatpush3.msra.mxu0 %v199_v44  ;;  %7907 = vmatpush3.msra.mxu1 %v199_v44  ;;  %v9152_v3 = vpop.f32.mrf.mxu1 }
 0x1b7   :  { %7895 = vmatmul.mubr.msk.f32.vlgmr.msra.gmra.mxu0 %vm157_vm1, %v289_v45  ;;  %7909 = vmatmul.mubr.msk.f32.vlgmr.msra.gmra.mxu1 %vm157_vm1, %v402_v46 }
 0x1b8   :  { %7914 = vmatprep.subr.mxu0 %v210_v40  ;;  %7928 = vmatprep.subr.mxu1 %v210_v40 }
 0x1b9   :  { %7915 = vmatpush3.msra.mxu0 %v210_v40  ;;  %7929 = vmatpush3.msra.mxu1 %v210_v40 }
 0x1ba   :  { %7916 = vmatprep.subr.mxu0 %v207_v42  ;;  %7930 = vmatprep.subr.mxu1 %v207_v42 }
 0x1bb   :  { %7897 = vmatprep.mubr.msk.f32.mxu0 %vm157_vm1, %v290_v47  ;;  %7911 = vmatprep.mubr.msk.f32.mxu1 %vm157_vm1, %v403_v48 }
 0x1bc   :  { %7917 = vmatpush3.msra.mxu0 %v207_v42  ;;  %7931 = vmatpush3.msra.mxu1 %v207_v42 }
 0x1bd   :  { %7898 = vmatmul.mubr.msk.f32.gmra.mxu0 %vm157_vm1, %v291_v49  ;;  %7912 = vmatmul.mubr.msk.f32.gmra.mxu1 %vm157_vm1, %v404_v50 }
 0x1be   :  { %7918 = vmatprep.subr.mxu0 %v202_v43  ;;  %7932 = vmatprep.subr.mxu1 %v202_v43 }
 0x1bf   :  { %7919 = vmatpush3.msra.mxu0 %v202_v43  ;;  %7933 = vmatpush3.msra.mxu1 %v202_v43 }
 0x1c0   :  { %7920 = vmatprep.subr.mxu0 %v199_v44  ;;  %7934 = vmatprep.subr.mxu1 %v199_v44 }
 0x1c1   :  { %7921 = vmatpush3.msra.mxu0 %v199_v44  ;;  %7922 = vmatprep.mubr.msk.f32.mxu0 %vm157_vm1, %v514_v51 }
 0x1c2   :  { %7935 = vmatpush3.msra.mxu1 %v199_v44  ;;  %7936 = vmatprep.mubr.msk.f32.mxu1 %vm157_vm1, %v627_v52 }
 0x1c3   :  { %7923 = vmatmul.mubr.msk.f32.vlgmr.msra.gmra.mxu0 %vm157_vm1, %v515_v53  ;;  %7937 = vmatmul.mubr.msk.f32.vlgmr.msra.gmra.mxu1 %vm157_vm1, %v628_v54 }
 0x1c4   :  { %7925 = vmatprep.mubr.msk.f32.mxu0 %vm157_vm1, %v516_v55  ;;  %7939 = vmatprep.mubr.msk.f32.mxu1 %vm157_vm1, %v629_v56 }
 0x1c5   :  { %7942 = vmatprep.subr.bf16.mxu0 %v8687_v59 }
 0x1c6   :  { %7943 = vmatpush3.bf16.msra.mxu0 %v8687_v59 }
 0x1c7   :  { %7926 = vmatmul.mubr.msk.f32.gmra.mxu0 %vm157_vm1, %v517_v57  ;;  %7940 = vmatmul.mubr.msk.f32.gmra.mxu1 %vm157_vm1, %v630_v58 }
 0x1c8   :  { %7944 = vmatprep.subr.bf16.mxu0 %v8688_v60 }
 0x1ca   :  { %7945 = vmatpush3.bf16.msra.mxu0 %v8688_v60 }
 0x1cb   :  { %7946 = vmatprep.subr.bf16.mxu0 %v8689_v61 }
 0x1ce   :  { %7947 = vmatpush3.bf16.msra.mxu0 %v8689_v61 }
 0x1cf   :  { %7948 = vmatprep.subr.bf16.mxu0 %v8690_v62 }
 0x1d2   :  { %7949 = vmatpush3.bf16.msra.mxu0 %v8690_v62 }
 0x1d3   :  { %7954 = vmatprep.subr.bf16.mxu0 %v9143_v63 }
 0x277   :  { %v7896_v5 = vpop.f32.mrf.mxu0  ;;  %v7910_v6 = vpop.f32.mrf.mxu1 }
 0x278   :  { %v394_v12 = vmul.f32 %v7896_v5, %v392_v8  ;;  %v507_v25 = vmul.f32 %v7910_v6, %v505_v16 }
 0x279   :  { %v370_v9 = vpop.f32.mrf.mxu0  ;;  %v483_v10 = vpop.f32.mrf.mxu1 }
 0x27a   :  { %v393_v20 = vmul.f32 %v392_v8, %v370_v9  ;;  %v398_v24 = vadd.f32 %v394_v12, %v286_v11  ;;  %v506_v40 = vmul.f32 %v505_v16, %v483_v10 }
 0x27c   :  { %v397_v33 = vadd.f32 %v393_v20, %v286_v11  ;;  %v511_v39 = vadd.f32 %v507_v25, %v398_v24 }
 0x27d   :  { %v7899_v17 = vpop.f32.mrf.mxu0  ;;  %v7913_v18 = vpop.f32.mrf.mxu1 }
 0x27e   :  { %v396_v21 = vmul.f32 %v7899_v17, %v392_v8  ;;  %v509_v36 = vmul.f32 %v7913_v18, %v505_v16  ;;  %v510_v46 = vadd.f32 %v506_v40, %v397_v33 }
 0x27f   :  { %v380_v22 = vpop.f32.mrf.mxu0  ;;  %v493_v23 = vpop.f32.mrf.mxu1 }
 0x280   :  { %v395_v32 = vmul.f32 %v392_v8, %v380_v22  ;;  %v400_v34 = vadd.f32 %v396_v21, %v286_v11  ;;  %v508_v50 = vmul.f32 %v505_v16, %v493_v23 }
 0x282   :  { %v399_v43 = vadd.f32 %v395_v32, %v286_v11  ;;  %v513_v49 = vadd.f32 %v509_v36, %v400_v34 }
 0x283   :  { %v7924_v37 = vpop.f32.mrf.mxu0  ;;  %v7938_v38 = vpop.f32.mrf.mxu1 }
 0x284   :  { %v620_v41 = vmul.f32 %v7924_v37, %v618_v30  ;;  %v733_v42 = vmul.f32 %v7938_v38, %v731_v31  ;;  %v512_v58 = vadd.f32 %v508_v50, %v399_v43  ;;  %v8694_v43 = vld [vmem:[#allocation5 + $0x58] sm:$0xff]  }
 0x285   :  { %v596_v44 = vpop.f32.mrf.mxu0  ;;  %v709_v45 = vpop.f32.mrf.mxu1 }
 0x286   :  { %v624_v47 = vadd.f32 %v620_v41, %v511_v39  ;;  %v619_v48 = vmul.f32 %v618_v30, %v596_v44  ;;  %v732_v51 = vmul.f32 %v731_v31, %v709_v45  ;;  %v8692_v41 = vld [vmem:[#allocation5 + $0x68] sm:$0xff]   ;;  %v9189_v44 = vld [vmem:[%s11300_s3] sm:$0xff] }
 0x287   :  { %v7927_v52 = vpop.f32.mrf.mxu0  ;;  %v7941_v53 = vpop.f32.mrf.mxu1  ;;  %8030 = vmatprep.mubr.msk.f32.mxu1 %vm157_vm1, %v9189_v44 }
 0x288   :  { %v737_v54 = vadd.f32 %v733_v42, %v624_v47  ;;  %v623_v55 = vadd.f32 %v619_v48, %v510_v46  ;;  %v622_v56 = vmul.f32 %v7927_v52, %v618_v30  ;;  %v735_v57 = vmul.f32 %v7941_v53, %v731_v31  ;;  %v8693_v42 = vld [vmem:[#allocation5 + $0x60] sm:$0xff]  }
 0x289   :  { %v606_v59 = vpop.f32.mrf.mxu0  ;;  %v719_v60 = vpop.f32.mrf.mxu1 }
 0x28a   :  { %v6855_v61 = vmul.f32 -1.442695, %v737_v54  ;;  %v736_v62 = vadd.f32 %v732_v51, %v623_v55  ;;  %v626_v4 = vadd.f32 %v622_v56, %v513_v49  ;;  %v621_v5 = vmul.f32 %v618_v30, %v606_v59 }
 0x28b   :  { %v734_v6 = vmul.f32 %v731_v31, %v719_v60 }
 0x28c   :  { %8720 = vpow2.f32 %v6855_v61  ;;  %v6854_v8 = vmul.f32 -1.442695, %v736_v62  ;;  %v739_v9 = vadd.f32 %v735_v57, %v626_v4  ;;  %v625_v10 = vadd.f32 %v621_v5, %v512_v58 }
 0x28e   :  { %8722 = vpow2.f32 %v6854_v8  ;;  %v6857_v11 = vmul.f32 -1.442695, %v739_v9  ;;  %v738_v12 = vadd.f32 %v734_v6, %v625_v10 }
 0x290   :  { %8724 = vpow2.f32 %v6857_v11  ;;  %v6856_v16 = vmul.f32 -1.442695, %v738_v12 }
 0x292   :  { %8726 = vpow2.f32 %v6856_v16 }
 0x299   :  { %v8721_v17 = vpop.eup %8720 }
 0x29a   :  { %v753_v18 = vadd.f32 1.0, %v8721_v17 }
 0x29b   :  { %v8723_v20 = vpop.eup %8722 }
 0x29c   :  { %8728 = vrcp.f32 %v753_v18  ;;  %v752_v21 = vadd.f32 1.0, %v8723_v20 }
 0x29d   :  { %v8725_v22 = vpop.eup %8724 }
 0x29e   :  { %8730 = vrcp.f32 %v752_v21  ;;  %v755_v23 = vadd.f32 1.0, %v8725_v22 }
 0x29f   :  { %v8727_v24 = vpop.eup %8726 }
 0x2a0   :  { %8732 = vrcp.f32 %v755_v23  ;;  %v754_v25 = vadd.f32 1.0, %v8727_v24 }
 0x2a2   :  { %8734 = vrcp.f32 %v754_v25 }
 0x2a9   :  { %v8729_v30 = vpop.eup %8728 }
 0x2aa   :  { %v9169_v32 = vmul.f32 %v8729_v30, %v737_v54 }
 0x2ab   :  { %v8731_v31 = vpop.eup %8730 }
 0x2ac   :  { %v9171_v33 = vmul.f32 %v8731_v31, %v736_v62 }
 0x2ad   :  { %v8733_v34 = vpop.eup %8732 }
 0x2ae   :  { %v776_v36 = vpack.c.bf16 %v9169_v32, %v9171_v33  ;;  %v9175_v38 = vmul.f32 %v8733_v34, %v739_v9 }
 0x2af   :  { %v8735_v37 = vpop.eup %8734 }
 0x2b0   :  { %v9177_v39 = vmul.f32 %v8735_v37, %v738_v12  ;;  %7950 = vmatprep.mubr.msk.bf16.mxu0 %vm806_vm2, %v776_v36 }
 0x2b2   :  { %v777_v40 = vpack.c.bf16 %v9175_v38, %v9177_v39 }
 0x2b4   :  { %7951 = vmatmul.mubr.msk.bf16.vlgmr.msra.gmra.mxu0 %vm806_vm2, %v777_v40 }
 0x2b5   :  { %7955 = vmatpush3.bf16.msra.mxu0 %v9143_v63  ;;  %7962 = vmatprep.mubr.msk.bf16.mxu0 %vm806_vm2, %v776_v36  ;;  %v11303_v63 = vsub.s32 4, %v9043_v13 }
 0x2b6   :  { %7956 = vmatprep.subr.bf16.mxu0 %v8692_v41 }
 0x2b7   :  { %v781_v45 = vrot.slane %v9051_v15, %v11303_v63 }
 0x2b9   :  { %7957 = vmatpush3.bf16.msra.mxu0 %v8692_v41 }
 0x2ba   :  { %7958 = vmatprep.subr.bf16.mxu0 %v8693_v42 }
 0x2bd   :  { %7959 = vmatpush3.bf16.msra.mxu0 %v8693_v42 }
 0x2be   :  { %7960 = vmatprep.subr.bf16.mxu0 %v8694_v43 }
 0x2c1   :  { %7961 = vmatpush3.bf16.msra.mxu0 %v8694_v43 }
 0x2c4   :  { %7963 = vmatmul.mubr.msk.bf16.vlgmr.msra.gmra.mxu0 %vm806_vm2, %v777_v40 }
 0x2c5   :  { %7974 = vmatprep.mubr.msk.f32.mxu0 %vm157_vm1, %v9189_v44 }
 0x374   :  { %v7952_v46 = vpop.f32.mrf.mxu0 }
 0x375   :  { %v856_v47 = vadd.f32 %v7952_v46, %v781_v45 }
 0x376   :  { %v847_v48 = vpop.f32.mrf.mxu0 }
 0x377   :  { %v868_v49 = vand.u32 2147483647, %v856_v47  ;;  %v848_v50 = vadd.f32 %v847_v48, %v781_v45  ;;  %v864_v23 = vmax.f32 %v856_v47, 0.0 }
 0x378   :  { %v7953_v51 = vpop.f32.mrf.mxu0 }
 0x379   :  { %v872_v52 = vsub.f32 0.0, %v868_v49  ;;  %v866_v53 = vand.u32 2147483647, %v848_v50  ;;  %v859_v54 = vadd.f32 %v7953_v51, %v781_v45  ;;  %v862_v41 = vmax.f32 %v848_v50, 0.0  ;;  %v9205_v50 = vld [vmem:[%s11300_s3 + $0x8] sm:$0xff] }
 0x37a   :  { %v850_v55 = vpop.f32.mrf.mxu0 }
 0x37b   :  { %v878_v56 = vmul.f32 1.442695, %v872_v52  ;;  %v870_v57 = vsub.f32 0.0, %v866_v53  ;;  %v869_v58 = vand.u32 2147483647, %v859_v54  ;;  %v851_v59 = vadd.f32 %v850_v55, %v781_v45  ;;  %v9211_v52 = vld [vmem:[%s11300_s3 + $0x10] sm:$0xff] }
 0x37c   :  { %v865_v24 = vmax.f32 %v859_v54, 0.0  ;;  %v9220_v54 = vld [vmem:[%s11300_s3 + $0x18] sm:$0xff]  ;;  %v9225_v55 = vld [vmem:[%s11300_s3 + $0x20] sm:$0xff] }
 0x37d   :  { %8736 = vpow2.f32 %v878_v56  ;;  %v874_v60 = vmul.f32 1.442695, %v870_v57  ;;  %v873_v61 = vsub.f32 0.0, %v869_v58  ;;  %v867_v62 = vand.u32 2147483647, %v851_v59  ;;  %v9238_v57 = vld [vmem:[%s11300_s3 + $0x28] sm:$0xff] }
 0x37e   :  { %v863_v37 = vmax.f32 %v851_v59, 0.0  ;;  %v9243_v58 = vld [vmem:[%s11300_s3 + $0x30] sm:$0xff]  ;;  %v9256_v59 = vld [vmem:[%s11300_s3 + $0x38] sm:$0xff] }
 0x37f   :  { %8738 = vpow2.f32 %v874_v60  ;;  %v880_v15 = vmul.f32 1.442695, %v873_v61  ;;  %v871_v4 = vsub.f32 0.0, %v867_v62  ;;  %v9261_v60 = vld [vmem:[%s11300_s3 + $0x40] sm:$0xff]  ;;  %v9274_v61 = vld [vmem:[%s11300_s3 + $0x48] sm:$0xff]  ;;  %v9279_v62 = vld [vmem:[%s11300_s3 + $0x50] sm:$0xff] }
 0x381   :  { %8740 = vpow2.f32 %v880_v15  ;;  %v876_v5 = vmul.f32 1.442695, %v871_v4  ;;  %v9292_v15 = vld [vmem:[%s11300_s3 + $0x58] sm:$0xff]  ;;  %v9297_v4 = vld [vmem:[%s11300_s3 + $0x60] sm:$0xff] }
 0x383   :  { %8742 = vpow2.f32 %v876_v5  ;;  %v9310_v5 = vld [vmem:[%s11300_s3 + $0x68] sm:$0xff] }
 0x384   :  { %v7964_v42 = vpop.f32.mrf.mxu0 }
 0x386   :  { %v964_v48 = vpop.f32.mrf.mxu0 }
 0x388   :  { %v7965_v53 = vpop.f32.mrf.mxu0 }
 0x38a   :  { %v8737_v6 = vpop.eup %8736  ;;  %v967_v56 = vpop.f32.mrf.mxu0 }
 0x38b   :  { %v884_v8 = vadd.f32 1.0, %v8737_v6  ;;  %v9315_v6 = vld [vmem:[%s11300_s3 + $0x70] sm:$0xff] }
 0x38c   :  { %v8739_v9 = vpop.eup %8738 }
 0x38d   :  { %8744 = vlog2.f32 %v884_v8  ;;  %v882_v10 = vadd.f32 1.0, %v8739_v9  ;;  %v9328_v8 = vld [vmem:[%s11300_s3 + $0x78] sm:$0xff]  ;;  %v9333_v9 = vld [vmem:[%s11300_s3 + $0x80] sm:$0xff] }
 0x38e   :  { %v8741_v11 = vpop.eup %8740 }
 0x38f   :  { %v885_v12 = vadd.f32 1.0, %v8741_v11  ;;  %8746 = vlog2.f32 %v882_v10  ;;  %v9346_v10 = vld [vmem:[%s11300_s3 + $0x88] sm:$0xff]  ;;  %v9351_v11 = vld [vmem:[%s11300_s3 + $0x90] sm:$0xff] }
 0x390   :  { %v8743_v16 = vpop.eup %8742 }
 0x391   :  { %8748 = vlog2.f32 %v885_v12  ;;  %v883_v17 = vadd.f32 1.0, %v8743_v16  ;;  %v998_v12 = vld [vmem:[%s11300_s3 + $0x98] sm:$0xff]  ;;  %v999_v16 = vld [vmem:[%s11300_s3 + $0xa0] sm:$0xff] }
 0x393   :  { %8750 = vlog2.f32 %v883_v17  ;;  %v1000_v17 = vld [vmem:[%s11300_s3 + $0xa8] sm:$0xff] }
 0x39a   :  { %v8745_v18 = vpop.eup %8744 }
 0x39b   :  { %v891_v21 = vmul.f32 0.6931472, %v8745_v18  ;;  %v1001_v18 = vld [vmem:[%s11300_s3 + $0xb0] sm:$0xff] }
 0x39c   :  { %v8747_v20 = vpop.eup %8746 }
 0x39d   :  { %v896_v34 = vadd.f32 %v891_v21, %v864_v23  ;;  %v887_v36 = vmul.f32 0.6931472, %v8747_v20  ;;  %v1002_v20 = vld [vmem:[%s11300_s3 + $0xb8] sm:$0xff]  ;;  %v1003_v21 = vld [vmem:[%s11300_s3 + $0xc0] sm:$0xff]  ;;  %v1005_v23 = vld [vmem:[%s11300_s3 + $0xd0] sm:$0xff] }
 0x39e   :  { %v8749_v22 = vpop.eup %8748 }
 0x39f   :  { %v893_v25 = vmul.f32 0.6931472, %v8749_v22  ;;  %v1334_v46 = vmul.f32 %v896_v34, %v9177_v39  ;;  %v894_v47 = vadd.f32 %v887_v36, %v862_v41  ;;  %v1004_v22 = vld [vmem:[%s11300_s3 + $0xc8] sm:$0xff] }
 0x3a0   :  { %v8751_v30 = vpop.eup %8750  ;;  %v2558_v36 = vld [vmem:[%s11300_s3 + $0x3a8] sm:$0xff] }
 0x3a1   :  { %v897_v31 = vadd.f32 %v893_v25, %v865_v24  ;;  %v889_v40 = vmul.f32 0.6931472, %v8751_v30  ;;  %v1332_v51 = vmul.f32 %v894_v47, %v9171_v33  ;;  %v1006_v24 = vld [vmem:[%s11300_s3 + $0xd8] sm:$0xff]  ;;  %v1007_v25 = vld [vmem:[%s11300_s3 + $0xe0] sm:$0xff]  ;;  %v1008_v30 = vld [vmem:[%s11300_s3 + $0xe8] sm:$0xff] }
 0x3a3   :  { %7966 = vmatprep.subr.mxu0 %v897_v31  ;;  %v1335_v43 = vmul.f32 %v897_v31, %v9175_v38  ;;  %v895_v45 = vadd.f32 %v889_v40, %v863_v37  ;;  %v2557_v40 = vld [vmem:[%s11300_s3 + $0x3a0] sm:$0xff] }
 0x3a4   :  { %7967 = vmatpush3.msra.mxu0 %v897_v31  ;;  %v1009_v31 = vld [vmem:[%s11300_s3 + $0xf0] sm:$0xff] }
 0x3a5   :  { %7968 = vmatprep.subr.mxu0 %v896_v34  ;;  %8022 = vmatprep.subr.mxu1 %v1335_v43  ;;  %v1333_v49 = vmul.f32 %v895_v45, %v9169_v32 }
 0x3a6   :  { %7969 = vmatpush3.msra.mxu0 %v896_v34  ;;  %8023 = vmatpush3.msra.mxu1 %v1335_v43  ;;  %v1010_v34 = vld [vmem:[%s11300_s3 + $0xf8] sm:$0xff] }
 0x3a7   :  { %7970 = vmatprep.subr.mxu0 %v895_v45  ;;  %8024 = vmatprep.subr.mxu1 %v1334_v46 }
 0x3a8   :  { %7971 = vmatpush3.msra.mxu0 %v895_v45  ;;  %8025 = vmatpush3.msra.mxu1 %v1334_v46  ;;  %v2560_v46 = vld [vmem:[%s11300_s3 + $0x3b8] sm:$0xff] }
 0x3a9   :  { %7972 = vmatprep.subr.mxu0 %v894_v47  ;;  %8026 = vmatprep.subr.mxu1 %v1333_v49 }
 0x3aa   :  { %7973 = vmatpush3.msra.mxu0 %v894_v47  ;;  %8027 = vmatpush3.msra.mxu1 %v1333_v49  ;;  %v2559_v49 = vld [vmem:[%s11300_s3 + $0x3b0] sm:$0xff] }
 0x3ab   :  { %7975 = vmatmul.mubr.msk.f32.vlgmr.msra.gmra.mxu0 %vm157_vm1, %v9205_v50  ;;  %8028 = vmatprep.subr.mxu1 %v1332_v51 }
 0x3ac   :  { %8078 = vmatprep.subr.mxu0 %v7965_v53  ;;  %8029 = vmatpush3.msra.mxu1 %v1332_v51 }
 0x3ad   :  { %8079 = vmatpush3.msra.mxu0 %v7965_v53  ;;  %7977 = vmatprep.mubr.msk.f32.mxu0 %vm157_vm1, %v9211_v52 }
 0x3ae   :  { %8080 = vmatprep.subr.mxu0 %v7964_v42  ;;  %8031 = vmatmul.mubr.msk.f32.vlgmr.msra.gmra.mxu1 %vm157_vm1, %v9205_v50 }
 0x3af   :  { %8081 = vmatpush3.msra.mxu0 %v7964_v42  ;;  %8033 = vmatprep.mubr.msk.f32.mxu1 %vm157_vm1, %v9211_v52 }
 0x3b0   :  { %7978 = vmatmul.mubr.msk.f32.gmra.mxu0 %vm157_vm1, %v9220_v54  ;;  %8082 = vmatprep.subr.mxu0 %v967_v56 }
 0x3b1   :  { %8083 = vmatpush3.msra.mxu0 %v967_v56  ;;  %7980 = vmatprep.mubr.msk.f32.mxu0 %vm157_vm1, %v9225_v55  ;;  %v2561_v56 = vld [vmem:[%s11300_s3 + $0x3c0] sm:$0xff] }
 0x3b2   :  { %8084 = vmatprep.subr.mxu0 %v964_v48  ;;  %8034 = vmatmul.mubr.msk.f32.gmra.mxu1 %vm157_vm1, %v9220_v54 }
 0x3b3   :  { %8085 = vmatpush3.msra.mxu0 %v964_v48  ;;  %8036 = vmatprep.mubr.msk.f32.mxu1 %vm157_vm1, %v9225_v55 }
 0x3b4   :  { %7981 = vmatmul.mubr.msk.f32.gmra.mxu0 %vm157_vm1, %v9238_v57 }
 0x3b5   :  { %7983 = vmatprep.mubr.msk.f32.mxu0 %vm157_vm1, %v9243_v58 }
 0x3b6   :  { %8037 = vmatmul.mubr.msk.f32.gmra.mxu1 %vm157_vm1, %v9238_v57 }
 0x3b7   :  { %8039 = vmatprep.mubr.msk.f32.mxu1 %vm157_vm1, %v9243_v58 }
 0x3b8   :  { %7984 = vmatmul.mubr.msk.f32.gmra.mxu0 %vm157_vm1, %v9256_v59 }
 0x3b9   :  { %7986 = vmatprep.mubr.msk.f32.mxu0 %vm157_vm1, %v9261_v60 }
 0x3ba   :  { %8040 = vmatmul.mubr.msk.f32.gmra.mxu1 %vm157_vm1, %v9256_v59 }
 0x3bb   :  { %8042 = vmatprep.mubr.msk.f32.mxu1 %vm157_vm1, %v9261_v60 }
 0x3bc   :  { %7987 = vmatmul.mubr.msk.f32.gmra.mxu0 %vm157_vm1, %v9274_v61 }
 0x3bd   :  { %7989 = vmatprep.mubr.msk.f32.mxu0 %vm157_vm1, %v9279_v62 }
 0x3be   :  { %8043 = vmatmul.mubr.msk.f32.gmra.mxu1 %vm157_vm1, %v9274_v61 }
 0x3bf   :  { %8045 = vmatprep.mubr.msk.f32.mxu1 %vm157_vm1, %v9279_v62 }
 0x3c0   :  { %7990 = vmatmul.mubr.msk.f32.gmra.mxu0 %vm157_vm1, %v9292_v15 }
 0x3c1   :  { %7992 = vmatprep.mubr.msk.f32.mxu0 %vm157_vm1, %v9297_v4 }
 0x3c2   :  { %8046 = vmatmul.mubr.msk.f32.gmra.mxu1 %vm157_vm1, %v9292_v15 }
 0x3c3   :  { %8048 = vmatprep.mubr.msk.f32.mxu1 %vm157_vm1, %v9297_v4 }
 0x3c4   :  { %7993 = vmatmul.mubr.msk.f32.gmra.mxu0 %vm157_vm1, %v9310_v5 }
 0x3c5   :  { %7995 = vmatprep.mubr.msk.f32.mxu0 %vm157_vm1, %v9315_v6 }
 0x3c6   :  { %8049 = vmatmul.mubr.msk.f32.gmra.mxu1 %vm157_vm1, %v9310_v5 }
 0x3c7   :  { %8051 = vmatprep.mubr.msk.f32.mxu1 %vm157_vm1, %v9315_v6 }
 0x3c8   :  { %7996 = vmatmul.mubr.msk.f32.gmra.mxu0 %vm157_vm1, %v9328_v8 }
 0x3c9   :  { %7998 = vmatprep.mubr.msk.f32.mxu0 %vm157_vm1, %v9333_v9 }
 0x3ca   :  { %8052 = vmatmul.mubr.msk.f32.gmra.mxu1 %vm157_vm1, %v9328_v8 }
 0x3cb   :  { %8054 = vmatprep.mubr.msk.f32.mxu1 %vm157_vm1, %v9333_v9 }
 0x3cc   :  { %7999 = vmatmul.mubr.msk.f32.gmra.mxu0 %vm157_vm1, %v9346_v10 }
 0x3cd   :  { %8001 = vmatprep.mubr.msk.f32.mxu0 %vm157_vm1, %v9351_v11 }
 0x3ce   :  { %8055 = vmatmul.mubr.msk.f32.gmra.mxu1 %vm157_vm1, %v9346_v10 }
 0x3cf   :  { %8057 = vmatprep.mubr.msk.f32.mxu1 %vm157_vm1, %v9351_v11 }
 0x3d0   :  { %8002 = vmatmul.mubr.msk.f32.gmra.mxu0 %vm157_vm1, %v998_v12 }
 0x3d1   :  { %8004 = vmatprep.mubr.msk.f32.mxu0 %vm157_vm1, %v999_v16 }
 0x3d2   :  { %8058 = vmatmul.mubr.msk.f32.gmra.mxu1 %vm157_vm1, %v998_v12 }
 0x3d3   :  { %8060 = vmatprep.mubr.msk.f32.mxu1 %vm157_vm1, %v999_v16 }
 0x3d4   :  { %8005 = vmatmul.mubr.msk.f32.gmra.mxu0 %vm157_vm1, %v1000_v17 }
 0x3d5   :  { %8007 = vmatprep.mubr.msk.f32.mxu0 %vm157_vm1, %v1001_v18 }
 0x3d6   :  { %8061 = vmatmul.mubr.msk.f32.gmra.mxu1 %vm157_vm1, %v1000_v17 }
 0x3d7   :  { %8063 = vmatprep.mubr.msk.f32.mxu1 %vm157_vm1, %v1001_v18 }
 0x3d8   :  { %8008 = vmatmul.mubr.msk.f32.gmra.mxu0 %vm157_vm1, %v1002_v20 }
 0x3d9   :  { %8010 = vmatprep.mubr.msk.f32.mxu0 %vm157_vm1, %v1003_v21 }
 0x3da   :  { %8064 = vmatmul.mubr.msk.f32.gmra.mxu1 %vm157_vm1, %v1002_v20 }
 0x3db   :  { %8066 = vmatprep.mubr.msk.f32.mxu1 %vm157_vm1, %v1003_v21 }
 0x3dc   :  { %8011 = vmatmul.mubr.msk.f32.gmra.mxu0 %vm157_vm1, %v1004_v22 }
 0x3dd   :  { %8013 = vmatprep.mubr.msk.f32.mxu0 %vm157_vm1, %v1005_v23 }
 0x3de   :  { %8067 = vmatmul.mubr.msk.f32.gmra.mxu1 %vm157_vm1, %v1004_v22 }
 0x3df   :  { %8069 = vmatprep.mubr.msk.f32.mxu1 %vm157_vm1, %v1005_v23 }
 0x3e0   :  { %8014 = vmatmul.mubr.msk.f32.gmra.mxu0 %vm157_vm1, %v1006_v24 }
 0x3e1   :  { %8016 = vmatprep.mubr.msk.f32.mxu0 %vm157_vm1, %v1007_v25 }
 0x3e2   :  { %8070 = vmatmul.mubr.msk.f32.gmra.mxu1 %vm157_vm1, %v1006_v24 }
 0x3e3   :  { %8072 = vmatprep.mubr.msk.f32.mxu1 %vm157_vm1, %v1007_v25 }
 0x3e4   :  { %8017 = vmatmul.mubr.msk.f32.gmra.mxu0 %vm157_vm1, %v1008_v30 }
 0x3e5   :  { %8019 = vmatprep.mubr.msk.f32.mxu0 %vm157_vm1, %v1009_v31 }
 0x3e6   :  { %8073 = vmatmul.mubr.msk.f32.gmra.mxu1 %vm157_vm1, %v1008_v30 }
 0x3e7   :  { %8075 = vmatprep.mubr.msk.f32.mxu1 %vm157_vm1, %v1009_v31 }
 0x3e8   :  { %8020 = vmatmul.mubr.msk.f32.gmra.mxu0 %vm157_vm1, %v1010_v34 }
 0x3e9   :  { %8086 = vmatprep.mubr.msk.f32.mxu0 %vm157_vm1, %v9189_v44  ;;  %v11304_v44 = vmov 1.0  }
 0x3ea   :  { %8076 = vmatmul.mubr.msk.f32.gmra.mxu1 %vm157_vm1, %v1010_v34  ;;  %8134 = vmatprep.subr.mxu1 %v11304_v44 }
 0x3eb   :  { %8186 = vmatprep.subr.mxu0 %v11304_v44  ;;  %8135 = vmatpush3.msra.mxu1 %v11304_v44 }
 0x3ec   :  { %8087 = vmatmul.mubr.msk.f32.vlgmr.msra.gmra.mxu0 %vm157_vm1, %v9205_v50  ;;  %8136 = vmatprep.subr.mxu1 %v11304_v44 }
 0x3ed   :  { %8089 = vmatprep.mubr.msk.f32.mxu0 %vm157_vm1, %v9211_v52  ;;  %8187 = vmatpush3.msra.mxu0 %v11304_v44  ;;  %v2562_v52 = vld [vmem:[%s11300_s3 + $0x3c8] sm:$0xff] }
 0x3ee   :  { %8188 = vmatprep.subr.mxu0 %v11304_v44  ;;  %8137 = vmatpush3.msra.mxu1 %v11304_v44 }
 0x3ef   :  { %8189 = vmatpush3.msra.mxu0 %v11304_v44 }
 0x3f0   :  { %8090 = vmatmul.mubr.msk.f32.gmra.mxu0 %vm157_vm1, %v9220_v54 }
 0x3f1   :  { %8092 = vmatprep.mubr.msk.f32.mxu0 %vm157_vm1, %v9225_v55 }
 0x3f4   :  { %8093 = vmatmul.mubr.msk.f32.gmra.mxu0 %vm157_vm1, %v9238_v57 }
 0x3f5   :  { %8095 = vmatprep.mubr.msk.f32.mxu0 %vm157_vm1, %v9243_v58 }
 0x3f8   :  { %8096 = vmatmul.mubr.msk.f32.gmra.mxu0 %vm157_vm1, %v9256_v59 }
 0x3f9   :  { %8098 = vmatprep.mubr.msk.f32.mxu0 %vm157_vm1, %v9261_v60  ;;  %v2564_v60 = vld [vmem:[%s11300_s3 + $0x3d8] sm:$0xff] }
 0x3fc   :  { %8099 = vmatmul.mubr.msk.f32.gmra.mxu0 %vm157_vm1, %v9274_v61 }
 0x3fd   :  { %8101 = vmatprep.mubr.msk.f32.mxu0 %vm157_vm1, %v9279_v62 }
 0x400   :  { %8102 = vmatmul.mubr.msk.f32.gmra.mxu0 %vm157_vm1, %v9292_v15 }
 0x401   :  { %8104 = vmatprep.mubr.msk.f32.mxu0 %vm157_vm1, %v9297_v4  ;;  %v2563_v4 = vld [vmem:[%s11300_s3 + $0x3d0] sm:$0xff] }
 0x404   :  { %8105 = vmatmul.mubr.msk.f32.gmra.mxu0 %vm157_vm1, %v9310_v5 }
 0x405   :  { %8107 = vmatprep.mubr.msk.f32.mxu0 %vm157_vm1, %v9315_v6 }
 0x408   :  { %8108 = vmatmul.mubr.msk.f32.gmra.mxu0 %vm157_vm1, %v9328_v8 }
 0x409   :  { %8110 = vmatprep.mubr.msk.f32.mxu0 %vm157_vm1, %v9333_v9  ;;  %v2566_v9 = vld [vmem:[%s11300_s3 + $0x3e8] sm:$0xff] }
 0x40c   :  { %8111 = vmatmul.mubr.msk.f32.gmra.mxu0 %vm157_vm1, %v9346_v10 }
 0x40d   :  { %8113 = vmatprep.mubr.msk.f32.mxu0 %vm157_vm1, %v9351_v11 }
 0x410   :  { %8114 = vmatmul.mubr.msk.f32.gmra.mxu0 %vm157_vm1, %v998_v12 }
 0x411   :  { %8116 = vmatprep.mubr.msk.f32.mxu0 %vm157_vm1, %v999_v16  ;;  %v2565_v16 = vld [vmem:[%s11300_s3 + $0x3e0] sm:$0xff] }
 0x414   :  { %8117 = vmatmul.mubr.msk.f32.gmra.mxu0 %vm157_vm1, %v1000_v17 }
 0x415   :  { %8119 = vmatprep.mubr.msk.f32.mxu0 %vm157_vm1, %v1001_v18 }
 0x418   :  { %8120 = vmatmul.mubr.msk.f32.gmra.mxu0 %vm157_vm1, %v1002_v20 }
 0x419   :  { %8122 = vmatprep.mubr.msk.f32.mxu0 %vm157_vm1, %v1003_v21 }
 0x41c   :  { %8123 = vmatmul.mubr.msk.f32.gmra.mxu0 %vm157_vm1, %v1004_v22  ;;  %v2568_v22 = vld [vmem:[%s11300_s3 + $0x3f8] sm:$0xff] }
 0x41d   :  { %8125 = vmatprep.mubr.msk.f32.mxu0 %vm157_vm1, %v1005_v23 }
 0x420   :  { %8126 = vmatmul.mubr.msk.f32.gmra.mxu0 %vm157_vm1, %v1006_v24 }
 0x421   :  { %8128 = vmatprep.mubr.msk.f32.mxu0 %vm157_vm1, %v1007_v25 }
 0x424   :  { %8129 = vmatmul.mubr.msk.f32.gmra.mxu0 %vm157_vm1, %v1008_v30 }
 0x425   :  { %8131 = vmatprep.mubr.msk.f32.mxu0 %vm157_vm1, %v1009_v31  ;;  %v2567_v31 = vld [vmem:[%s11300_s3 + $0x3f0] sm:$0xff] }
 0x428   :  { %8132 = vmatmul.mubr.msk.f32.gmra.mxu0 %vm157_vm1, %v1010_v34 }
 0x46b   :  { %v7976_v37 = vpop.f32.mrf.mxu0 }
 0x46c   :  { %v2590_v41 = vmul.f32 %v7976_v37, %v2558_v36 }
 0x46d   :  { %v1173_v42 = vpop.f32.mrf.mxu0 }
 0x46e   :  { %v2623_v43 = vmul.f32 1.442695, %v2590_v41  ;;  %v2589_v45 = vmul.f32 %v2557_v40, %v1173_v42  ;;  %v2570_v41 = vld [vmem:[%s11300_s3 + $0x408] sm:$0xff] }
 0x470   :  { %8752 = vpow2.f32 %v2623_v43  ;;  %v2621_v47 = vmul.f32 1.442695, %v2589_v45  ;;  %v7979_v48 = vpop.f32.mrf.mxu0 }
 0x471   :  { %v2592_v50 = vmul.f32 %v7979_v48, %v2560_v46 }
 0x472   :  { %8754 = vpow2.f32 %v2621_v47  ;;  %v1183_v51 = vpop.f32.mrf.mxu0  ;;  %v2569_v47 = vld [vmem:[%s11300_s3 + $0x400] sm:$0xff] }
 0x473   :  { %v2627_v53 = vmul.f32 1.442695, %v2592_v50  ;;  %v2591_v54 = vmul.f32 %v2559_v49, %v1183_v51 }
 0x474   :  { %v7982_v55 = vpop.f32.mrf.mxu0 }
 0x475   :  { %8756 = vpow2.f32 %v2627_v53  ;;  %v2625_v57 = vmul.f32 1.442695, %v2591_v54  ;;  %v2594_v58 = vmul.f32 %v7982_v55, %v2562_v52  ;;  %v2572_v52 = vld [vmem:[%s11300_s3 + $0x418] sm:$0xff] }
 0x476   :  { %v1193_v59 = vpop.f32.mrf.mxu0 }
 0x477   :  { %8758 = vpow2.f32 %v2625_v57  ;;  %v2631_v61 = vmul.f32 1.442695, %v2594_v58  ;;  %v2593_v62 = vmul.f32 %v2561_v56, %v1193_v59  ;;  %v2571_v57 = vld [vmem:[%s11300_s3 + $0x410] sm:$0xff] }
 0x478   :  { %v7985_v15 = vpop.f32.mrf.mxu0 }
 0x479   :  { %8760 = vpow2.f32 %v2631_v61  ;;  %v2629_v5 = vmul.f32 1.442695, %v2593_v62  ;;  %v2596_v6 = vmul.f32 %v7985_v15, %v2564_v60  ;;  %v2574_v62 = vld [vmem:[%s11300_s3 + $0x428] sm:$0xff] }
 0x47a   :  { %v1203_v8 = vpop.f32.mrf.mxu0 }
 0x47b   :  { %8762 = vpow2.f32 %v2629_v5  ;;  %v2635_v10 = vmul.f32 1.442695, %v2596_v6  ;;  %v2595_v11 = vmul.f32 %v2563_v4, %v1203_v8  ;;  %v2573_v8 = vld [vmem:[%s11300_s3 + $0x420] sm:$0xff] }
 0x47c   :  { %v7988_v12 = vpop.f32.mrf.mxu0 }
 0x47d   :  { %v8753_v17 = vpop.eup %8752  ;;  %8764 = vpow2.f32 %v2635_v10  ;;  %v2633_v18 = vmul.f32 1.442695, %v2595_v11  ;;  %v2598_v20 = vmul.f32 %v7988_v12, %v2566_v9 }
 0x47e   :  { %2686 = vst.msk [vmem:[#allocation2 + $0x8] sm:$0xff] %vm806_vm2, %v8753_v17  ;;  %v1213_v21 = vpop.f32.mrf.mxu0 }
 0x47f   :  { %v8755_v23 = vpop.eup %8754  ;;  %8766 = vpow2.f32 %v2633_v18  ;;  %v2639_v24 = vmul.f32 1.442695, %v2598_v20  ;;  %v2597_v25 = vmul.f32 %v2565_v16, %v1213_v21  ;;  %v2576_v16 = vld [vmem:[%s11300_s3 + $0x438] sm:$0xff] }
 0x480   :  { %2685 = vst.msk [vmem:[#allocation2] sm:$0xff] %vm806_vm2, %v8755_v23  ;;  %v7991_v30 = vpop.f32.mrf.mxu0 }
 0x481   :  { %8768 = vpow2.f32 %v2639_v24  ;;  %v2637_v34 = vmul.f32 1.442695, %v2597_v25  ;;  %v2600_v36 = vmul.f32 %v7991_v30, %v2568_v22  ;;  %v2575_v22 = vld [vmem:[%s11300_s3 + $0x430] sm:$0xff] }
 0x482   :  { %v8757_v37 = vpop.eup %8756  ;;  %v1223_v40 = vpop.f32.mrf.mxu0 }
 0x483   :  { %2688 = vst.msk [vmem:[#allocation2 + $0x18] sm:$0xff] %vm806_vm2, %v8757_v37  ;;  %8770 = vpow2.f32 %v2637_v34  ;;  %v2643_v42 = vmul.f32 1.442695, %v2600_v36  ;;  %v2599_v43 = vmul.f32 %v2567_v31, %v1223_v40  ;;  %v2578_v31 = vld [vmem:[%s11300_s3 + $0x448] sm:$0xff] }
 0x484   :  { %v8759_v45 = vpop.eup %8758  ;;  %v7994_v46 = vpop.f32.mrf.mxu0 }
 0x485   :  { %2687 = vst.msk [vmem:[#allocation2 + $0x10] sm:$0xff] %vm806_vm2, %v8759_v45  ;;  %8772 = vpow2.f32 %v2643_v42  ;;  %v2641_v48 = vmul.f32 1.442695, %v2599_v43  ;;  %v2602_v49 = vmul.f32 %v7994_v46, %v2570_v41  ;;  %v2577_v41 = vld [vmem:[%s11300_s3 + $0x440] sm:$0xff] }
 0x486   :  { %v8761_v50 = vpop.eup %8760  ;;  %v1233_v51 = vpop.f32.mrf.mxu0 }
 0x487   :  { %2690 = vst.msk [vmem:[#allocation2 + $0x28] sm:$0xff] %vm806_vm2, %v8761_v50  ;;  %8774 = vpow2.f32 %v2641_v48  ;;  %v2647_v53 = vmul.f32 1.442695, %v2602_v49  ;;  %v2601_v54 = vmul.f32 %v2569_v47, %v1233_v51  ;;  %v2580_v47 = vld [vmem:[%s11300_s3 + $0x458] sm:$0xff] }
 0x488   :  { %v8763_v55 = vpop.eup %8762  ;;  %v7997_v56 = vpop.f32.mrf.mxu0 }
 0x489   :  { %2689 = vst.msk [vmem:[#allocation2 + $0x20] sm:$0xff] %vm806_vm2, %v8763_v55  ;;  %8776 = vpow2.f32 %v2647_v53  ;;  %v2645_v58 = vmul.f32 1.442695, %v2601_v54  ;;  %v2604_v59 = vmul.f32 %v7997_v56, %v2572_v52  ;;  %v2579_v52 = vld [vmem:[%s11300_s3 + $0x450] sm:$0xff] }
 0x48a   :  { %v8765_v60 = vpop.eup %8764  ;;  %v1243_v61 = vpop.f32.mrf.mxu0 }
 0x48b   :  { %2692 = vst.msk [vmem:[#allocation2 + $0x38] sm:$0xff] %vm806_vm2, %v8765_v60  ;;  %8778 = vpow2.f32 %v2645_v58  ;;  %v2651_v15 = vmul.f32 1.442695, %v2604_v59  ;;  %v2603_v4 = vmul.f32 %v2571_v57, %v1243_v61  ;;  %v2582_v57 = vld [vmem:[%s11300_s3 + $0x468] sm:$0xff] }
 0x48c   :  { %v8767_v5 = vpop.eup %8766  ;;  %v8000_v6 = vpop.f32.mrf.mxu0 }
 0x48d   :  { %2691 = vst.msk [vmem:[#allocation2 + $0x30] sm:$0xff] %vm806_vm2, %v8767_v5  ;;  %8780 = vpow2.f32 %v2651_v15  ;;  %v2649_v9 = vmul.f32 1.442695, %v2603_v4  ;;  %v2606_v10 = vmul.f32 %v8000_v6, %v2574_v62  ;;  %v2581_v62 = vld [vmem:[%s11300_s3 + $0x460] sm:$0xff] }
 0x48e   :  { %v8769_v11 = vpop.eup %8768  ;;  %v1253_v12 = vpop.f32.mrf.mxu0 }
 0x48f   :  { %2694 = vst.msk [vmem:[#allocation2 + $0x48] sm:$0xff] %vm806_vm2, %v8769_v11  ;;  %8782 = vpow2.f32 %v2649_v9  ;;  %v2655_v17 = vmul.f32 1.442695, %v2606_v10  ;;  %v2605_v18 = vmul.f32 %v2573_v8, %v1253_v12  ;;  %v2584_v8 = vld [vmem:[%s11300_s3 + $0x478] sm:$0xff] }
 0x490   :  { %v8771_v20 = vpop.eup %8770  ;;  %v8003_v21 = vpop.f32.mrf.mxu0 }
 0x491   :  { %2693 = vst.msk [vmem:[#allocation2 + $0x40] sm:$0xff] %vm806_vm2, %v8771_v20  ;;  %8784 = vpow2.f32 %v2655_v17  ;;  %v2653_v23 = vmul.f32 1.442695, %v2605_v18  ;;  %v2608_v24 = vmul.f32 %v8003_v21, %v2576_v16  ;;  %v2583_v16 = vld [vmem:[%s11300_s3 + $0x470] sm:$0xff] }
 0x492   :  { %v8773_v25 = vpop.eup %8772  ;;  %v1263_v30 = vpop.f32.mrf.mxu0 }
 0x493   :  { %2696 = vst.msk [vmem:[#allocation2 + $0x58] sm:$0xff] %vm806_vm2, %v8773_v25  ;;  %8786 = vpow2.f32 %v2653_v23  ;;  %v2659_v34 = vmul.f32 1.442695, %v2608_v24  ;;  %v2607_v36 = vmul.f32 %v2575_v22, %v1263_v30  ;;  %v2586_v22 = vld [vmem:[%s11300_s3 + $0x488] sm:$0xff] }
 0x494   :  { %v8775_v37 = vpop.eup %8774  ;;  %v8006_v40 = vpop.f32.mrf.mxu0 }
 0x495   :  { %2695 = vst.msk [vmem:[#allocation2 + $0x50] sm:$0xff] %vm806_vm2, %v8775_v37  ;;  %8788 = vpow2.f32 %v2659_v34  ;;  %v2657_v42 = vmul.f32 1.442695, %v2607_v36  ;;  %v2610_v43 = vmul.f32 %v8006_v40, %v2578_v31  ;;  %v2585_v31 = vld [vmem:[%s11300_s3 + $0x480] sm:$0xff] }
 0x496   :  { %v8777_v45 = vpop.eup %8776  ;;  %v1273_v46 = vpop.f32.mrf.mxu0 }
 0x497   :  { %2698 = vst.msk [vmem:[#allocation2 + $0x68] sm:$0xff] %vm806_vm2, %v8777_v45  ;;  %8790 = vpow2.f32 %v2657_v42  ;;  %v2663_v48 = vmul.f32 1.442695, %v2610_v43  ;;  %v2609_v49 = vmul.f32 %v2577_v41, %v1273_v46  ;;  %v2588_v41 = vld [vmem:[%s11300_s3 + $0x498] sm:$0xff] }
 0x498   :  { %v8779_v50 = vpop.eup %8778  ;;  %v8009_v51 = vpop.f32.mrf.mxu0 }
 0x499   :  { %2697 = vst.msk [vmem:[#allocation2 + $0x60] sm:$0xff] %vm806_vm2, %v8779_v50  ;;  %8792 = vpow2.f32 %v2663_v48  ;;  %v2661_v53 = vmul.f32 1.442695, %v2609_v49  ;;  %v2612_v54 = vmul.f32 %v8009_v51, %v2580_v47  ;;  %v2587_v47 = vld [vmem:[%s11300_s3 + $0x490] sm:$0xff] }
 0x49a   :  { %v8781_v55 = vpop.eup %8780  ;;  %v1283_v56 = vpop.f32.mrf.mxu0 }
 0x49b   :  { %2700 = vst.msk [vmem:[#allocation2 + $0x78] sm:$0xff] %vm806_vm2, %v8781_v55  ;;  %8794 = vpow2.f32 %v2661_v53  ;;  %v2667_v58 = vmul.f32 1.442695, %v2612_v54  ;;  %v2611_v59 = vmul.f32 %v2579_v52, %v1283_v56  ;;  %v1786_v56 = vld [vmem:[%s11300_s3 + $0x100] sm:$0xff] }
 0x49c   :  { %v8783_v60 = vpop.eup %8782  ;;  %v8012_v61 = vpop.f32.mrf.mxu0 }
 0x49d   :  { %2699 = vst.msk [vmem:[#allocation2 + $0x70] sm:$0xff] %vm806_vm2, %v8783_v60  ;;  %8796 = vpow2.f32 %v2667_v58  ;;  %v2665_v15 = vmul.f32 1.442695, %v2611_v59  ;;  %v2614_v4 = vmul.f32 %v8012_v61, %v2582_v57  ;;  %v2172_v57 = vld [vmem:[%s11300_s3 + $0x200] sm:$0xff]  ;;  %v1787_v59 = vld [vmem:[%s11300_s3 + $0x108] sm:$0xff] }
 0x49e   :  { %v8785_v5 = vpop.eup %8784  ;;  %v1293_v6 = vpop.f32.mrf.mxu0  ;;  %v2173_v60 = vld [vmem:[%s11300_s3 + $0x208] sm:$0xff] }
 0x49f   :  { %2702 = vst.msk [vmem:[#allocation2 + $0x88] sm:$0xff] %vm806_vm2, %v8785_v5  ;;  %8798 = vpow2.f32 %v2665_v15  ;;  %v2671_v9 = vmul.f32 1.442695, %v2614_v4  ;;  %v2613_v10 = vmul.f32 %v2581_v62, %v1293_v6 }
 0x4a0   :  { %v8787_v11 = vpop.eup %8786  ;;  %v8015_v12 = vpop.f32.mrf.mxu0 }
 0x4a1   :  { %2701 = vst.msk [vmem:[#allocation2 + $0x80] sm:$0xff] %vm806_vm2, %v8787_v11  ;;  %8800 = vpow2.f32 %v2671_v9  ;;  %v2669_v17 = vmul.f32 1.442695, %v2613_v10  ;;  %v2616_v18 = vmul.f32 %v8015_v12, %v2584_v8  ;;  %v1788_v10 = vld [vmem:[%s11300_s3 + $0x110] sm:$0xff]  ;;  %v1789_v12 = vld [vmem:[%s11300_s3 + $0x118] sm:$0xff] }
 0x4a2   :  { %v8789_v20 = vpop.eup %8788  ;;  %v1303_v21 = vpop.f32.mrf.mxu0  ;;  %v2174_v11 = vld [vmem:[%s11300_s3 + $0x210] sm:$0xff] }
 0x4a3   :  { %2704 = vst.msk [vmem:[#allocation2 + $0x98] sm:$0xff] %vm806_vm2, %v8789_v20  ;;  %8802 = vpow2.f32 %v2669_v17  ;;  %v2675_v23 = vmul.f32 1.442695, %v2616_v18  ;;  %v2615_v24 = vmul.f32 %v2583_v16, %v1303_v21  ;;  %v2175_v16 = vld [vmem:[%s11300_s3 + $0x218] sm:$0xff] }
 0x4a4   :  { %v8791_v25 = vpop.eup %8790  ;;  %v8018_v30 = vpop.f32.mrf.mxu0 }
 0x4a5   :  { %2703 = vst.msk [vmem:[#allocation2 + $0x90] sm:$0xff] %vm806_vm2, %v8791_v25  ;;  %8804 = vpow2.f32 %v2675_v23  ;;  %v2673_v34 = vmul.f32 1.442695, %v2615_v24  ;;  %v2618_v36 = vmul.f32 %v8018_v30, %v2586_v22  ;;  %v1790_v30 = vld [vmem:[%s11300_s3 + $0x120] sm:$0xff] }
 0x4a6   :  { %v8793_v37 = vpop.eup %8792  ;;  %v1313_v40 = vpop.f32.mrf.mxu0 }
 0x4a7   :  { %2706 = vst.msk [vmem:[#allocation2 + $0xa8] sm:$0xff] %vm806_vm2, %v8793_v37  ;;  %8806 = vpow2.f32 %v2673_v34  ;;  %v2679_v42 = vmul.f32 1.442695, %v2618_v36  ;;  %v2617_v43 = vmul.f32 %v2585_v31, %v1313_v40  ;;  %v2176_v31 = vld [vmem:[%s11300_s3 + $0x220] sm:$0xff]  ;;  %v1791_v34 = vld [vmem:[%s11300_s3 + $0x128] sm:$0xff] }
 0x4a8   :  { %v8795_v45 = vpop.eup %8794  ;;  %v8021_v46 = vpop.f32.mrf.mxu0  ;;  %v2177_v36 = vld [vmem:[%s11300_s3 + $0x228] sm:$0xff] }
 0x4a9   :  { %2705 = vst.msk [vmem:[#allocation2 + $0xa0] sm:$0xff] %vm806_vm2, %v8795_v45  ;;  %8808 = vpow2.f32 %v2679_v42  ;;  %v2677_v48 = vmul.f32 1.442695, %v2617_v43  ;;  %v2620_v49 = vmul.f32 %v8021_v46, %v2588_v41 }
 0x4aa   :  { %v8797_v50 = vpop.eup %8796  ;;  %v1323_v51 = vpop.f32.mrf.mxu0 }
 0x4ab   :  { %2708 = vst.msk [vmem:[#allocation2 + $0xb8] sm:$0xff] %vm806_vm2, %v8797_v50  ;;  %8810 = vpow2.f32 %v2677_v48  ;;  %v2683_v52 = vmul.f32 1.442695, %v2620_v49  ;;  %v2619_v53 = vmul.f32 %v2587_v47, %v1323_v51  ;;  %v1792_v48 = vld [vmem:[%s11300_s3 + $0x130] sm:$0xff]  ;;  %v1793_v50 = vld [vmem:[%s11300_s3 + $0x138] sm:$0xff] }
 0x4ac   :  { %v8799_v54 = vpop.eup %8798  ;;  %v8088_v55 = vpop.f32.mrf.mxu0  ;;  %v2178_v49 = vld [vmem:[%s11300_s3 + $0x230] sm:$0xff]  ;;  %v2179_v51 = vld [vmem:[%s11300_s3 + $0x238] sm:$0xff] }
 0x4ad   :  { %2707 = vst.msk [vmem:[#allocation2 + $0xb0] sm:$0xff] %vm806_vm2, %v8799_v54  ;;  %8812 = vpow2.f32 %v2683_v52  ;;  %v2681_v58 = vmul.f32 1.442695, %v2619_v53  ;;  %v1819_v6 = vmul.f32 %v8088_v55, %v1787_v59  ;;  %v2205_v8 = vmul.f32 %v8088_v55, %v2173_v60  ;;  %v1794_v60 = vld [vmem:[%s11300_s3 + $0x140] sm:$0xff] }
 0x4ae   :  { %v8801_v61 = vpop.eup %8800  ;;  %v1627_v62 = vpop.f32.mrf.mxu0 }
 0x4af   :  { %2710 = vst.msk [vmem:[#allocation2 + $0xc8] sm:$0xff] %vm806_vm2, %v8801_v61  ;;  %8814 = vpow2.f32 %v2681_v58  ;;  %v1818_v15 = vmul.f32 %v1786_v56, %v1627_v62  ;;  %v2204_v4 = vmul.f32 %v2172_v57, %v1627_v62  ;;  %v2180_v61 = vld [vmem:[%s11300_s3 + $0x240] sm:$0xff]  ;;  %v1795_v62 = vld [vmem:[%s11300_s3 + $0x148] sm:$0xff] }
 0x4b0   :  { %v8803_v5 = vpop.eup %8802  ;;  %v8091_v9 = vpop.f32.mrf.mxu0 }
 0x4b1   :  { %2709 = vst.msk [vmem:[#allocation2 + $0xc0] sm:$0xff] %vm806_vm2, %v8803_v5  ;;  %8138 = vmatprep.mubr.msk.f32.mxu1 %vm1850_vm3, %v1818_v15  ;;  %8190 = vmatprep.mubr.msk.f32.mxu0 %vm1850_vm3, %v2204_v4  ;;  %v1821_v23 = vmul.f32 %v8091_v9, %v1789_v12  ;;  %v2207_v24 = vmul.f32 %v8091_v9, %v2175_v16  ;;  %v2181_v15 = vld [vmem:[%s11300_s3 + $0x248] sm:$0xff]  ;;  %v2182_v12 = vld [vmem:[%s11300_s3 + $0x250] sm:$0xff]  ;;  %v1797_v16 = vld [vmem:[%s11300_s3 + $0x158] sm:$0xff] }
 0x4b2   :  { %v8805_v17 = vpop.eup %8804  ;;  %v1637_v18 = vpop.f32.mrf.mxu0  ;;  %8139 = vmatmul.mubr.msk.f32.vlgmr.msra.gmra.mxu1 %vm1850_vm3, %v1819_v6  ;;  %8191 = vmatmul.mubr.msk.f32.vlgmr.msra.gmra.mxu0 %vm1850_vm3, %v2205_v8 }
 0x4b3   :  { %2712 = vst.msk [vmem:[#allocation2 + $0xd8] sm:$0xff] %vm806_vm2, %v8805_v17  ;;  %v1820_v20 = vmul.f32 %v1788_v10, %v1637_v18  ;;  %v2206_v21 = vmul.f32 %v2174_v11, %v1637_v18  ;;  %v1796_v11 = vld [vmem:[%s11300_s3 + $0x150] sm:$0xff]  ;;  %v2183_v17 = vld [vmem:[%s11300_s3 + $0x258] sm:$0xff] }
 0x4b4   :  { %v8807_v22 = vpop.eup %8806  ;;  %v8094_v25 = vpop.f32.mrf.mxu0 }
 0x4b5   :  { %2711 = vst.msk [vmem:[#allocation2 + $0xd0] sm:$0xff] %vm806_vm2, %v8807_v22  ;;  %8141 = vmatprep.mubr.msk.f32.mxu1 %vm1850_vm3, %v1820_v20  ;;  %8193 = vmatprep.mubr.msk.f32.mxu0 %vm1850_vm3, %v2206_v21  ;;  %v1823_v45 = vmul.f32 %v8094_v25, %v1791_v34  ;;  %v2209_v46 = vmul.f32 %v8094_v25, %v2177_v36  ;;  %v1798_v25 = vld [vmem:[%s11300_s3 + $0x160] sm:$0xff]  ;;  %v2185_v34 = vld [vmem:[%s11300_s3 + $0x268] sm:$0xff] }
 0x4b6   :  { %v8809_v37 = vpop.eup %8808  ;;  %v1647_v40 = vpop.f32.mrf.mxu0  ;;  %8142 = vmatmul.mubr.msk.f32.gmra.mxu1 %vm1850_vm3, %v1821_v23  ;;  %8194 = vmatmul.mubr.msk.f32.gmra.mxu0 %vm1850_vm3, %v2207_v24 }
 0x4b7   :  { %2714 = vst.msk [vmem:[#allocation2 + $0xe8] sm:$0xff] %vm806_vm2, %v8809_v37  ;;  %v1822_v41 = vmul.f32 %v1790_v30, %v1647_v40  ;;  %v2208_v42 = vmul.f32 %v2176_v31, %v1647_v40  ;;  %v2184_v30 = vld [vmem:[%s11300_s3 + $0x260] sm:$0xff]  ;;  %v1799_v31 = vld [vmem:[%s11300_s3 + $0x168] sm:$0xff] }
 0x4b8   :  { %v8811_v43 = vpop.eup %8810  ;;  %v8097_v47 = vpop.f32.mrf.mxu0 }
 0x4b9   :  { %2713 = vst.msk [vmem:[#allocation2 + $0xe0] sm:$0xff] %vm806_vm2, %v8811_v43  ;;  %8144 = vmatprep.mubr.msk.f32.mxu1 %vm1850_vm3, %v1822_v41  ;;  %8196 = vmatprep.mubr.msk.f32.mxu0 %vm1850_vm3, %v2208_v42  ;;  %v1825_v57 = vmul.f32 %v8097_v47, %v1793_v50  ;;  %v2211_v58 = vmul.f32 %v8097_v47, %v2179_v51  ;;  %v1801_v47 = vld [vmem:[%s11300_s3 + $0x178] sm:$0xff] }
 0x4ba   :  { %v8813_v52 = vpop.eup %8812  ;;  %v1657_v53 = vpop.f32.mrf.mxu0  ;;  %8145 = vmatmul.mubr.msk.f32.gmra.mxu1 %vm1850_vm3, %v1823_v45  ;;  %8197 = vmatmul.mubr.msk.f32.gmra.mxu0 %vm1850_vm3, %v2209_v46  ;;  %v1800_v45 = vld [vmem:[%s11300_s3 + $0x170] sm:$0xff] }
 0x4bb   :  { %2716 = vst.msk [vmem:[#allocation2 + $0xf8] sm:$0xff] %vm806_vm2, %v8813_v52  ;;  %v1824_v54 = vmul.f32 %v1792_v48, %v1657_v53  ;;  %v2210_v55 = vmul.f32 %v2178_v49, %v1657_v53  ;;  %v2186_v46 = vld [vmem:[%s11300_s3 + $0x270] sm:$0xff]  ;;  %v2187_v48 = vld [vmem:[%s11300_s3 + $0x278] sm:$0xff] }
 0x4bc   :  { %v8815_v56 = vpop.eup %8814  ;;  %v8100_v59 = vpop.f32.mrf.mxu0 }
 0x4bd   :  { %2715 = vst.msk [vmem:[#allocation2 + $0xf0] sm:$0xff] %vm806_vm2, %v8815_v56  ;;  %8147 = vmatprep.mubr.msk.f32.mxu1 %vm1850_vm3, %v1824_v54  ;;  %8199 = vmatprep.mubr.msk.f32.mxu0 %vm1850_vm3, %v2210_v55  ;;  %v1827_v8 = vmul.f32 %v8100_v59, %v1795_v62  ;;  %v2213_v9 = vmul.f32 %v8100_v59, %v2181_v15  ;;  %v1802_v55 = vld [vmem:[%s11300_s3 + $0x180] sm:$0xff] }
 0x4be   :  { %v1667_v4 = vpop.f32.mrf.mxu0  ;;  %8148 = vmatmul.mubr.msk.f32.gmra.mxu1 %vm1850_vm3, %v1825_v57  ;;  %8200 = vmatmul.mubr.msk.f32.gmra.mxu0 %vm1850_vm3, %v2211_v58  ;;  %v2188_v56 = vld [vmem:[%s11300_s3 + $0x280] sm:$0xff]  ;;  %v1803_v57 = vld [vmem:[%s11300_s3 + $0x188] sm:$0xff] }
 0x4bf   :  { %v1826_v5 = vmul.f32 %v1794_v60, %v1667_v4  ;;  %v2212_v6 = vmul.f32 %v2180_v61, %v1667_v4  ;;  %v2189_v58 = vld [vmem:[%s11300_s3 + $0x288] sm:$0xff] }
 0x4c0   :  { %v8103_v10 = vpop.f32.mrf.mxu0 }
 0x4c1   :  { %8150 = vmatprep.mubr.msk.f32.mxu1 %vm1850_vm3, %v1826_v5  ;;  %8202 = vmatprep.mubr.msk.f32.mxu0 %vm1850_vm3, %v2212_v6  ;;  %v1829_v22 = vmul.f32 %v8103_v10, %v1797_v16  ;;  %v2215_v23 = vmul.f32 %v8103_v10, %v2183_v17  ;;  %v1804_v5 = vld [vmem:[%s11300_s3 + $0x190] sm:$0xff] }
 0x4c2   :  { %v1677_v18 = vpop.f32.mrf.mxu0  ;;  %8151 = vmatmul.mubr.msk.f32.gmra.mxu1 %vm1850_vm3, %v1827_v8  ;;  %8203 = vmatmul.mubr.msk.f32.gmra.mxu0 %vm1850_vm3, %v2213_v9  ;;  %v2190_v6 = vld [vmem:[%s11300_s3 + $0x290] sm:$0xff]  ;;  %v1805_v8 = vld [vmem:[%s11300_s3 + $0x198] sm:$0xff] }
 0x4c3   :  { %v1828_v20 = vmul.f32 %v1796_v11, %v1677_v18  ;;  %v2214_v21 = vmul.f32 %v2182_v12, %v1677_v18  ;;  %v2191_v9 = vld [vmem:[%s11300_s3 + $0x298] sm:$0xff] }
 0x4c4   :  { %v8106_v24 = vpop.f32.mrf.mxu0 }
 0x4c5   :  { %8153 = vmatprep.mubr.msk.f32.mxu1 %vm1850_vm3, %v1828_v20  ;;  %8205 = vmatprep.mubr.msk.f32.mxu0 %vm1850_vm3, %v2214_v21  ;;  %v1831_v41 = vmul.f32 %v8106_v24, %v1799_v31  ;;  %v2217_v42 = vmul.f32 %v8106_v24, %v2185_v34  ;;  %v1806_v20 = vld [vmem:[%s11300_s3 + $0x1a0] sm:$0xff] }
 0x4c6   :  { %v1687_v36 = vpop.f32.mrf.mxu0  ;;  %8154 = vmatmul.mubr.msk.f32.gmra.mxu1 %vm1850_vm3, %v1829_v22  ;;  %8206 = vmatmul.mubr.msk.f32.gmra.mxu0 %vm1850_vm3, %v2215_v23  ;;  %v2192_v21 = vld [vmem:[%s11300_s3 + $0x2a0] sm:$0xff]  ;;  %v1807_v22 = vld [vmem:[%s11300_s3 + $0x1a8] sm:$0xff] }
 0x4c7   :  { %v1830_v37 = vmul.f32 %v1798_v25, %v1687_v36  ;;  %v2216_v40 = vmul.f32 %v2184_v30, %v1687_v36  ;;  %v2193_v23 = vld [vmem:[%s11300_s3 + $0x2a8] sm:$0xff] }
 0x4c8   :  { %v8109_v43 = vpop.f32.mrf.mxu0 }
 0x4c9   :  { %8156 = vmatprep.mubr.msk.f32.mxu1 %vm1850_vm3, %v1830_v37  ;;  %8208 = vmatprep.mubr.msk.f32.mxu0 %vm1850_vm3, %v2216_v40  ;;  %v1833_v52 = vmul.f32 %v8109_v43, %v1801_v47  ;;  %v2219_v53 = vmul.f32 %v8109_v43, %v2187_v48  ;;  %v1808_v37 = vld [vmem:[%s11300_s3 + $0x1b0] sm:$0xff] }
 0x4ca   :  { %v1697_v49 = vpop.f32.mrf.mxu0  ;;  %8157 = vmatmul.mubr.msk.f32.gmra.mxu1 %vm1850_vm3, %v1831_v41  ;;  %8209 = vmatmul.mubr.msk.f32.gmra.mxu0 %vm1850_vm3, %v2217_v42  ;;  %v2194_v40 = vld [vmem:[%s11300_s3 + $0x2b0] sm:$0xff]  ;;  %v1809_v41 = vld [vmem:[%s11300_s3 + $0x1b8] sm:$0xff] }
 0x4cb   :  { %v1832_v50 = vmul.f32 %v1800_v45, %v1697_v49  ;;  %v2218_v51 = vmul.f32 %v2186_v46, %v1697_v49  ;;  %v2195_v42 = vld [vmem:[%s11300_s3 + $0x2b8] sm:$0xff] }
 0x4cc   :  { %v8112_v54 = vpop.f32.mrf.mxu0 }
 0x4cd   :  { %8159 = vmatprep.mubr.msk.f32.mxu1 %vm1850_vm3, %v1832_v50  ;;  %8211 = vmatprep.mubr.msk.f32.mxu0 %vm1850_vm3, %v2218_v51  ;;  %v1835_v62 = vmul.f32 %v8112_v54, %v1803_v57  ;;  %v2221_v15 = vmul.f32 %v8112_v54, %v2189_v58  ;;  %v1810_v50 = vld [vmem:[%s11300_s3 + $0x1c0] sm:$0xff] }
 0x4ce   :  { %v1707_v59 = vpop.f32.mrf.mxu0  ;;  %8160 = vmatmul.mubr.msk.f32.gmra.mxu1 %vm1850_vm3, %v1833_v52  ;;  %8212 = vmatmul.mubr.msk.f32.gmra.mxu0 %vm1850_vm3, %v2219_v53  ;;  %v2196_v51 = vld [vmem:[%s11300_s3 + $0x2c0] sm:$0xff]  ;;  %v1811_v52 = vld [vmem:[%s11300_s3 + $0x1c8] sm:$0xff] }
 0x4cf   :  { %v1834_v60 = vmul.f32 %v1802_v55, %v1707_v59  ;;  %v2220_v61 = vmul.f32 %v2188_v56, %v1707_v59  ;;  %v2197_v53 = vld [vmem:[%s11300_s3 + $0x2c8] sm:$0xff] }
 0x4d0   :  { %v8115_v4 = vpop.f32.mrf.mxu0 }
 0x4d1   :  { %8162 = vmatprep.mubr.msk.f32.mxu1 %vm1850_vm3, %v1834_v60  ;;  %8214 = vmatprep.mubr.msk.f32.mxu0 %vm1850_vm3, %v2220_v61  ;;  %v1837_v16 = vmul.f32 %v8115_v4, %v1805_v8  ;;  %v2223_v17 = vmul.f32 %v8115_v4, %v2191_v9  ;;  %v1812_v60 = vld [vmem:[%s11300_s3 + $0x1d0] sm:$0xff] }
 0x4d2   :  { %v1717_v10 = vpop.f32.mrf.mxu0  ;;  %8163 = vmatmul.mubr.msk.f32.gmra.mxu1 %vm1850_vm3, %v1835_v62  ;;  %8215 = vmatmul.mubr.msk.f32.gmra.mxu0 %vm1850_vm3, %v2221_v15  ;;  %v2198_v61 = vld [vmem:[%s11300_s3 + $0x2d0] sm:$0xff]  ;;  %v1813_v62 = vld [vmem:[%s11300_s3 + $0x1d8] sm:$0xff] }
 0x4d3   :  { %v1836_v11 = vmul.f32 %v1804_v5, %v1717_v10  ;;  %v2222_v12 = vmul.f32 %v2190_v6, %v1717_v10  ;;  %v2199_v15 = vld [vmem:[%s11300_s3 + $0x2d8] sm:$0xff] }
 0x4d4   :  { %v8118_v18 = vpop.f32.mrf.mxu0 }
 0x4d5   :  { %8165 = vmatprep.mubr.msk.f32.mxu1 %vm1850_vm3, %v1836_v11  ;;  %8217 = vmatprep.mubr.msk.f32.mxu0 %vm1850_vm3, %v2222_v12  ;;  %v1839_v31 = vmul.f32 %v8118_v18, %v1807_v22  ;;  %v2225_v34 = vmul.f32 %v8118_v18, %v2193_v23  ;;  %v1814_v11 = vld [vmem:[%s11300_s3 + $0x1e0] sm:$0xff] }
 0x4d6   :  { %v1727_v24 = vpop.f32.mrf.mxu0  ;;  %8166 = vmatmul.mubr.msk.f32.gmra.mxu1 %vm1850_vm3, %v1837_v16  ;;  %8218 = vmatmul.mubr.msk.f32.gmra.mxu0 %vm1850_vm3, %v2223_v17  ;;  %v2200_v12 = vld [vmem:[%s11300_s3 + $0x2e0] sm:$0xff]  ;;  %v1815_v16 = vld [vmem:[%s11300_s3 + $0x1e8] sm:$0xff] }
 0x4d7   :  { %v1838_v25 = vmul.f32 %v1806_v20, %v1727_v24  ;;  %v2224_v30 = vmul.f32 %v2192_v21, %v1727_v24  ;;  %v2201_v17 = vld [vmem:[%s11300_s3 + $0x2e8] sm:$0xff] }
 0x4d8   :  { %v8121_v36 = vpop.f32.mrf.mxu0 }
 0x4d9   :  { %8168 = vmatprep.mubr.msk.f32.mxu1 %vm1850_vm3, %v1838_v25  ;;  %8220 = vmatprep.mubr.msk.f32.mxu0 %vm1850_vm3, %v2224_v30  ;;  %v1841_v47 = vmul.f32 %v8121_v36, %v1809_v41  ;;  %v2227_v48 = vmul.f32 %v8121_v36, %v2195_v42  ;;  %v1816_v25 = vld [vmem:[%s11300_s3 + $0x1f0] sm:$0xff] }
 0x4da   :  { %v1737_v43 = vpop.f32.mrf.mxu0  ;;  %8169 = vmatmul.mubr.msk.f32.gmra.mxu1 %vm1850_vm3, %v1839_v31  ;;  %8221 = vmatmul.mubr.msk.f32.gmra.mxu0 %vm1850_vm3, %v2225_v34  ;;  %v2202_v30 = vld [vmem:[%s11300_s3 + $0x2f0] sm:$0xff]  ;;  %v1817_v31 = vld [vmem:[%s11300_s3 + $0x1f8] sm:$0xff] }
 0x4db   :  { %v1840_v45 = vmul.f32 %v1808_v37, %v1737_v43  ;;  %v2226_v46 = vmul.f32 %v2194_v40, %v1737_v43  ;;  %v2203_v34 = vld [vmem:[%s11300_s3 + $0x2f8] sm:$0xff]  ;;  %v8032_v43 = vpop.f32.mrf.mxu1 }
 0x4dc   :  { %v8124_v49 = vpop.f32.mrf.mxu0 }
 0x4dd   :  { %8171 = vmatprep.mubr.msk.f32.mxu1 %vm1850_vm3, %v1840_v45  ;;  %8223 = vmatprep.mubr.msk.f32.mxu0 %vm1850_vm3, %v2226_v46  ;;  %v1843_v57 = vmul.f32 %v8124_v49, %v1811_v52  ;;  %v2229_v58 = vmul.f32 %v8124_v49, %v2197_v53  ;;  %v1402_v45 = vpop.f32.mrf.mxu1 }
 0x4de   :  { %v1747_v54 = vpop.f32.mrf.mxu0  ;;  %8172 = vmatmul.mubr.msk.f32.gmra.mxu1 %vm1850_vm3, %v1841_v47  ;;  %8224 = vmatmul.mubr.msk.f32.gmra.mxu0 %vm1850_vm3, %v2227_v48 }
 0x4df   :  { %v1842_v55 = vmul.f32 %v1810_v50, %v1747_v54  ;;  %v2228_v56 = vmul.f32 %v2196_v51, %v1747_v54  ;;  %v8035_v46 = vpop.f32.mrf.mxu1 }
 0x4e0   :  { %v8127_v59 = vpop.f32.mrf.mxu0 }
 0x4e1   :  { %8174 = vmatprep.mubr.msk.f32.mxu1 %vm1850_vm3, %v1842_v55  ;;  %8226 = vmatprep.mubr.msk.f32.mxu0 %vm1850_vm3, %v2228_v56  ;;  %v1845_v8 = vmul.f32 %v8127_v59, %v1813_v62  ;;  %v2231_v9 = vmul.f32 %v8127_v59, %v2199_v15  ;;  %v1412_v47 = vpop.f32.mrf.mxu1 }
 0x4e2   :  { %v1757_v4 = vpop.f32.mrf.mxu0  ;;  %8175 = vmatmul.mubr.msk.f32.gmra.mxu1 %vm1850_vm3, %v1843_v57  ;;  %8227 = vmatmul.mubr.msk.f32.gmra.mxu0 %vm1850_vm3, %v2229_v58 }
 0x4e3   :  { %v1844_v5 = vmul.f32 %v1812_v60, %v1757_v4  ;;  %v2230_v6 = vmul.f32 %v2198_v61, %v1757_v4  ;;  %v8038_v48 = vpop.f32.mrf.mxu1 }
 0x4e4   :  { %v8130_v10 = vpop.f32.mrf.mxu0 }
 0x4e5   :  { %8177 = vmatprep.mubr.msk.f32.mxu1 %vm1850_vm3, %v1844_v5  ;;  %8229 = vmatprep.mubr.msk.f32.mxu0 %vm1850_vm3, %v2230_v6  ;;  %v1847_v22 = vmul.f32 %v8130_v10, %v1815_v16  ;;  %v2233_v23 = vmul.f32 %v8130_v10, %v2201_v17  ;;  %v1422_v49 = vpop.f32.mrf.mxu1  ;;  %v2942_v16 = vld [vmem:[%s11301_s4 + $0x8] sm:$0xff] }
 0x4e6   :  { %v1767_v18 = vpop.f32.mrf.mxu0  ;;  %8178 = vmatmul.mubr.msk.f32.gmra.mxu1 %vm1850_vm3, %v1845_v8  ;;  %8230 = vmatmul.mubr.msk.f32.gmra.mxu0 %vm1850_vm3, %v2231_v9 }
 0x4e7   :  { %v1846_v20 = vmul.f32 %v1814_v11, %v1767_v18  ;;  %v2232_v21 = vmul.f32 %v2200_v12, %v1767_v18  ;;  %v9873_v50 = vpop.f32.mrf.mxu1 }
 0x4e8   :  { %v8133_v24 = vpop.f32.mrf.mxu0 }
 0x4e9   :  { %8180 = vmatprep.mubr.msk.f32.mxu1 %vm1850_vm3, %v1846_v20  ;;  %8232 = vmatprep.mubr.msk.f32.mxu0 %vm1850_vm3, %v2232_v21  ;;  %v1849_v41 = vmul.f32 %v8133_v24, %v1817_v31  ;;  %v2235_v42 = vmul.f32 %v8133_v24, %v2203_v34  ;;  %v9875_v51 = vpop.f32.mrf.mxu1 }
 0x4ea   :  { %v1777_v36 = vpop.f32.mrf.mxu0  ;;  %8181 = vmatmul.mubr.msk.f32.gmra.mxu1 %vm1850_vm3, %v1847_v22  ;;  %8233 = vmatmul.mubr.msk.f32.gmra.mxu0 %vm1850_vm3, %v2233_v23 }
 0x4eb   :  { %v1848_v37 = vmul.f32 %v1816_v25, %v1777_v36  ;;  %v2234_v40 = vmul.f32 %v2202_v30, %v1777_v36  ;;  %v9877_v52 = vpop.f32.mrf.mxu1 }
 0x4ed   :  { %8183 = vmatprep.mubr.msk.f32.mxu1 %vm1850_vm3, %v1848_v37  ;;  %8235 = vmatprep.mubr.msk.f32.mxu0 %vm1850_vm3, %v2234_v40  ;;  %v9879_v53 = vpop.f32.mrf.mxu1  ;;  %v2782_v40 = vld [vmem:[#allocation2 + $0x8] sm:$0xff] }
 0x4ee   :  { %8184 = vmatmul.mubr.msk.f32.gmra.mxu1 %vm1850_vm3, %v1849_v41  ;;  %8236 = vmatmul.mubr.msk.f32.gmra.mxu0 %vm1850_vm3, %v2235_v42  ;;  %v2784_v44 = vmul.f32 0.0, %v2782_v40 }
 0x4ef   :  { %v9881_v54 = vpop.f32.mrf.mxu1  ;;  %3085 = vmatprep.mubr.f32.mxu1 %v2942_v16 }
 0x4f1   :  { %v9883_v55 = vpop.f32.mrf.mxu1 }
 0x4f3   :  { %v9885_v56 = vpop.f32.mrf.mxu1 }
 0x4f5   :  { %v9887_v57 = vpop.f32.mrf.mxu1 }
 0x4f7   :  { %v9889_v58 = vpop.f32.mrf.mxu1 }
 0x4f9   :  { %v9891_v59 = vpop.f32.mrf.mxu1 }
 0x4fb   :  { %v9893_v60 = vpop.f32.mrf.mxu1 }
 0x4fd   :  { %v9895_v61 = vpop.f32.mrf.mxu1 }
 0x4ff   :  { %v9897_v62 = vpop.f32.mrf.mxu1 }
 0x501   :  { %v9899_v15 = vpop.f32.mrf.mxu1 }
 0x503   :  { %v9901_v4 = vpop.f32.mrf.mxu1 }
 0x505   :  { %v9903_v5 = vpop.f32.mrf.mxu1 }
 0x507   :  { %v9905_v6 = vpop.f32.mrf.mxu1 }
 0x509   :  { %v9907_v8 = vpop.f32.mrf.mxu1 }
 0x50b   :  { %v9909_v9 = vpop.f32.mrf.mxu1 }
 0x50d   :  { %v9911_v10 = vpop.f32.mrf.mxu1 }
 0x50f   :  { %v9913_v11 = vpop.f32.mrf.mxu1 }
 0x511   :  { %v9915_v12 = vpop.f32.mrf.mxu1 }
 0x513   :  { %v9920_v17 = vpop.f32.mrf.mxu1 }
 0x515   :  { %v9922_v18 = vpop.f32.mrf.mxu1 }
 0x517   :  { %v9924_v20 = vpop.f32.mrf.mxu1 }
 0x519   :  { %v9926_v21 = vpop.f32.mrf.mxu1 }
 0x572   :  { %v8140_v22 = vpop.f32.mrf.mxu1  ;;  %v9928_v23 = vpop.f32.mrf.mxu0 }
 0x573   :  { %v2718_v24 = vmul.f32 %v8140_v22, %v8032_v43  ;;  %v2781_v43 = vld [vmem:[#allocation2] sm:$0xff] }
 0x574   :  { %v2013_v25 = vpop.f32.mrf.mxu1  ;;  %v9930_v30 = vpop.f32.mrf.mxu0 }
 0x575   :  { %2750 = vst.msk [vmem:[#allocation3 + $0x8] sm:$0xff] %vm806_vm2, %v2718_v24  ;;  %v2717_v31 = vmul.f32 %v2013_v25, %v1402_v45 }
 0x576   :  { %v8143_v34 = vpop.f32.mrf.mxu1  ;;  %v9933_v36 = vpop.f32.mrf.mxu0 }
 0x577   :  { %2749 = vst.msk [vmem:[#allocation3] sm:$0xff] %vm806_vm2, %v2717_v31  ;;  %v2720_v37 = vmul.f32 %v8143_v34, %v8035_v46  ;;  %v2783_v31 = vmul.f32 0.0, %v2781_v43 }
 0x578   :  { %v2023_v41 = vpop.f32.mrf.mxu1  ;;  %v9936_v42 = vpop.f32.mrf.mxu0 }
 0x579   :  { %2752 = vst.msk [vmem:[#allocation3 + $0x18] sm:$0xff] %vm806_vm2, %v2720_v37  ;;  %v2719_v16 = vmul.f32 %v2023_v41, %v1412_v47  ;;  %v2792_v37 = vld [vmem:[#allocation2 + $0x18] sm:$0xff] }
 0x57a   :  { %v8146_v22 = vpop.f32.mrf.mxu1  ;;  %v9939_v63 = vpop.f32.mrf.mxu0 }
 0x57b   :  { %2751 = vst.msk [vmem:[#allocation3 + $0x10] sm:$0xff] %vm806_vm2, %v2719_v16  ;;  %v2722_v45 = vmul.f32 %v8146_v22, %v8038_v48  ;;  %v2791_v22 = vld [vmem:[#allocation2 + $0x10] sm:$0xff] }
 0x57c   :  { %v2786_v24 = vld [vmem:[#allocation3 + $0x8] sm:$0xff]  ;;  %v2033_v25 = vpop.f32.mrf.mxu1  ;;  %v9942_v7 = vpop.f32.mrf.mxu0 }
 0x57d   :  { %v2788_v46 = vadd.f32 %v2786_v24, %v2784_v44  ;;  %2754 = vst.msk [vmem:[#allocation3 + $0x28] sm:$0xff] %vm806_vm2, %v2722_v45  ;;  %v2721_v34 = vmul.f32 %v2033_v25, %v1422_v49 }
 0x57e   :  { %v2785_v35 = vld [vmem:[#allocation3] sm:$0xff]  ;;  %v8149_v47 = vpop.f32.mrf.mxu1  ;;  %v9945_v41 = vpop.f32.mrf.mxu0 }
 0x57f   :  { %2790 = vst.msk [vmem:[#allocation4 + $0x8] sm:$0xff] %vm806_vm2, %v2788_v46  ;;  %v2787_v40 = vadd.f32 %v2785_v35, %v2783_v31  ;;  %v2794_v14 = vmul.f32 %v2792_v37, %v2788_v46  ;;  %2753 = vst.msk [vmem:[#allocation3 + $0x20] sm:$0xff] %vm806_vm2, %v2721_v34  ;;  %v2724_v48 = vmul.f32 %v8149_v47, %v9873_v50  ;;  %v2802_v35 = vld [vmem:[#allocation2 + $0x28] sm:$0xff] }
 0x580   :  { %v2796_v16 = vld [vmem:[#allocation3 + $0x18] sm:$0xff]  ;;  %v2043_v44 = vpop.f32.mrf.mxu1  ;;  %v9950_v43 = vpop.f32.mrf.mxu0 }
 0x581   :  { %2789 = vst.msk [vmem:[#allocation4] sm:$0xff] %vm806_vm2, %v2787_v40  ;;  %v2798_v49 = vadd.f32 %v2796_v16, %v2794_v14  ;;  %v2793_v45 = vmul.f32 %v2791_v22, %v2787_v40  ;;  %2756 = vst.msk [vmem:[#allocation3 + $0x38] sm:$0xff] %vm806_vm2, %v2724_v48  ;;  %v2723_v24 = vmul.f32 %v2043_v44, %v9875_v51  ;;  %v2801_v14 = vld [vmem:[#allocation2 + $0x20] sm:$0xff] }
 0x582   :  { %v2795_v25 = vld [vmem:[#allocation3 + $0x10] sm:$0xff]  ;;  %v8152_v46 = vpop.f32.mrf.mxu1  ;;  %v9955_v31 = vpop.f32.mrf.mxu0 }
 0x583   :  { %2800 = vst.msk [vmem:[#allocation4 + $0x18] sm:$0xff] %vm806_vm2, %v2798_v49  ;;  %v2797_v50 = vadd.f32 %v2795_v25, %v2793_v45  ;;  %v2804_v34 = vmul.f32 %v2802_v35, %v2798_v49  ;;  %2755 = vst.msk [vmem:[#allocation3 + $0x30] sm:$0xff] %vm806_vm2, %v2723_v24  ;;  %v2726_v37 = vmul.f32 %v8152_v46, %v9877_v52  ;;  %v2812_v45 = vld [vmem:[#allocation2 + $0x38] sm:$0xff] }
 0x584   :  { %v2806_v47 = vld [vmem:[#allocation3 + $0x28] sm:$0xff]  ;;  %v2053_v40 = vpop.f32.mrf.mxu1  ;;  %v9960_v16 = vpop.f32.mrf.mxu0 }
 0x585   :  { %2799 = vst.msk [vmem:[#allocation4 + $0x10] sm:$0xff] %vm806_vm2, %v2797_v50  ;;  %v2808_v51 = vadd.f32 %v2806_v47, %v2804_v34  ;;  %v2803_v48 = vmul.f32 %v2801_v14, %v2797_v50  ;;  %2758 = vst.msk [vmem:[#allocation3 + $0x48] sm:$0xff] %vm806_vm2, %v2726_v37  ;;  %v2725_v22 = vmul.f32 %v2053_v40, %v9879_v53  ;;  %v2811_v34 = vld [vmem:[#allocation2 + $0x30] sm:$0xff] }
 0x586   :  { %v2805_v44 = vld [vmem:[#allocation3 + $0x20] sm:$0xff]  ;;  %v8155_v49 = vpop.f32.mrf.mxu1  ;;  %v9965_v25 = vpop.f32.mrf.mxu0 }
 0x587   :  { %2810 = vst.msk [vmem:[#allocation4 + $0x28] sm:$0xff] %vm806_vm2, %v2808_v51  ;;  %v2807_v52 = vadd.f32 %v2805_v44, %v2803_v48  ;;  %v2814_v24 = vmul.f32 %v2812_v45, %v2808_v51  ;;  %2757 = vst.msk [vmem:[#allocation3 + $0x40] sm:$0xff] %vm806_vm2, %v2725_v22  ;;  %v2728_v35 = vmul.f32 %v8155_v49, %v9881_v54  ;;  %v2822_v48 = vld [vmem:[#allocation2 + $0x48] sm:$0xff] }
 0x588   :  { %v2816_v46 = vld [vmem:[#allocation3 + $0x38] sm:$0xff]  ;;  %v2063_v50 = vpop.f32.mrf.mxu1  ;;  %v9970_v47 = vpop.f32.mrf.mxu0 }
 0x589   :  { %2809 = vst.msk [vmem:[#allocation4 + $0x20] sm:$0xff] %vm806_vm2, %v2807_v52  ;;  %v2818_v53 = vadd.f32 %v2816_v46, %v2814_v24  ;;  %v2813_v37 = vmul.f32 %v2811_v34, %v2807_v52  ;;  %2760 = vst.msk [vmem:[#allocation3 + $0x58] sm:$0xff] %vm806_vm2, %v2728_v35  ;;  %v2727_v14 = vmul.f32 %v2063_v50, %v9883_v55  ;;  %v2821_v24 = vld [vmem:[#allocation2 + $0x40] sm:$0xff] }
 0x58a   :  { %v2815_v40 = vld [vmem:[#allocation3 + $0x30] sm:$0xff]  ;;  %v8158_v51 = vpop.f32.mrf.mxu1  ;;  %v9975_v44 = vpop.f32.mrf.mxu0 }
 0x58b   :  { %2820 = vst.msk [vmem:[#allocation4 + $0x38] sm:$0xff] %vm806_vm2, %v2818_v53  ;;  %v2817_v54 = vadd.f32 %v2815_v40, %v2813_v37  ;;  %v2824_v22 = vmul.f32 %v2822_v48, %v2818_v53  ;;  %2759 = vst.msk [vmem:[#allocation3 + $0x50] sm:$0xff] %vm806_vm2, %v2727_v14  ;;  %v2730_v45 = vmul.f32 %v8158_v51, %v9885_v56  ;;  %v2832_v37 = vld [vmem:[#allocation2 + $0x58] sm:$0xff]  ;;  %v2831_v51 = vld [vmem:[#allocation2 + $0x50] sm:$0xff] }
 0x58c   :  { %v2826_v49 = vld [vmem:[#allocation3 + $0x48] sm:$0xff]  ;;  %v2073_v52 = vpop.f32.mrf.mxu1  ;;  %v9980_v46 = vpop.f32.mrf.mxu0 }
 0x58d   :  { %2819 = vst.msk [vmem:[#allocation4 + $0x30] sm:$0xff] %vm806_vm2, %v2817_v54  ;;  %v2828_v55 = vadd.f32 %v2826_v49, %v2824_v22  ;;  %v2823_v35 = vmul.f32 %v2821_v24, %v2817_v54  ;;  %2762 = vst.msk [vmem:[#allocation3 + $0x68] sm:$0xff] %vm806_vm2, %v2730_v45  ;;  %v2729_v34 = vmul.f32 %v2073_v52, %v9887_v57 }
 0x58e   :  { %v2825_v50 = vld [vmem:[#allocation3 + $0x40] sm:$0xff]  ;;  %v8161_v53 = vpop.f32.mrf.mxu1  ;;  %v9985_v40 = vpop.f32.mrf.mxu0 }
 0x58f   :  { %2830 = vst.msk [vmem:[#allocation4 + $0x48] sm:$0xff] %vm806_vm2, %v2828_v55  ;;  %v2827_v56 = vadd.f32 %v2825_v50, %v2823_v35  ;;  %v2834_v14 = vmul.f32 %v2832_v37, %v2828_v55  ;;  %2761 = vst.msk [vmem:[#allocation3 + $0x60] sm:$0xff] %vm806_vm2, %v2729_v34  ;;  %v2732_v48 = vmul.f32 %v8161_v53, %v9889_v58  ;;  %v2842_v35 = vld [vmem:[#allocation2 + $0x68] sm:$0xff] }
 0x590   :  { %v2836_v22 = vld [vmem:[#allocation3 + $0x58] sm:$0xff]  ;;  %v2083_v54 = vpop.f32.mrf.mxu1  ;;  %v9990_v49 = vpop.f32.mrf.mxu0 }
 0x591   :  { %2829 = vst.msk [vmem:[#allocation4 + $0x40] sm:$0xff] %vm806_vm2, %v2827_v56  ;;  %v2833_v57 = vmul.f32 %v2831_v51, %v2827_v56  ;;  %v2838_v45 = vadd.f32 %v2836_v22, %v2834_v14  ;;  %2764 = vst.msk [vmem:[#allocation3 + $0x78] sm:$0xff] %vm806_vm2, %v2732_v48  ;;  %v2731_v24 = vmul.f32 %v2083_v54, %v9891_v59  ;;  %v2841_v56 = vld [vmem:[#allocation2 + $0x60] sm:$0xff] }
 0x592   :  { %v2835_v52 = vld [vmem:[#allocation3 + $0x50] sm:$0xff]  ;;  %v8164_v55 = vpop.f32.mrf.mxu1  ;;  %v9995_v50 = vpop.f32.mrf.mxu0 }
 0x593   :  { %2840 = vst.msk [vmem:[#allocation4 + $0x58] sm:$0xff] %vm806_vm2, %v2838_v45  ;;  %v2837_v58 = vadd.f32 %v2835_v52, %v2833_v57  ;;  %v2844_v34 = vmul.f32 %v2842_v35, %v2838_v45  ;;  %2763 = vst.msk [vmem:[#allocation3 + $0x70] sm:$0xff] %vm806_vm2, %v2731_v24  ;;  %v2734_v37 = vmul.f32 %v8164_v55, %v9893_v60  ;;  %v2852_v57 = vld [vmem:[#allocation2 + $0x78] sm:$0xff]  ;;  %v2851_v55 = vld [vmem:[#allocation2 + $0x70] sm:$0xff] }
 0x594   :  { %v2846_v53 = vld [vmem:[#allocation3 + $0x68] sm:$0xff]  ;;  %v2093_v14 = vpop.f32.mrf.mxu1  ;;  %v10000_v51 = vpop.f32.mrf.mxu0 }
 0x595   :  { %2839 = vst.msk [vmem:[#allocation4 + $0x50] sm:$0xff] %vm806_vm2, %v2837_v58  ;;  %v2848_v59 = vadd.f32 %v2846_v53, %v2844_v34  ;;  %v2843_v48 = vmul.f32 %v2841_v56, %v2837_v58  ;;  %2766 = vst.msk [vmem:[#allocation3 + $0x88] sm:$0xff] %vm806_vm2, %v2734_v37  ;;  %v2733_v22 = vmul.f32 %v2093_v14, %v9895_v61 }
 0x596   :  { %v2845_v54 = vld [vmem:[#allocation3 + $0x60] sm:$0xff]  ;;  %v8167_v45 = vpop.f32.mrf.mxu1  ;;  %v10005_v52 = vpop.f32.mrf.mxu0 }
 0x597   :  { %2850 = vst.msk [vmem:[#allocation4 + $0x68] sm:$0xff] %vm806_vm2, %v2848_v59  ;;  %v2847_v60 = vadd.f32 %v2845_v54, %v2843_v48  ;;  %v2854_v24 = vmul.f32 %v2852_v57, %v2848_v59  ;;  %2765 = vst.msk [vmem:[#allocation3 + $0x80] sm:$0xff] %vm806_vm2, %v2733_v22  ;;  %v2736_v35 = vmul.f32 %v8167_v45, %v9897_v62  ;;  %v2862_v48 = vld [vmem:[#allocation2 + $0x88] sm:$0xff] }
 0x598   :  { %v2856_v34 = vld [vmem:[#allocation3 + $0x78] sm:$0xff]  ;;  %v2103_v58 = vpop.f32.mrf.mxu1  ;;  %v10010_v53 = vpop.f32.mrf.mxu0 }
 0x599   :  { %2849 = vst.msk [vmem:[#allocation4 + $0x60] sm:$0xff] %vm806_vm2, %v2847_v60  ;;  %v2853_v61 = vmul.f32 %v2851_v55, %v2847_v60  ;;  %v2858_v37 = vadd.f32 %v2856_v34, %v2854_v24  ;;  %2768 = vst.msk [vmem:[#allocation3 + $0x98] sm:$0xff] %vm806_vm2, %v2736_v35  ;;  %v2735_v56 = vmul.f32 %v2103_v58, %v9899_v15  ;;  %v2861_v60 = vld [vmem:[#allocation2 + $0x80] sm:$0xff] }
 0x59a   :  { %v2855_v14 = vld [vmem:[#allocation3 + $0x70] sm:$0xff]  ;;  %v8170_v59 = vpop.f32.mrf.mxu1  ;;  %v10015_v54 = vpop.f32.mrf.mxu0 }
 0x59b   :  { %2860 = vst.msk [vmem:[#allocation4 + $0x78] sm:$0xff] %vm806_vm2, %v2858_v37  ;;  %v2857_v62 = vadd.f32 %v2855_v14, %v2853_v61  ;;  %v2864_v22 = vmul.f32 %v2862_v48, %v2858_v37  ;;  %2767 = vst.msk [vmem:[#allocation3 + $0x90] sm:$0xff] %vm806_vm2, %v2735_v56  ;;  %v2738_v57 = vmul.f32 %v8170_v59, %v9901_v4  ;;  %v2872_v61 = vld [vmem:[#allocation2 + $0x98] sm:$0xff]  ;;  %v2871_v59 = vld [vmem:[#allocation2 + $0x90] sm:$0xff] }
 0x59c   :  { %v2866_v45 = vld [vmem:[#allocation3 + $0x88] sm:$0xff]  ;;  %v2113_v24 = vpop.f32.mrf.mxu1  ;;  %v10020_v55 = vpop.f32.mrf.mxu0 }
 0x59d   :  { %2859 = vst.msk [vmem:[#allocation4 + $0x70] sm:$0xff] %vm806_vm2, %v2857_v62  ;;  %v2868_v15 = vadd.f32 %v2866_v45, %v2864_v22  ;;  %v2863_v35 = vmul.f32 %v2861_v60, %v2857_v62  ;;  %2770 = vst.msk [vmem:[#allocation3 + $0xa8] sm:$0xff] %vm806_vm2, %v2738_v57  ;;  %v2737_v34 = vmul.f32 %v2113_v24, %v9903_v5  ;;  %v2882_v60 = vld [vmem:[#allocation2 + $0xa8] sm:$0xff] }
 0x59e   :  { %v2865_v58 = vld [vmem:[#allocation3 + $0x80] sm:$0xff]  ;;  %v8173_v37 = vpop.f32.mrf.mxu1  ;;  %v10028_v28 = vpop.f32.mrf.mxu0 }
 0x59f   :  { %2870 = vst.msk [vmem:[#allocation4 + $0x88] sm:$0xff] %vm806_vm2, %v2868_v15  ;;  %v2867_v56 = vadd.f32 %v2865_v58, %v2863_v35  ;;  %v2874_v4 = vmul.f32 %v2872_v61, %v2868_v15  ;;  %2769 = vst.msk [vmem:[#allocation3 + $0xa0] sm:$0xff] %vm806_vm2, %v2737_v34  ;;  %v2740_v14 = vmul.f32 %v8173_v37, %v9905_v6  ;;  %v2881_v58 = vld [vmem:[#allocation2 + $0xa0] sm:$0xff] }
 0x5a0   :  { %v2876_v48 = vld [vmem:[#allocation3 + $0x98] sm:$0xff]  ;;  %v2123_v62 = vpop.f32.mrf.mxu1  ;;  %v10036_v61 = vpop.f32.mrf.mxu0 }
 0x5a1   :  { %2869 = vst.msk [vmem:[#allocation4 + $0x80] sm:$0xff] %vm806_vm2, %v2867_v56  ;;  %v2878_v22 = vadd.f32 %v2876_v48, %v2874_v4  ;;  %v2873_v5 = vmul.f32 %v2871_v59, %v2867_v56  ;;  %2772 = vst.msk [vmem:[#allocation3 + $0xb8] sm:$0xff] %vm806_vm2, %v2740_v14  ;;  %v2739_v57 = vmul.f32 %v2123_v62, %v9907_v8  ;;  %v2892_v48 = vld [vmem:[#allocation2 + $0xb8] sm:$0xff] }
 0x5a2   :  { %v2875_v45 = vld [vmem:[#allocation3 + $0x90] sm:$0xff]  ;;  %v8176_v24 = vpop.f32.mrf.mxu1 }
 0x5a3   :  { %2880 = vst.msk [vmem:[#allocation4 + $0x98] sm:$0xff] %vm806_vm2, %v2878_v22  ;;  %v2877_v15 = vadd.f32 %v2875_v45, %v2873_v5  ;;  %v2884_v6 = vmul.f32 %v2882_v60, %v2878_v22  ;;  %2771 = vst.msk [vmem:[#allocation3 + $0xb0] sm:$0xff] %vm806_vm2, %v2739_v57  ;;  %v2742_v35 = vmul.f32 %v8176_v24, %v9909_v9  ;;  %v2891_v57 = vld [vmem:[#allocation2 + $0xb0] sm:$0xff]  ;;  %v10044_v45 = vpop.f32.mrf.mxu0 }
 0x5a4   :  { %v2886_v34 = vld [vmem:[#allocation3 + $0xa8] sm:$0xff]  ;;  %v2133_v37 = vpop.f32.mrf.mxu1 }
 0x5a5   :  { %2879 = vst.msk [vmem:[#allocation4 + $0x90] sm:$0xff] %vm806_vm2, %v2877_v15  ;;  %v2888_v56 = vadd.f32 %v2886_v34, %v2884_v6  ;;  %v2883_v8 = vmul.f32 %v2881_v58, %v2877_v15  ;;  %2774 = vst.msk [vmem:[#allocation3 + $0xc8] sm:$0xff] %vm806_vm2, %v2742_v35  ;;  %v2741_v4 = vmul.f32 %v2133_v37, %v9911_v10  ;;  %v2902_v35 = vld [vmem:[#allocation2 + $0xc8] sm:$0xff] }
 0x5a6   :  { %v2885_v14 = vld [vmem:[#allocation3 + $0xa0] sm:$0xff]  ;;  %v8179_v59 = vpop.f32.mrf.mxu1 }
 0x5a7   :  { %2890 = vst.msk [vmem:[#allocation4 + $0xa8] sm:$0xff] %vm806_vm2, %v2888_v56  ;;  %v2887_v62 = vadd.f32 %v2885_v14, %v2883_v8  ;;  %v2894_v9 = vmul.f32 %v2892_v48, %v2888_v56  ;;  %2773 = vst.msk [vmem:[#allocation3 + $0xc0] sm:$0xff] %vm806_vm2, %v2741_v4  ;;  %v2744_v22 = vmul.f32 %v8179_v59, %v9913_v11  ;;  %v10052_v8 = vpop.f32.mrf.mxu0  ;;  %v2901_v4 = vld [vmem:[#allocation2 + $0xc0] sm:$0xff] }
 0x5a8   :  { %v2896_v5 = vld [vmem:[#allocation3 + $0xb8] sm:$0xff]  ;;  %v2143_v60 = vpop.f32.mrf.mxu1 }
 0x5a9   :  { %2889 = vst.msk [vmem:[#allocation4 + $0xa0] sm:$0xff] %vm806_vm2, %v2887_v62  ;;  %v2898_v24 = vadd.f32 %v2896_v5, %v2894_v9  ;;  %v2893_v10 = vmul.f32 %v2891_v57, %v2887_v62  ;;  %2776 = vst.msk [vmem:[#allocation3 + $0xd8] sm:$0xff] %vm806_vm2, %v2744_v22  ;;  %v2743_v15 = vmul.f32 %v2143_v60, %v9915_v12  ;;  %v2912_v9 = vld [vmem:[#allocation2 + $0xd8] sm:$0xff] }
 0x5aa   :  { %v2895_v6 = vld [vmem:[#allocation3 + $0xb0] sm:$0xff]  ;;  %v8182_v34 = vpop.f32.mrf.mxu1 }
 0x5ab   :  { %2900 = vst.msk [vmem:[#allocation4 + $0xb8] sm:$0xff] %vm806_vm2, %v2898_v24  ;;  %v2897_v58 = vadd.f32 %v2895_v6, %v2893_v10  ;;  %v2904_v11 = vmul.f32 %v2902_v35, %v2898_v24  ;;  %2775 = vst.msk [vmem:[#allocation3 + $0xd0] sm:$0xff] %vm806_vm2, %v2743_v15  ;;  %v2746_v37 = vmul.f32 %v8182_v34, %v9920_v17  ;;  %v10060_v24 = vpop.f32.mrf.mxu0  ;;  %v2911_v10 = vld [vmem:[#allocation2 + $0xd0] sm:$0xff] }
 0x5ac   :  { %v2906_v56 = vld [vmem:[#allocation3 + $0xc8] sm:$0xff]  ;;  %v2153_v14 = vpop.f32.mrf.mxu1 }
 0x5ad   :  { %2899 = vst.msk [vmem:[#allocation4 + $0xb0] sm:$0xff] %vm806_vm2, %v2897_v58  ;;  %v2908_v48 = vadd.f32 %v2906_v56, %v2904_v11  ;;  %v2903_v12 = vmul.f32 %v2901_v4, %v2897_v58  ;;  %2778 = vst.msk [vmem:[#allocation3 + $0xe8] sm:$0xff] %vm806_vm2, %v2746_v37  ;;  %v2745_v59 = vmul.f32 %v2153_v14, %v9922_v18  ;;  %v2922_v58 = vld [vmem:[#allocation2 + $0xe8] sm:$0xff]  ;;  %v2921_v4 = vld [vmem:[#allocation2 + $0xe0] sm:$0xff] }
 0x5ae   :  { %v2905_v62 = vld [vmem:[#allocation3 + $0xc0] sm:$0xff]  ;;  %v8185_v22 = vpop.f32.mrf.mxu1 }
 0x5af   :  { %2910 = vst.msk [vmem:[#allocation4 + $0xc8] sm:$0xff] %vm806_vm2, %v2908_v48  ;;  %v2907_v5 = vadd.f32 %v2905_v62, %v2903_v12  ;;  %v2914_v17 = vmul.f32 %v2912_v9, %v2908_v48  ;;  %2777 = vst.msk [vmem:[#allocation3 + $0xe0] sm:$0xff] %vm806_vm2, %v2745_v59  ;;  %v2748_v57 = vmul.f32 %v8185_v22, %v9924_v20  ;;  %v2528_v20 = vpop.f32.mrf.mxu0  ;;  %v2932_v59 = vld [vmem:[#allocation2 + $0xf8] sm:$0xff] }
 0x5b0   :  { %v2916_v60 = vld [vmem:[#allocation3 + $0xd8] sm:$0xff]  ;;  %v2163_v15 = vpop.f32.mrf.mxu1 }
 0x5b1   :  { %2909 = vst.msk [vmem:[#allocation4 + $0xc0] sm:$0xff] %vm806_vm2, %v2907_v5  ;;  %v2918_v6 = vadd.f32 %v2916_v60, %v2914_v17  ;;  %v2913_v18 = vmul.f32 %v2911_v10, %v2907_v5  ;;  %2780 = vst.msk [vmem:[#allocation3 + $0xf8] sm:$0xff] %vm806_vm2, %v2748_v57  ;;  %v2747_v35 = vmul.f32 %v2163_v15, %v9926_v21  ;;  %v8234_v9 = vpop.f32.mrf.mxu0  ;;  %v2931_v5 = vld [vmem:[#allocation2 + $0xf0] sm:$0xff] }
 0x5b2   :  { %v2915_v34 = vld [vmem:[#allocation3 + $0xd0] sm:$0xff] }
 0x5b3   :  { %2920 = vst.msk [vmem:[#allocation4 + $0xd8] sm:$0xff] %vm806_vm2, %v2918_v6  ;;  %v2917_v11 = vadd.f32 %v2915_v34, %v2913_v18  ;;  %v2924_v37 = vmul.f32 %v2922_v58, %v2918_v6  ;;  %2779 = vst.msk [vmem:[#allocation3 + $0xf0] sm:$0xff] %vm806_vm2, %v2747_v35  ;;  %v2538_v15 = vpop.f32.mrf.mxu0  ;;  %v2964_v18 = vld [vmem:[#allocation4 + $0x78] sm:$0xff]  ;;  %v2963_v34 = vld [vmem:[#allocation4 + $0x70] sm:$0xff] }
 0x5b4   :  { %v2926_v56 = vld [vmem:[#allocation3 + $0xe8] sm:$0xff] }
 0x5b5   :  { %2919 = vst.msk [vmem:[#allocation4 + $0xd0] sm:$0xff] %vm806_vm2, %v2917_v11  ;;  %v2928_v14 = vadd.f32 %v2926_v56, %v2924_v37  ;;  %v2923_v48 = vmul.f32 %v2921_v4, %v2917_v11  ;;  %v8237_v6 = vpop.f32.mrf.mxu0  ;;  %v2996_v11 = vmul.f32 %v9985_v40, %v2964_v18 }
 0x5b6   :  { %v2925_v12 = vld [vmem:[#allocation3 + $0xe0] sm:$0xff]  ;;  %v2974_v18 = vld [vmem:[#allocation4 + $0xc8] sm:$0xff] }
 0x5b7   :  { %2930 = vst.msk [vmem:[#allocation4 + $0xe8] sm:$0xff] %vm806_vm2, %v2928_v14  ;;  %v2927_v21 = vadd.f32 %v2925_v12, %v2923_v48  ;;  %v2934_v62 = vmul.f32 %v2932_v59, %v2928_v14  ;;  %v2548_v56 = vpop.f32.mrf.mxu0  ;;  %v2962_v14 = vld [vmem:[#allocation4 + $0x68] sm:$0xff]  ;;  %v2995_v12 = vmul.f32 %v2963_v34, %v9990_v49 }
 0x5b8   :  { %v2936_v22 = vld [vmem:[#allocation3 + $0xf8] sm:$0xff]  ;;  %v2973_v34 = vld [vmem:[#allocation4 + $0xc0] sm:$0xff] }
 0x5b9   :  { %2929 = vst.msk [vmem:[#allocation4 + $0xe0] sm:$0xff] %vm806_vm2, %v2927_v21  ;;  %v2938_v17 = vadd.f32 %v2936_v22, %v2934_v62  ;;  %v2933_v57 = vmul.f32 %v2931_v5, %v2927_v21  ;;  %v2961_v21 = vld [vmem:[#allocation4 + $0x60] sm:$0xff]  ;;  %v2994_v22 = vmul.f32 %v9975_v44, %v2962_v14  ;;  %v2954_v14 = vld [vmem:[#allocation4 + $0x28] sm:$0xff] }
 0x5ba   :  { %v2935_v60 = vld [vmem:[#allocation3 + $0xf0] sm:$0xff]  ;;  %v2976_v5 = vld [vmem:[#allocation4 + $0xd8] sm:$0xff]  ;;  %v2993_v40 = vmul.f32 %v2961_v21, %v9980_v46  ;;  %v3006_v46 = vmul.f32 %v10044_v45, %v2974_v18  ;;  %v2970_v45 = vld [vmem:[#allocation4 + $0xa8] sm:$0xff] }
 0x5bb   :  { %2940 = vst.msk [vmem:[#allocation4 + $0xf8] sm:$0xff] %vm806_vm2, %v2938_v17  ;;  %v2937_v10 = vadd.f32 %v2935_v60, %v2933_v57  ;;  %v2960_v17 = vld [vmem:[#allocation4 + $0x58] sm:$0xff]  ;;  %v8697_v18 = vld [vmem:[#allocation5 + $0x80] sm:$0xff]  }
 0x5bc   :  { %v2975_v60 = vld [vmem:[#allocation4 + $0xd0] sm:$0xff]  ;;  %v2992_v49 = vmul.f32 %v9965_v25, %v2960_v17  ;;  %v3005_v25 = vmul.f32 %v2973_v34, %v10052_v8  ;;  %v2969_v8 = vld [vmem:[#allocation4 + $0xa0] sm:$0xff]  ;;  %v2952_v21 = vld [vmem:[#allocation4 + $0x18] sm:$0xff] }
 0x5bd   :  { %2939 = vst.msk [vmem:[#allocation4 + $0xf0] sm:$0xff] %vm806_vm2, %v2937_v10  ;;  %v2959_v10 = vld [vmem:[#allocation4 + $0x50] sm:$0xff]  ;;  %v2950_v17 = vld [vmem:[#allocation4 + $0x8] sm:$0xff] }
 0x5be   :  { %v2978_v37 = vld [vmem:[#allocation4 + $0xe8] sm:$0xff]  ;;  %v2991_v44 = vmul.f32 %v2959_v10, %v9970_v47  ;;  %v2947_v10 = vld [vmem:[%s11301_s4 + $0x30] sm:$0xff] }
 0x5bf   :  { %v3010_v62 = vmul.f32 %v8234_v9, %v2978_v37  ;;  %v2958_v9 = vld [vmem:[#allocation4 + $0x48] sm:$0xff] }
 0x5c0   :  { %v2977_v59 = vld [vmem:[#allocation4 + $0xe0] sm:$0xff] }
 0x5c1   :  { %v3009_v57 = vmul.f32 %v2977_v59, %v2538_v15  ;;  %v2957_v15 = vld [vmem:[#allocation4 + $0x40] sm:$0xff]  ;;  %v2986_v59 = vmul.f32 %v9939_v63, %v2954_v14 }
 0x5c2   :  { %v2980_v35 = vld [vmem:[#allocation4 + $0xf8] sm:$0xff]  ;;  %v2989_v37 = vmul.f32 %v2957_v15, %v9960_v16  ;;  %v3002_v16 = vmul.f32 %v10015_v54, %v2970_v45  ;;  %v2966_v54 = vld [vmem:[#allocation4 + $0x88] sm:$0xff] }
 0x5c3   :  { %v3012_v58 = vmul.f32 %v8237_v6, %v2980_v35  ;;  %v3008_v6 = vmul.f32 %v10060_v24, %v2976_v5  ;;  %v3007_v35 = vmul.f32 %v2975_v60, %v2528_v20  ;;  %v2956_v24 = vld [vmem:[#allocation4 + $0x38] sm:$0xff]  ;;  %v2971_v20 = vld [vmem:[#allocation4 + $0xb0] sm:$0xff]  ;;  %v2984_v5 = vmul.f32 %v9933_v36, %v2952_v21 }
 0x5c4   :  { %v2979_v4 = vld [vmem:[#allocation4 + $0xf0] sm:$0xff]  ;;  %v2982_v60 = vmul.f32 %v9928_v23, %v2950_v17 }
 0x5c5   :  { %v3011_v48 = vmul.f32 %v2979_v4, %v2548_v56  ;;  %7507 = vmatprep.subr.mxu1 %v3012_v58  ;;  %v2990_v58 = vmul.f32 %v9955_v31, %v2958_v9  ;;  %v2955_v56 = vld [vmem:[#allocation4 + $0x30] sm:$0xff]  ;;  %v2988_v4 = vmul.f32 %v9945_v41, %v2956_v24  ;;  %v3003_v31 = vmul.f32 %v2971_v20, %v10036_v61  ;;  %v8698_v9 = vld [vmem:[#allocation5 + $0x78] sm:$0xff]  }
 0x5c6   :  { %7508 = vmatpush3.msra.mxu1 %v2996_v11  ;;  %v2972_v11 = vld [vmem:[#allocation4 + $0xb8] sm:$0xff]  ;;  %v3001_v41 = vmul.f32 %v2969_v8, %v10020_v55  ;;  %v2967_v61 = vld [vmem:[#allocation4 + $0x90] sm:$0xff]  ;;  %v2965_v55 = vld [vmem:[#allocation4 + $0x80] sm:$0xff] }
 0x5c7   :  { %7509 = vmatprep.subr.mxu1 %v3011_v48  ;;  %v3004_v47 = vmul.f32 %v10028_v28, %v2972_v11  ;;  %v2987_v48 = vmul.f32 %v2955_v56, %v9950_v43  ;;  %v2968_v28 = vld [vmem:[#allocation4 + $0x98] sm:$0xff]  ;;  %v2999_v63 = vmul.f32 %v2967_v61, %v10010_v53  ;;  %v2941_v53 = vld [vmem:[%s11301_s4] sm:$0xff]  ;;  %v2943_v23 = vld [vmem:[%s11301_s4 + $0x10] sm:$0xff] }
 0x5c8   :  { %7510 = vmatpush3.msra.mxu1 %v2995_v12  ;;  %v2953_v12 = vld [vmem:[#allocation4 + $0x20] sm:$0xff]  ;;  %v3000_v43 = vmul.f32 %v10005_v52, %v2968_v28  ;;  %v2997_v52 = vmul.f32 %v2965_v55, %v10000_v51  ;;  %v2948_v51 = vld [vmem:[%s11301_s4 + $0x38] sm:$0xff] }
 0x5c9   :  { %7511 = vmatprep.subr.mxu1 %v3010_v62  ;;  %v2985_v62 = vmul.f32 %v2953_v12, %v9942_v7  ;;  %v2998_v7 = vmul.f32 %v9995_v50, %v2966_v54  ;;  %v2945_v50 = vld [vmem:[%s11301_s4 + $0x20] sm:$0xff] }
 0x5ca   :  { %7512 = vmatpush3.msra.mxu1 %v2994_v22  ;;  %v2951_v22 = vld [vmem:[#allocation4 + $0x10] sm:$0xff] }
 0x5cb   :  { %7513 = vmatprep.subr.mxu1 %v3009_v57  ;;  %v2983_v57 = vmul.f32 %v2951_v22, %v9936_v42  ;;  %v2944_v42 = vld [vmem:[%s11301_s4 + $0x18] sm:$0xff] }
 0x5cc   :  { %7514 = vmatpush3.msra.mxu1 %v2993_v40  ;;  %v2949_v40 = vld [vmem:[#allocation4] sm:$0xff] }
 0x5cd   :  { %7515 = vmatprep.subr.mxu1 %v3008_v6  ;;  %v2981_v36 = vmul.f32 %v2949_v40, %v9930_v30  ;;  %v2946_v30 = vld [vmem:[%s11301_s4 + $0x28] sm:$0xff]  ;;  %v8695_v6 = vld [vmem:[#allocation5 + $0x90] sm:$0xff]  }
 0x5ce   :  { %7516 = vmatpush3.msra.mxu1 %v2992_v49  ;;  %v8696_v49 = vld [vmem:[#allocation5 + $0x88] sm:$0xff]  }
 0x5cf   :  { %7517 = vmatprep.subr.mxu1 %v3007_v35  ;;  %v10123_v35 = vld [vmem:[%s11300_s3 + $0x4a8] sm:$0xff] }
 0x5d0   :  { %7518 = vmatpush3.msra.mxu1 %v2991_v44  ;;  %v220_v44 = vrot.slane %v10123_v35, %v9165_v19 }
 0x5d1   :  { %7519 = vmatprep.subr.mxu1 %v3006_v46 }
 0x5d2   :  { %7520 = vmatpush3.msra.mxu1 %v2990_v58  ;;  %v268_v34 = vadd.f32 %v9148_v1, %v220_v44  ;;  %v271_v15 = vadd.f32 %v9152_v3, %v220_v44  ;;  %v276_v11 = vadd.f32 %v9146_v0, %v220_v44  ;;  %v279_v24 = vadd.f32 %v9150_v2, %v220_v44 }
 0x5d3   :  { %7521 = vmatprep.subr.mxu1 %v3005_v25  ;;  %v11315_v0 = vsub.s32 5, %v9043_v13 }
 0x5d4   :  { %7522 = vmatpush3.msra.mxu1 %v2989_v37  ;;  %v7030_v46 = vmul.f32 -1.442695, %v268_v34  ;;  %v7031_v58 = vmul.f32 -1.442695, %v271_v15  ;;  %v7032_v25 = vmul.f32 -1.442695, %v276_v11 }
 0x5d5   :  { %7523 = vmatprep.subr.mxu1 %v3004_v47  ;;  %v7033_v37 = vmul.f32 -1.442695, %v279_v24 }
 0x5d6   :  { %7524 = vmatpush3.msra.mxu1 %v2988_v4  ;;  %8816 = vpow2.f32 %v7030_v46 }
 0x5d7   :  { %7525 = vmatprep.subr.mxu1 %v3003_v31  ;;  %8818 = vpow2.f32 %v7031_v58 }
 0x5d8   :  { %7526 = vmatpush3.msra.mxu1 %v2987_v48  ;;  %8820 = vpow2.f32 %v7032_v25  ;;  %v3016_v48 = vrot.slane %v10123_v35, %v11315_v0 }
 0x5d9   :  { %7527 = vmatprep.subr.mxu1 %v3002_v16  ;;  %8822 = vpow2.f32 %v7033_v37 }
 0x5da   :  { %7528 = vmatpush3.msra.mxu1 %v2986_v59  ;;  %v3017_v59 = vmul.f32 %v3016_v48, %v9171_v33 }
 0x5db   :  { %7529 = vmatprep.subr.mxu1 %v3001_v41 }
 0x5dc   :  { %7530 = vmatpush3.msra.mxu1 %v2985_v62  ;;  %v3018_v62 = vmul.f32 %v3016_v48, %v9169_v32 }
 0x5dd   :  { %7531 = vmatprep.subr.mxu1 %v3000_v43 }
 0x5de   :  { %7532 = vmatpush3.msra.mxu1 %v2984_v5 }
 0x5df   :  { %7533 = vmatprep.subr.mxu1 %v2999_v63 }
 0x5e0   :  { %7534 = vmatpush3.msra.mxu1 %v2983_v57 }
 0x5e1   :  { %7535 = vmatprep.subr.mxu1 %v2998_v7 }
 0x5e2   :  { %7536 = vmatpush3.msra.mxu1 %v2982_v60  ;;  %v3019_v60 = vmul.f32 %v3016_v48, %v9177_v39  ;;  %v8700_v39 = vld [vmem:[#allocation5 + $0x98] sm:$0xff]  }
 0x5e3   :  { %7537 = vmatprep.subr.mxu1 %v2997_v52  ;;  %v8817_v20 = vpop.eup %8816 }
 0x5e4   :  { %7538 = vmatpush3.msra.mxu1 %v2981_v36  ;;  %v8819_v56 = vpop.eup %8818  ;;  %v3118_v47 = vadd.f32 1.0, %v8817_v20 }
 0x5e5   :  { %3086 = vmatmul.mubr.f32.vlgmr.msra.gmra.mxu1 %v2941_v53  ;;  %8238 = vmatprep.subr.bf16.mxu1 %v8695_v6  ;;  %v3119_v4 = vadd.f32 1.0, %v8819_v56  ;;  %v8821_v1 = vpop.eup %8820 }
 0x5e6   :  { %3090 = vmatprep.mubr.f32.mxu1 %v2944_v42  ;;  %8239 = vmatpush3.bf16.msra.mxu1 %v8695_v6  ;;  %8824 = vrcp.f32 %v3118_v47  ;;  %v8823_v3 = vpop.eup %8822  ;;  %v3120_v45 = vadd.f32 1.0, %v8821_v1  ;;  %v3020_v42 = vmul.f32 %v3016_v48, %v9175_v38  ;;  %v11314_v38 = vsub.s32 6, %v9043_v13 }
 0x5e7   :  { %8240 = vmatprep.subr.bf16.mxu1 %v8696_v49  ;;  %8826 = vrcp.f32 %v3119_v4  ;;  %v3121_v14 = vadd.f32 1.0, %v8823_v3 }
 0x5e8   :  { %8828 = vrcp.f32 %v3120_v45  ;;  %v3234_v58 = vrot.slane %v10123_v35, %v11314_v38 }
 0x5e9   :  { %3091 = vmatmul.mubr.f32.gmra.mxu1 %v2943_v23  ;;  %8830 = vrcp.f32 %v3121_v14 }
 0x5ea   :  { %3095 = vmatprep.mubr.f32.mxu1 %v2946_v30  ;;  %8241 = vmatpush3.bf16.msra.mxu1 %v8696_v49  ;;  %v8699_v49 = vld [vmem:[#allocation5 + $0xa0] sm:$0xff]  }
 0x5eb   :  { %8242 = vmatprep.subr.bf16.mxu1 %v8697_v18 }
 0x5ed   :  { %3096 = vmatmul.mubr.f32.gmra.mxu1 %v2945_v50 }
 0x5ee   :  { %3100 = vmatprep.mubr.f32.mxu1 %v2948_v51  ;;  %8243 = vmatpush3.bf16.msra.mxu1 %v8697_v18 }
 0x5ef   :  { %8244 = vmatprep.subr.bf16.mxu1 %v8698_v9 }
 0x5f1   :  { %3101 = vmatmul.mubr.f32.gmra.mxu1 %v2947_v10 }
 0x5f2   :  { %8245 = vmatpush3.bf16.msra.mxu1 %v8698_v9 }
 0x5f3   :  { %v8825_v16 = vpop.eup %8824  ;;  %8250 = vmatprep.subr.bf16.mxu1 %v8699_v49 }
 0x5f4   :  { %v8827_v28 = vpop.eup %8826  ;;  %v3130_v43 = vmul.f32 %v8825_v16, %v268_v34 }
 0x5f5   :  { %v3131_v5 = vmul.f32 %v8827_v28, %v271_v15  ;;  %v8829_v7 = vpop.eup %8828 }
 0x5f6   :  { %v8831_v33 = vpop.eup %8830  ;;  %v3132_v23 = vmul.f32 %v8829_v7, %v276_v11 }
 0x5f7   :  { %v3133_v30 = vmul.f32 %v8831_v33, %v279_v24  ;;  %v11321_v24 = vld [vmem:[#allocation9_spill] sm:$0xff] }
 0x6a5   :  { %v7539_v31 = vpop.f32.mrf.mxu1 }
 0x6a7   :  { %v7540_v2 = vpop.f32.mrf.mxu1 }
 0x6a8   :  { %v7541_v8 = vadd.f32 %v7540_v2, %v7539_v31 }
 0x6a9   :  { %v7542_v12 = vpop.f32.mrf.mxu1 }
 0x6aa   :  { %v3088_v41 = vadd.f32 %v7541_v8, %v3017_v59 }
 0x6ab   :  { %v7543_v21 = vpop.f32.mrf.mxu1 }
 0x6ac   :  { %v7544_v61 = vadd.f32 %v7543_v21, %v7542_v12  ;;  %v3134_v63 = vmul.f32 %v3130_v43, %v3088_v41  ;;  %v3322_v41 = vld [vmem:[%s11300_s3 + $0x390] sm:$0xff] }
 0x6ad   :  { %v7545_v22 = vpop.f32.mrf.mxu1 }
 0x6ae   :  { %v3093_v54 = vadd.f32 %v7544_v61, %v3018_v62  ;;  %v11322_v62 = vmov 1.0   ;;  %v3323_v61 = vld [vmem:[%s11300_s3 + $0x398] sm:$0xff] }
 0x6af   :  { %v7546_v17 = vpop.f32.mrf.mxu1 }
 0x6b0   :  { %v3135_v57 = vmul.f32 %v3131_v5, %v3093_v54  ;;  %v7547_v55 = vadd.f32 %v7546_v17, %v7545_v22  ;;  %v8701_v17 = vld [vmem:[#allocation5 + $0xa8] sm:$0xff]  }
 0x6b1   :  { %v7548_v40 = vpop.f32.mrf.mxu1 }
 0x6b2   :  { %v3146_v52 = vpack.c.bf16 %v3135_v57, %v3134_v63  ;;  %v3098_v53 = vadd.f32 %v7547_v55, %v3019_v60 }
 0x6b3   :  { %v7549_v36 = vpop.f32.mrf.mxu1 }
 0x6b4   :  { %v7550_v32 = vadd.f32 %v7549_v36, %v7548_v40  ;;  %8246 = vmatprep.mubr.msk.bf16.mxu1 %vm806_vm2, %v3146_v52  ;;  %v3136_v51 = vmul.f32 %v3132_v23, %v3098_v53 }
 0x6b6   :  { %v3103_v50 = vadd.f32 %v7550_v32, %v3020_v42 }
 0x6b8   :  { %v3137_v10 = vmul.f32 %v3133_v30, %v3103_v50 }
 0x6ba   :  { %v3147_v6 = vpack.c.bf16 %v3137_v10, %v3136_v51 }
 0x6bc   :  { %8247 = vmatmul.mubr.msk.bf16.vlgmr.msra.gmra.mxu1 %vm806_vm2, %v3147_v6 }
 0x6bd   :  { %8251 = vmatpush3.bf16.msra.mxu1 %v8699_v49 }
 0x6be   :  { %8252 = vmatprep.subr.bf16.mxu1 %v8700_v39 }
 0x6c1   :  { %8253 = vmatpush3.bf16.msra.mxu1 %v8700_v39 }
 0x77c   :  { %v8248_v18 = vpop.f32.mrf.mxu1 }
 0x77d   :  { %v3229_v46 = vadd.f32 %v8248_v18, %v9064_v29 }
 0x77e   :  { %v3212_v9 = vpop.f32.mrf.mxu1 }
 0x77f   :  { %v3227_v34 = vadd.f32 %v3212_v9, %v9060_v27  ;;  %v3237_v47 = vadd.f32 %v3234_v58, %v3229_v46  ;;  %v11313_v27 = vsub.s32 7, %v9043_v13  ;;  %v8705_v46 = vld [vmem:[#allocation5 + $0xc0] sm:$0xff]  }
 0x780   :  { %v8249_v44 = vpop.f32.mrf.mxu1 }
 0x781   :  { %v3230_v15 = vadd.f32 %v8249_v44, %v9058_v26  ;;  %v3235_v20 = vadd.f32 %v3234_v58, %v3227_v34  ;;  %v3320_v26 = vld [vmem:[%s11300_s3 + $0x380] sm:$0xff]  ;;  %v3248_v3 = vrot.slane %v10123_v35, %v11313_v27  ;;  %v3321_v35 = vld [vmem:[%s11300_s3 + $0x388] sm:$0xff]  ;;  %v8702_v44 = vld [vmem:[#allocation5 + $0xb8] sm:$0xff]  }
 0x782   :  { %v3215_v11 = vpop.f32.mrf.mxu1  ;;  %v8703_v34 = vld [vmem:[#allocation5 + $0xc8] sm:$0xff]  }
 0x783   :  { %v3228_v25 = vadd.f32 %v3215_v11, %v11321_v24  ;;  %v3238_v37 = vadd.f32 %v3234_v58, %v3230_v15  ;;  %8296 = vmatprep.subr.bf16.mxu0 %v8703_v34  ;;  %v8704_v15 = vld [vmem:[#allocation5 + $0xb0] sm:$0xff]   ;;  %v11323_v24 = vld [vmem:[#allocation8_spill] sm:$0xff] }
 0x784   :  { %8297 = vmatpush3.bf16.msra.mxu0 %v8703_v34 }
 0x785   :  { %v3236_v56 = vadd.f32 %v3234_v58, %v3228_v25  ;;  %v3244_v1 = vpack.c.bf16 %v3238_v37, %v3237_v47  ;;  %8298 = vmatprep.subr.bf16.mxu0 %v8705_v46  ;;  %v10184_v58 = vld [vmem:[%s11300_s3 + $0x5b8] sm:$0xff] }
 0x786   :  { %v3543_v25 = vrot.slane %v10184_v58, %v11323_v24 }
 0x787   :  { %v3243_v4 = vpack.c.bf16 %v3236_v56, %v3235_v20 }
 0x788   :  { %8299 = vmatpush3.bf16.msra.mxu0 %v8705_v46 }
 0x789   :  { %8254 = vmatprep.mubr.msk.bf16.mxu1 %vm157_vm1, %v3243_v4 }
 0x78a   :  { %8255 = vmatmul.mubr.msk.bf16.vlgmr.msra.gmra.mxu1 %vm157_vm1, %v3244_v1 }
 0x78b   :  { %8266 = vmatprep.mubr.msk.f32.mxu1 %vm157_vm1, %v3320_v26  ;;  %v7055_v26 = vld [vmem:[%s11298_s1 + $0x1] ss:$0 sm:$0xff] }
 0x84a   :  { %v8256_v29 = vpop.f32.mrf.mxu1 }
 0x84b   :  { %v3310_v31 = vadd.f32 %v8256_v29, %v3248_v3 }
 0x84c   :  { %v3301_v45 = vpop.f32.mrf.mxu1 }
 0x84d   :  { %v3318_v16 = vmul.f32 %v3310_v31, %v3310_v31  ;;  %v3302_v59 = vadd.f32 %v3301_v45, %v3248_v3 }
 0x84e   :  { %v8257_v14 = vpop.f32.mrf.mxu1 }
 0x84f   :  { %v3313_v2 = vadd.f32 %v8257_v14, %v3248_v3  ;;  %v3316_v21 = vmul.f32 %v3302_v59, %v3302_v59 }
 0x850   :  { %v3304_v48 = vpop.f32.mrf.mxu1 }
 0x851   :  { %v3319_v8 = vmul.f32 %v3313_v2, %v3313_v2  ;;  %v3305_v12 = vadd.f32 %v3304_v48, %v3248_v3 }
 0x853   :  { %8258 = vmatprep.subr.mxu1 %v3319_v8  ;;  %v3317_v28 = vmul.f32 %v3305_v12, %v3305_v12 }
 0x854   :  { %8259 = vmatpush3.msra.mxu1 %v3319_v8  ;;  %v3765_v8 = vld [vmem:[%s11300_s3 + $0x300] sm:$0xff] }
 0x855   :  { %8260 = vmatprep.subr.mxu1 %v3318_v16 }
 0x856   :  { %8261 = vmatpush3.msra.mxu1 %v3318_v16 }
 0x857   :  { %8262 = vmatprep.subr.mxu1 %v3317_v28 }
 0x858   :  { %8263 = vmatpush3.msra.mxu1 %v3317_v28  ;;  %v11325_v28 = vld [vmem:[#allocation10_spill] sm:$0xff] }
 0x859   :  { %8264 = vmatprep.subr.mxu1 %v3316_v21 }
 0x85a   :  { %8265 = vmatpush3.msra.mxu1 %v3316_v21  ;;  %v3622_v21 = vrot.slane %v10184_v58, %v11325_v28 }
 0x85b   :  { %8267 = vmatmul.mubr.msk.f32.vlgmr.msra.gmra.mxu1 %vm157_vm1, %v3321_v35  ;;  %8272 = vmatprep.subr.mxu1 %v11322_v62 }
 0x85c   :  { %8269 = vmatprep.mubr.msk.f32.mxu1 %vm157_vm1, %v3322_v41  ;;  %8273 = vmatpush3.msra.mxu1 %v11322_v62 }
 0x85d   :  { %8274 = vmatprep.subr.mxu1 %v11322_v62 }
 0x85e   :  { %8275 = vmatpush3.msra.mxu1 %v11322_v62 }
 0x85f   :  { %8270 = vmatmul.mubr.msk.f32.gmra.mxu1 %vm157_vm1, %v3323_v61  ;;  %8282 = vmatprep.subr.bf16.mxu1 %v8701_v17 }
 0x91b   :  { %v8268_v22 = vpop.f32.mrf.mxu1 }
 0x91d   :  { %v3402_v43 = vpop.f32.mrf.mxu1 }
 0x91e   :  { %8276 = vmatprep.mubr.msk.f32.mxu1 %vm1850_vm3, %v3402_v43 }
 0x91f   :  { %v8271_v5 = vpop.f32.mrf.mxu1  ;;  %8277 = vmatmul.mubr.msk.f32.vlgmr.msra.gmra.mxu1 %vm1850_vm3, %v8268_v22 }
 0x920   :  { %8283 = vmatpush3.bf16.msra.mxu1 %v8701_v17  ;;  %v3879_v17 = vld [vmem:[%s11300_s3 + $0x328] sm:$0xff] }
 0x921   :  { %v3412_v54 = vpop.f32.mrf.mxu1  ;;  %8288 = vmatprep.subr.bf16.mxu1 %v8702_v44 }
 0x922   :  { %8279 = vmatprep.mubr.msk.f32.mxu1 %vm1850_vm3, %v3412_v54  ;;  %v3766_v54 = vld [vmem:[%s11300_s3 + $0x308] sm:$0xff] }
 0x923   :  { %8280 = vmatmul.mubr.msk.f32.gmra.mxu1 %vm1850_vm3, %v8271_v5 }
 0x9df   :  { %v8278_v63 = vpop.f32.mrf.mxu1 }
 0x9e0   :  { %v3519_v57 = vmul.f32 0.00390625, %v8278_v63  ;;  %v3767_v63 = vld [vmem:[%s11300_s3 + $0x310] sm:$0xff] }
 0x9e1   :  { %v3499_v55 = vpop.f32.mrf.mxu1 }
 0x9e2   :  { %v3523_v40 = vadd.f32 1e-08, %v3519_v57  ;;  %v3518_v7 = vmul.f32 0.00390625, %v3499_v55  ;;  %v3880_v57 = vld [vmem:[%s11300_s3 + $0x330] sm:$0xff]  ;;  %v3768_v55 = vld [vmem:[%s11300_s3 + $0x318] sm:$0xff] }
 0x9e3   :  { %v8281_v60 = vpop.f32.mrf.mxu1 }
 0x9e4   :  { %8832 = vrsqrt.f32 %v3523_v40  ;;  %v3522_v52 = vadd.f32 1e-08, %v3518_v7  ;;  %v3521_v33 = vmul.f32 0.00390625, %v8281_v60  ;;  %v3881_v40 = vld [vmem:[%s11300_s3 + $0x338] sm:$0xff]  ;;  %v3991_v7 = vld [vmem:[%s11300_s3 + $0x340] sm:$0xff] }
 0x9e5   :  { %v3509_v36 = vpop.f32.mrf.mxu1  ;;  %v4104_v60 = vld [vmem:[%s11300_s3 + $0x360] sm:$0xff] }
 0x9e6   :  { %8834 = vrsqrt.f32 %v3522_v52  ;;  %v3525_v53 = vadd.f32 1e-08, %v3521_v33  ;;  %v3520_v42 = vmul.f32 0.00390625, %v3509_v36  ;;  %v3992_v52 = vld [vmem:[%s11300_s3 + $0x348] sm:$0xff]  ;;  %v3993_v36 = vld [vmem:[%s11300_s3 + $0x350] sm:$0xff] }
 0x9e7   :  { %v4105_v33 = vld [vmem:[%s11300_s3 + $0x368] sm:$0xff] }
 0x9e8   :  { %8836 = vrsqrt.f32 %v3525_v53  ;;  %v3524_v32 = vadd.f32 1e-08, %v3520_v42  ;;  %v4106_v53 = vld [vmem:[%s11300_s3 + $0x370] sm:$0xff]  ;;  %v3994_v42 = vld [vmem:[%s11300_s3 + $0x358] sm:$0xff] }
 0x9ea   :  { %8838 = vrsqrt.f32 %v3524_v32  ;;  %v4107_v32 = vld [vmem:[%s11300_s3 + $0x378] sm:$0xff] }
 0x9f1   :  { %v8833_v23 = vpop.eup %8832 }
 0x9f2   :  { %v3531_v51 = vmul.f32 %v8833_v23, %v3305_v12  ;;  %v3878_v12 = vld [vmem:[%s11300_s3 + $0x320] sm:$0xff]  ;;  %v8706_v23 = vld [vmem:[#allocation5 + $0xe8] sm:$0xff]  }
 0x9f3   :  { %v8835_v30 = vpop.eup %8834 }
 0x9f4   :  { %v3530_v50 = vmul.f32 %v8835_v30, %v3302_v59  ;;  %v8707_v30 = vld [vmem:[#allocation5 + $0x108] sm:$0xff]  }
 0x9f5   :  { %v8837_v10 = vpop.eup %8836 }
 0x9f6   :  { %v3538_v6 = vpack.c.bf16 %v3531_v51, %v3530_v50  ;;  %v3533_v39 = vmul.f32 %v8837_v10, %v3313_v2  ;;  %v8708_v50 = vld [vmem:[#allocation5 + $0xe0] sm:$0xff]   ;;  %v8710_v10 = vld [vmem:[#allocation5 + $0xd8] sm:$0xff]  }
 0x9f7   :  { %v8839_v49 = vpop.eup %8838  ;;  %v8709_v51 = vld [vmem:[#allocation5 + $0x100] sm:$0xff]  }
 0x9f8   :  { %v3532_v18 = vmul.f32 %v8839_v49, %v3310_v31  ;;  %8284 = vmatprep.mubr.msk.bf16.mxu1 %vm1850_vm3, %v3538_v6  ;;  %v8711_v6 = vld [vmem:[#allocation5 + $0xf8] sm:$0xff]   ;;  %v8712_v49 = vld [vmem:[#allocation5 + $0xd0] sm:$0xff]  }
 0x9fa   :  { %v3539_v9 = vpack.c.bf16 %v3533_v39, %v3532_v18  ;;  %v8713_v39 = vld [vmem:[#allocation5 + $0xf0] sm:$0xff]  }
 0x9fc   :  { %8285 = vmatmul.mubr.msk.bf16.vlgmr.msra.gmra.mxu1 %vm1850_vm3, %v3539_v9 }
 0x9fd   :  { %8289 = vmatpush3.bf16.msra.mxu1 %v8702_v44 }
 0x9fe   :  { %8290 = vmatprep.subr.bf16.mxu1 %v8704_v15 }
 0xa01   :  { %8291 = vmatpush3.bf16.msra.mxu1 %v8704_v15  ;;  %v3759_v15 = vld [vmem:[%s11300_s3 + $0x5b0] sm:$0xff] }
 0xabc   :  { %v8286_v11 = vpop.f32.mrf.mxu1 }
 0xabd   :  { %v3599_v4 = vadd.f32 %v8286_v11, %v3543_v25 }
 0xabe   :  { %v3590_v37 = vpop.f32.mrf.mxu1 }
 0xabf   :  { %v3591_v56 = vadd.f32 %v3590_v37, %v3543_v25  ;;  %v10197_v31 = vmul.f32 %v7055_v26, %v3599_v4 }
 0xac0   :  { %v8287_v20 = vpop.f32.mrf.mxu1 }
 0xac1   :  { %v3602_v47 = vadd.f32 %v8287_v20, %v3543_v25  ;;  %v10193_v45 = vmul.f32 %v7055_v26, %v3591_v56  ;;  %v11326_v56 = vld [vmem:[#allocation11_spill] sm:$0xff] }
 0xac2   :  { %v3593_v1 = vpop.f32.mrf.mxu1 }
 0xac3   :  { %v3594_v29 = vadd.f32 %v3593_v1, %v3543_v25  ;;  %v10191_v3 = vmul.f32 %v7055_v26, %v3602_v47  ;;  %v3869_v25 = vrot.slane %v3759_v15, %v11323_v24  ;;  %v3763_v47 = vrot.slane %v10184_v58, %v11326_v56 }
 0xac4   :  { %v3982_v1 = vrot.slane %v3759_v15, %v11325_v28  ;;  %v4208_v24 = vrot.slane %v3759_v15, %v11326_v56 }
 0xac5   :  { %v10195_v14 = vmul.f32 %v7055_v26, %v3594_v29  ;;  %v3618_v48 = vpack.c.bf16 %v10191_v3, %v10197_v31 }
 0xac7   :  { %11324 = vst [vmem:[#allocation9_spill] sm:$0xff] %v10195_v14  ;;  %v3617_v2 = vpack.c.bf16 %v10195_v14, %v10193_v45 }
 0xac9   :  { %8292 = vmatprep.mubr.msk.bf16.mxu1 %vm157_vm1, %v3617_v2  ;;  %8300 = vmatprep.mubr.msk.bf16.mxu0 %vm157_vm1, %v3617_v2 }
 0xaca   :  { %8293 = vmatmul.mubr.msk.bf16.vlgmr.msra.gmra.mxu1 %vm157_vm1, %v3618_v48  ;;  %8301 = vmatmul.mubr.msk.bf16.vlgmr.msra.gmra.mxu0 %vm157_vm1, %v3618_v48 }
 0xacb   :  { %8312 = vmatprep.mubr.msk.f32.mxu1 %vm157_vm1, %v3765_v8  ;;  %8326 = vmatprep.mubr.msk.f32.mxu0 %vm157_vm1, %v3878_v12 }
 0xb8a   :  { %v8294_v16 = vpop.f32.mrf.mxu1  ;;  %v10273_v18 = vpop.f32.mrf.mxu0 }
 0xb8b   :  { %v3684_v22 = vadd.f32 %v8294_v16, %v3622_v21 }
 0xb8c   :  { %v3675_v59 = vpop.f32.mrf.mxu1  ;;  %v10275_v9 = vpop.f32.mrf.mxu0 }
 0xb8d   :  { %v3676_v5 = vadd.f32 %v3675_v59, %v3622_v21 }
 0xb8e   :  { %v8295_v35 = vpop.f32.mrf.mxu1  ;;  %v10277_v44 = vpop.f32.mrf.mxu0 }
 0xb8f   :  { %v3687_v41 = vadd.f32 %v8295_v35, %v3622_v21 }
 0xb90   :  { %v3678_v61 = vpop.f32.mrf.mxu1  ;;  %v10279_v34 = vpop.f32.mrf.mxu0 }
 0xb91   :  { %8304 = vmatprep.subr.mxu1 %v3687_v41  ;;  %8318 = vmatprep.subr.mxu0 %v3687_v41  ;;  %v3679_v43 = vadd.f32 %v3678_v61, %v3622_v21  ;;  %v4095_v21 = vrot.slane %v3759_v15, %v9165_v19 }
 0xb92   :  { %8305 = vmatpush3.msra.mxu1 %v3687_v41  ;;  %8319 = vmatpush3.msra.mxu0 %v3687_v41 }
 0xb93   :  { %8306 = vmatprep.subr.mxu1 %v3684_v22  ;;  %8320 = vmatprep.subr.mxu0 %v3684_v22 }
 0xb94   :  { %8307 = vmatpush3.msra.mxu1 %v3684_v22  ;;  %8321 = vmatpush3.msra.mxu0 %v3684_v22 }
 0xb95   :  { %8308 = vmatprep.subr.mxu1 %v3679_v43  ;;  %8322 = vmatprep.subr.mxu0 %v3679_v43 }
 0xb96   :  { %8309 = vmatpush3.msra.mxu1 %v3679_v43  ;;  %8323 = vmatpush3.msra.mxu0 %v3679_v43 }
 0xb97   :  { %8310 = vmatprep.subr.mxu1 %v3676_v5  ;;  %8324 = vmatprep.subr.mxu0 %v3676_v5 }
 0xb98   :  { %8311 = vmatpush3.msra.mxu1 %v3676_v5  ;;  %8325 = vmatpush3.msra.mxu0 %v3676_v5 }
 0xb99   :  { %8313 = vmatmul.mubr.msk.f32.vlgmr.msra.gmra.mxu1 %vm157_vm1, %v3766_v54  ;;  %8327 = vmatmul.mubr.msk.f32.vlgmr.msra.gmra.mxu0 %vm157_vm1, %v3879_v17 }
 0xb9a   :  { %8332 = vmatprep.subr.mxu1 %v3687_v41  ;;  %8346 = vmatprep.subr.mxu0 %v3687_v41 }
 0xb9b   :  { %8333 = vmatpush3.msra.mxu1 %v3687_v41  ;;  %8347 = vmatpush3.msra.mxu0 %v3687_v41 }
 0xb9c   :  { %8334 = vmatprep.subr.mxu1 %v3684_v22  ;;  %8348 = vmatprep.subr.mxu0 %v3684_v22 }
 0xb9d   :  { %8315 = vmatprep.mubr.msk.f32.mxu1 %vm157_vm1, %v3767_v63  ;;  %8329 = vmatprep.mubr.msk.f32.mxu0 %vm157_vm1, %v3880_v57 }
 0xb9e   :  { %8335 = vmatpush3.msra.mxu1 %v3684_v22  ;;  %8349 = vmatpush3.msra.mxu0 %v3684_v22 }
 0xb9f   :  { %8316 = vmatmul.mubr.msk.f32.gmra.mxu1 %vm157_vm1, %v3768_v55  ;;  %8330 = vmatmul.mubr.msk.f32.gmra.mxu0 %vm157_vm1, %v3881_v40 }
 0xba0   :  { %8336 = vmatprep.subr.mxu1 %v3679_v43  ;;  %8350 = vmatprep.subr.mxu0 %v3679_v43 }
 0xba1   :  { %8337 = vmatpush3.msra.mxu1 %v3679_v43  ;;  %8351 = vmatpush3.msra.mxu0 %v3679_v43 }
 0xba2   :  { %8338 = vmatprep.subr.mxu1 %v3676_v5  ;;  %8352 = vmatprep.subr.mxu0 %v3676_v5 }
 0xba3   :  { %8339 = vmatpush3.msra.mxu1 %v3676_v5  ;;  %8340 = vmatprep.mubr.msk.f32.mxu1 %vm157_vm1, %v3991_v7 }
 0xba4   :  { %8353 = vmatpush3.msra.mxu0 %v3676_v5  ;;  %8354 = vmatprep.mubr.msk.f32.mxu0 %vm157_vm1, %v4104_v60 }
 0xba5   :  { %8341 = vmatmul.mubr.msk.f32.vlgmr.msra.gmra.mxu1 %vm157_vm1, %v3992_v52  ;;  %8355 = vmatmul.mubr.msk.f32.vlgmr.msra.gmra.mxu0 %vm157_vm1, %v4105_v33 }
 0xba6   :  { %8343 = vmatprep.mubr.msk.f32.mxu1 %vm157_vm1, %v3993_v36  ;;  %8357 = vmatprep.mubr.msk.f32.mxu0 %vm157_vm1, %v4106_v53 }
 0xba7   :  { %8360 = vmatprep.subr.bf16.mxu1 %v8706_v23  ;;  %8372 = vmatprep.subr.bf16.mxu0 %v8707_v30 }
 0xba8   :  { %8361 = vmatpush3.bf16.msra.mxu1 %v8706_v23  ;;  %8373 = vmatpush3.bf16.msra.mxu0 %v8707_v30 }
 0xba9   :  { %8344 = vmatmul.mubr.msk.f32.gmra.mxu1 %vm157_vm1, %v3994_v42  ;;  %8358 = vmatmul.mubr.msk.f32.gmra.mxu0 %vm157_vm1, %v4107_v32 }
 0xbaa   :  { %8362 = vmatprep.subr.bf16.mxu1 %v8708_v50  ;;  %8374 = vmatprep.subr.bf16.mxu0 %v8709_v51 }
 0xbac   :  { %8363 = vmatpush3.bf16.msra.mxu1 %v8708_v50  ;;  %8375 = vmatpush3.bf16.msra.mxu0 %v8709_v51 }
 0xbad   :  { %8364 = vmatprep.subr.bf16.mxu1 %v8710_v10  ;;  %8376 = vmatprep.subr.bf16.mxu0 %v8711_v6 }
 0xbb0   :  { %8365 = vmatpush3.bf16.msra.mxu1 %v8710_v10  ;;  %8377 = vmatpush3.bf16.msra.mxu0 %v8711_v6 }
 0xbb1   :  { %8366 = vmatprep.subr.bf16.mxu1 %v8712_v49  ;;  %8378 = vmatprep.subr.bf16.mxu0 %v8713_v39 }
 0xbb4   :  { %8367 = vmatpush3.bf16.msra.mxu1 %v8712_v49  ;;  %8379 = vmatpush3.bf16.msra.mxu0 %v8713_v39 }
 0xc59   :  { %v8314_v46 = vpop.f32.mrf.mxu1  ;;  %v8328_v11 = vpop.f32.mrf.mxu0 }
 0xc5a   :  { %v3871_v4 = vmul.f32 %v8314_v46, %v3869_v25  ;;  %v3984_v59 = vmul.f32 %v8328_v11, %v3982_v1 }
 0xc5b   :  { %v3847_v37 = vpop.f32.mrf.mxu1  ;;  %v3960_v20 = vpop.f32.mrf.mxu0 }
 0xc5c   :  { %v3870_v2 = vmul.f32 %v3869_v25, %v3847_v37  ;;  %v3875_v16 = vadd.f32 %v3871_v4, %v3763_v47  ;;  %v3983_v28 = vmul.f32 %v3982_v1, %v3960_v20 }
 0xc5e   :  { %v3874_v41 = vadd.f32 %v3870_v2, %v3763_v47  ;;  %v3988_v54 = vadd.f32 %v3984_v59, %v3875_v16 }
 0xc5f   :  { %v8317_v26 = vpop.f32.mrf.mxu1  ;;  %v8331_v29 = vpop.f32.mrf.mxu0 }
 0xc60   :  { %v3873_v48 = vmul.f32 %v8317_v26, %v3869_v25  ;;  %v3986_v22 = vmul.f32 %v8331_v29, %v3982_v1  ;;  %v3987_v7 = vadd.f32 %v3983_v28, %v3874_v41 }
 0xc61   :  { %v3857_v8 = vpop.f32.mrf.mxu1  ;;  %v3970_v12 = vpop.f32.mrf.mxu0 }
 0xc62   :  { %v3872_v35 = vmul.f32 %v3869_v25, %v3857_v8  ;;  %v3877_v61 = vadd.f32 %v3873_v48, %v3763_v47  ;;  %v3985_v36 = vmul.f32 %v3982_v1, %v3970_v12 }
 0xc64   :  { %v3876_v57 = vadd.f32 %v3872_v35, %v3763_v47  ;;  %v3990_v33 = vadd.f32 %v3986_v22, %v3877_v61 }
 0xc65   :  { %v8342_v43 = vpop.f32.mrf.mxu1  ;;  %v8356_v5 = vpop.f32.mrf.mxu0 }
 0xc66   :  { %v4097_v17 = vmul.f32 %v8342_v43, %v4095_v21  ;;  %v4210_v63 = vmul.f32 %v8356_v5, %v4208_v24  ;;  %v3989_v10 = vadd.f32 %v3985_v36, %v3876_v57 }
 0xc67   :  { %v4073_v55 = vpop.f32.mrf.mxu1  ;;  %v4186_v40 = vpop.f32.mrf.mxu0 }
 0xc68   :  { %v4101_v60 = vadd.f32 %v4097_v17, %v3988_v54  ;;  %v4096_v52 = vmul.f32 %v4095_v21, %v4073_v55  ;;  %v4209_v53 = vmul.f32 %v4208_v24, %v4186_v40  ;;  %v10309_v17 = vld [vmem:[%s11300_s3] sm:$0xff] }
 0xc69   :  { %v8345_v42 = vpop.f32.mrf.mxu1  ;;  %v8359_v32 = vpop.f32.mrf.mxu0 }
 0xc6a   :  { %v4214_v23 = vadd.f32 %v4210_v63, %v4101_v60  ;;  %v4100_v30 = vadd.f32 %v4096_v52, %v3987_v7  ;;  %v4099_v50 = vmul.f32 %v8345_v42, %v4095_v21  ;;  %v4212_v51 = vmul.f32 %v8359_v32, %v4208_v24 }
 0xc6b   :  { %v4083_v6 = vpop.f32.mrf.mxu1  ;;  %v4196_v49 = vpop.f32.mrf.mxu0  ;;  %v11327_v63 = vsub.s32 4, %v9043_v13 }
 0xc6c   :  { %v7081_v39 = vmul.f32 -1.442695, %v4214_v23  ;;  %v4213_v15 = vadd.f32 %v4209_v53, %v4100_v30  ;;  %v4103_v46 = vadd.f32 %v4099_v50, %v3990_v33  ;;  %v4098_v11 = vmul.f32 %v4095_v21, %v4083_v6 }
 0xc6d   :  { %v4211_v25 = vmul.f32 %v4208_v24, %v4196_v49  ;;  %v4258_v57 = vrot.slane %v10184_v58, %v11327_v63 }
 0xc6e   :  { %8840 = vpow2.f32 %v7081_v39  ;;  %v7080_v37 = vmul.f32 -1.442695, %v4213_v15  ;;  %v4216_v20 = vadd.f32 %v4212_v51, %v4103_v46  ;;  %v4102_v56 = vadd.f32 %v4098_v11, %v3989_v10 }
 0xc70   :  { %8842 = vpow2.f32 %v7080_v37  ;;  %v7083_v47 = vmul.f32 -1.442695, %v4216_v20  ;;  %v4215_v4 = vadd.f32 %v4211_v25, %v4102_v56 }
 0xc72   :  { %8844 = vpow2.f32 %v7083_v47  ;;  %v7082_v1 = vmul.f32 -1.442695, %v4215_v4 }
 0xc74   :  { %8846 = vpow2.f32 %v7082_v1 }
 0xc7b   :  { %v8841_v26 = vpop.eup %8840 }
 0xc7c   :  { %v4230_v29 = vadd.f32 1.0, %v8841_v26 }
 0xc7d   :  { %v8843_v2 = vpop.eup %8842 }
 0xc7e   :  { %8848 = vrcp.f32 %v4230_v29  ;;  %v4229_v48 = vadd.f32 1.0, %v8843_v2 }
 0xc7f   :  { %v8845_v8 = vpop.eup %8844 }
 0xc80   :  { %8850 = vrcp.f32 %v4229_v48  ;;  %v4232_v12 = vadd.f32 1.0, %v8845_v8 }
 0xc81   :  { %v8847_v16 = vpop.eup %8846 }
 0xc82   :  { %8852 = vrcp.f32 %v4232_v12  ;;  %v4231_v59 = vadd.f32 1.0, %v8847_v16 }
 0xc84   :  { %8854 = vrcp.f32 %v4231_v59 }
 0xc8b   :  { %v8849_v21 = vpop.eup %8848 }
 0xc8c   :  { %v10290_v35 = vmul.f32 %v8849_v21, %v4214_v23 }
 0xc8d   :  { %v8851_v24 = vpop.eup %8850 }
 0xc8e   :  { %v10292_v41 = vmul.f32 %v8851_v24, %v4213_v15 }
 0xc8f   :  { %v8853_v61 = vpop.eup %8852 }
 0xc90   :  { %v4253_v22 = vpack.c.bf16 %v10290_v35, %v10292_v41  ;;  %v10296_v5 = vmul.f32 %v8853_v61, %v4216_v20 }
 0xc91   :  { %v8855_v43 = vpop.eup %8854 }
 0xc92   :  { %v10298_v54 = vmul.f32 %v8855_v43, %v4215_v4  ;;  %8368 = vmatprep.mubr.msk.bf16.mxu1 %vm806_vm2, %v4253_v22  ;;  %8380 = vmatprep.mubr.msk.bf16.mxu0 %vm806_vm2, %v4253_v22 }
 0xc94   :  { %v4254_v28 = vpack.c.bf16 %v10296_v5, %v10298_v54 }
 0xc96   :  { %8369 = vmatmul.mubr.msk.bf16.vlgmr.msra.gmra.mxu1 %vm806_vm2, %v4254_v28  ;;  %8381 = vmatmul.mubr.msk.bf16.vlgmr.msra.gmra.mxu0 %vm806_vm2, %v4254_v28 }
 0xc97   :  { %8392 = vmatprep.mubr.msk.f32.mxu1 %vm157_vm1, %v10309_v17  ;;  %8448 = vmatprep.mubr.msk.f32.mxu0 %vm157_vm1, %v10309_v17 }
 0xd56   :  { %v8370_v55 = vpop.f32.mrf.mxu1  ;;  %v8382_v43 = vpop.f32.mrf.mxu0 }
 0xd57   :  { %v4332_v40 = vadd.f32 %v8370_v55, %v4258_v57 }
 0xd58   :  { %v4323_v7 = vpop.f32.mrf.mxu1 }
 0xd59   :  { %v4344_v60 = vand.u32 2147483647, %v4332_v40  ;;  %v4324_v52 = vadd.f32 %v4323_v7, %v4258_v57  ;;  %v4340_v48 = vmax.f32 %v4332_v40, 0.0  ;;  %v4440_v7 = vpop.f32.mrf.mxu0 }
 0xd5a   :  { %v8371_v33 = vpop.f32.mrf.mxu1 }
 0xd5b   :  { %v4348_v36 = vsub.f32 0.0, %v4344_v60  ;;  %v4342_v53 = vand.u32 2147483647, %v4324_v52  ;;  %v4335_v42 = vadd.f32 %v8371_v33, %v4258_v57  ;;  %v4338_v28 = vmax.f32 %v4324_v52, 0.0  ;;  %v10324_v52 = vld [vmem:[%s11300_s3 + $0x8] sm:$0xff] }
 0xd5c   :  { %v4326_v32 = vpop.f32.mrf.mxu1 }
 0xd5d   :  { %v4354_v23 = vmul.f32 1.442695, %v4348_v36  ;;  %v4346_v30 = vsub.f32 0.0, %v4342_v53  ;;  %v4345_v50 = vand.u32 2147483647, %v4335_v42  ;;  %v4327_v51 = vadd.f32 %v4326_v32, %v4258_v57  ;;  %v10330_v36 = vld [vmem:[%s11300_s3 + $0x10] sm:$0xff]  ;;  %v8383_v53 = vpop.f32.mrf.mxu0 }
 0xd5e   :  { %v4341_v8 = vmax.f32 %v4335_v42, 0.0  ;;  %v10339_v42 = vld [vmem:[%s11300_s3 + $0x18] sm:$0xff]  ;;  %v10344_v32 = vld [vmem:[%s11300_s3 + $0x20] sm:$0xff] }
 0xd5f   :  { %8856 = vpow2.f32 %v4354_v23  ;;  %v4350_v10 = vmul.f32 1.442695, %v4346_v30  ;;  %v4349_v6 = vsub.f32 0.0, %v4345_v50  ;;  %v4343_v49 = vand.u32 2147483647, %v4327_v51  ;;  %v4443_v23 = vpop.f32.mrf.mxu0  ;;  %v10357_v30 = vld [vmem:[%s11300_s3 + $0x28] sm:$0xff] }
 0xd60   :  { %v4339_v61 = vmax.f32 %v4327_v51, 0.0  ;;  %v10362_v50 = vld [vmem:[%s11300_s3 + $0x30] sm:$0xff]  ;;  %v10376_v51 = vld [vmem:[%s11300_s3 + $0x38] sm:$0xff] }
 0xd61   :  { %8858 = vpow2.f32 %v4350_v10  ;;  %v4356_v58 = vmul.f32 1.442695, %v4349_v6  ;;  %v4347_v39 = vsub.f32 0.0, %v4343_v49  ;;  %v10382_v10 = vld [vmem:[%s11300_s3 + $0x40] sm:$0xff]  ;;  %v10398_v6 = vld [vmem:[%s11300_s3 + $0x48] sm:$0xff]  ;;  %v10403_v49 = vld [vmem:[%s11300_s3 + $0x50] sm:$0xff] }
 0xd63   :  { %8860 = vpow2.f32 %v4356_v58  ;;  %v4352_v15 = vmul.f32 1.442695, %v4347_v39  ;;  %v10416_v58 = vld [vmem:[%s11300_s3 + $0x58] sm:$0xff]  ;;  %v10421_v39 = vld [vmem:[%s11300_s3 + $0x60] sm:$0xff] }
 0xd65   :  { %8862 = vpow2.f32 %v4352_v15  ;;  %v10434_v15 = vld [vmem:[%s11300_s3 + $0x68] sm:$0xff] }
 0xd6c   :  { %v8857_v46 = vpop.eup %8856 }
 0xd6d   :  { %v4360_v11 = vadd.f32 1.0, %v8857_v46  ;;  %v10439_v46 = vld [vmem:[%s11300_s3 + $0x70] sm:$0xff] }
 0xd6e   :  { %v8859_v25 = vpop.eup %8858 }
 0xd6f   :  { %8864 = vlog2.f32 %v4360_v11  ;;  %v4358_v37 = vadd.f32 1.0, %v8859_v25  ;;  %v10452_v11 = vld [vmem:[%s11300_s3 + $0x78] sm:$0xff]  ;;  %v10457_v25 = vld [vmem:[%s11300_s3 + $0x80] sm:$0xff] }
 0xd70   :  { %v8861_v20 = vpop.eup %8860 }
 0xd71   :  { %v4361_v56 = vadd.f32 1.0, %v8861_v20  ;;  %8866 = vlog2.f32 %v4358_v37  ;;  %v10470_v37 = vld [vmem:[%s11300_s3 + $0x88] sm:$0xff]  ;;  %v10475_v20 = vld [vmem:[%s11300_s3 + $0x90] sm:$0xff] }
 0xd72   :  { %v8863_v47 = vpop.eup %8862 }
 0xd73   :  { %8868 = vlog2.f32 %v4361_v56  ;;  %v4359_v4 = vadd.f32 1.0, %v8863_v47  ;;  %v10488_v56 = vld [vmem:[%s11300_s3 + $0x98] sm:$0xff]  ;;  %v10493_v47 = vld [vmem:[%s11300_s3 + $0xa0] sm:$0xff] }
 0xd75   :  { %8870 = vlog2.f32 %v4359_v4  ;;  %v4476_v4 = vld [vmem:[%s11300_s3 + $0xa8] sm:$0xff] }
 0xd7c   :  { %v8865_v1 = vpop.eup %8864 }
 0xd7d   :  { %v4367_v29 = vmul.f32 0.6931472, %v8865_v1  ;;  %v4477_v1 = vld [vmem:[%s11300_s3 + $0xb0] sm:$0xff] }
 0xd7e   :  { %v8867_v26 = vpop.eup %8866 }
 0xd7f   :  { %v4372_v21 = vadd.f32 %v4367_v29, %v4340_v48  ;;  %v4363_v24 = vmul.f32 0.6931472, %v8867_v26  ;;  %v4478_v26 = vld [vmem:[%s11300_s3 + $0xb8] sm:$0xff]  ;;  %v4479_v29 = vld [vmem:[%s11300_s3 + $0xc0] sm:$0xff]  ;;  %v4481_v48 = vld [vmem:[%s11300_s3 + $0xd0] sm:$0xff] }
 0xd80   :  { %v8869_v2 = vpop.eup %8868 }
 0xd81   :  { %v4369_v12 = vmul.f32 0.6931472, %v8869_v2  ;;  %v4810_v55 = vmul.f32 %v4372_v21, %v10298_v54  ;;  %v4370_v40 = vadd.f32 %v4363_v24, %v4338_v28  ;;  %v4480_v2 = vld [vmem:[%s11300_s3 + $0xc8] sm:$0xff]  ;;  %v6032_v24 = vld [vmem:[%s11300_s3 + $0x4b0] sm:$0xff] }
 0xd82   :  { %v8871_v16 = vpop.eup %8870 }
 0xd83   :  { %v4373_v59 = vadd.f32 %v4369_v12, %v4341_v8  ;;  %v4365_v22 = vmul.f32 0.6931472, %v8871_v16  ;;  %v4808_v33 = vmul.f32 %v4370_v40, %v10292_v41  ;;  %v4482_v8 = vld [vmem:[%s11300_s3 + $0xd8] sm:$0xff]  ;;  %v4483_v12 = vld [vmem:[%s11300_s3 + $0xe0] sm:$0xff]  ;;  %v4484_v16 = vld [vmem:[%s11300_s3 + $0xe8] sm:$0xff] }
 0xd85   :  { %8384 = vmatprep.subr.mxu1 %v4373_v59  ;;  %v4811_v63 = vmul.f32 %v4373_v59, %v10296_v5  ;;  %v4371_v57 = vadd.f32 %v4365_v22, %v4339_v61 }
 0xd86   :  { %8385 = vmatpush3.msra.mxu1 %v4373_v59  ;;  %v4485_v59 = vld [vmem:[%s11300_s3 + $0xf0] sm:$0xff] }
 0xd87   :  { %8386 = vmatprep.subr.mxu1 %v4372_v21  ;;  %8440 = vmatprep.subr.mxu0 %v4811_v63  ;;  %v4809_v60 = vmul.f32 %v4371_v57, %v10290_v35 }
 0xd88   :  { %8387 = vmatpush3.msra.mxu1 %v4372_v21  ;;  %8441 = vmatpush3.msra.mxu0 %v4811_v63  ;;  %v4486_v21 = vld [vmem:[%s11300_s3 + $0xf8] sm:$0xff]  ;;  %v6035_v63 = vld [vmem:[%s11300_s3 + $0x4c8] sm:$0xff] }
 0xd89   :  { %8388 = vmatprep.subr.mxu1 %v4371_v57  ;;  %8442 = vmatprep.subr.mxu0 %v4810_v55 }
 0xd8a   :  { %8389 = vmatpush3.msra.mxu1 %v4371_v57  ;;  %8443 = vmatpush3.msra.mxu0 %v4810_v55 }
 0xd8b   :  { %8390 = vmatprep.subr.mxu1 %v4370_v40  ;;  %8444 = vmatprep.subr.mxu0 %v4809_v60 }
 0xd8c   :  { %8391 = vmatpush3.msra.mxu1 %v4370_v40  ;;  %8445 = vmatpush3.msra.mxu0 %v4809_v60  ;;  %v6034_v40 = vld [vmem:[%s11300_s3 + $0x4c0] sm:$0xff] }
 0xd8d   :  { %8393 = vmatmul.mubr.msk.f32.vlgmr.msra.gmra.mxu1 %vm157_vm1, %v10324_v52  ;;  %8446 = vmatprep.subr.mxu0 %v4808_v33 }
 0xd8e   :  { %8496 = vmatprep.subr.mxu1 %v8383_v53  ;;  %8447 = vmatpush3.msra.mxu0 %v4808_v33 }
 0xd8f   :  { %8497 = vmatpush3.msra.mxu1 %v8383_v53  ;;  %8395 = vmatprep.mubr.msk.f32.mxu1 %vm157_vm1, %v10330_v36 }
 0xd90   :  { %8498 = vmatprep.subr.mxu1 %v8382_v43  ;;  %8449 = vmatmul.mubr.msk.f32.vlgmr.msra.gmra.mxu0 %vm157_vm1, %v10324_v52 }
 0xd91   :  { %8499 = vmatpush3.msra.mxu1 %v8382_v43  ;;  %8451 = vmatprep.mubr.msk.f32.mxu0 %vm157_vm1, %v10330_v36 }
 0xd92   :  { %8396 = vmatmul.mubr.msk.f32.gmra.mxu1 %vm157_vm1, %v10339_v42  ;;  %8500 = vmatprep.subr.mxu1 %v4443_v23 }
 0xd93   :  { %8501 = vmatpush3.msra.mxu1 %v4443_v23  ;;  %8398 = vmatprep.mubr.msk.f32.mxu1 %vm157_vm1, %v10344_v32 }
 0xd94   :  { %8502 = vmatprep.subr.mxu1 %v4440_v7  ;;  %8452 = vmatmul.mubr.msk.f32.gmra.mxu0 %vm157_vm1, %v10339_v42 }
 0xd95   :  { %8503 = vmatpush3.msra.mxu1 %v4440_v7  ;;  %8454 = vmatprep.mubr.msk.f32.mxu0 %vm157_vm1, %v10344_v32 }
 0xd96   :  { %8399 = vmatmul.mubr.msk.f32.gmra.mxu1 %vm157_vm1, %v10357_v30  ;;  %8552 = vmatprep.subr.mxu0 %v11322_v62 }
 0xd97   :  { %8401 = vmatprep.mubr.msk.f32.mxu1 %vm157_vm1, %v10362_v50  ;;  %8553 = vmatpush3.msra.mxu0 %v11322_v62 }
 0xd98   :  { %8455 = vmatmul.mubr.msk.f32.gmra.mxu0 %vm157_vm1, %v10357_v30  ;;  %8604 = vmatprep.subr.mxu1 %v11322_v62 }
 0xd99   :  { %8457 = vmatprep.mubr.msk.f32.mxu0 %vm157_vm1, %v10362_v50  ;;  %8554 = vmatprep.subr.mxu0 %v11322_v62 }
 0xd9a   :  { %8402 = vmatmul.mubr.msk.f32.gmra.mxu1 %vm157_vm1, %v10376_v51  ;;  %8555 = vmatpush3.msra.mxu0 %v11322_v62 }
 0xd9b   :  { %8404 = vmatprep.mubr.msk.f32.mxu1 %vm157_vm1, %v10382_v10 }
 0xd9c   :  { %8458 = vmatmul.mubr.msk.f32.gmra.mxu0 %vm157_vm1, %v10376_v51 }
 0xd9d   :  { %8460 = vmatprep.mubr.msk.f32.mxu0 %vm157_vm1, %v10382_v10 }
 0xd9e   :  { %8405 = vmatmul.mubr.msk.f32.gmra.mxu1 %vm157_vm1, %v10398_v6 }
 0xd9f   :  { %8407 = vmatprep.mubr.msk.f32.mxu1 %vm157_vm1, %v10403_v49 }
 0xda0   :  { %8461 = vmatmul.mubr.msk.f32.gmra.mxu0 %vm157_vm1, %v10398_v6 }
 0xda1   :  { %8463 = vmatprep.mubr.msk.f32.mxu0 %vm157_vm1, %v10403_v49 }
 0xda2   :  { %8408 = vmatmul.mubr.msk.f32.gmra.mxu1 %vm157_vm1, %v10416_v58 }
 0xda3   :  { %8410 = vmatprep.mubr.msk.f32.mxu1 %vm157_vm1, %v10421_v39 }
 0xda4   :  { %8464 = vmatmul.mubr.msk.f32.gmra.mxu0 %vm157_vm1, %v10416_v58 }
 0xda5   :  { %8466 = vmatprep.mubr.msk.f32.mxu0 %vm157_vm1, %v10421_v39 }
 0xda6   :  { %8411 = vmatmul.mubr.msk.f32.gmra.mxu1 %vm157_vm1, %v10434_v15 }
 0xda7   :  { %8413 = vmatprep.mubr.msk.f32.mxu1 %vm157_vm1, %v10439_v46 }
 0xda8   :  { %8467 = vmatmul.mubr.msk.f32.gmra.mxu0 %vm157_vm1, %v10434_v15 }
 0xda9   :  { %8469 = vmatprep.mubr.msk.f32.mxu0 %vm157_vm1, %v10439_v46 }
 0xdaa   :  { %8414 = vmatmul.mubr.msk.f32.gmra.mxu1 %vm157_vm1, %v10452_v11 }
 0xdab   :  { %8416 = vmatprep.mubr.msk.f32.mxu1 %vm157_vm1, %v10457_v25 }
 0xdac   :  { %8470 = vmatmul.mubr.msk.f32.gmra.mxu0 %vm157_vm1, %v10452_v11 }
 0xdad   :  { %8472 = vmatprep.mubr.msk.f32.mxu0 %vm157_vm1, %v10457_v25 }
 0xdae   :  { %8417 = vmatmul.mubr.msk.f32.gmra.mxu1 %vm157_vm1, %v10470_v37 }
 0xdaf   :  { %8419 = vmatprep.mubr.msk.f32.mxu1 %vm157_vm1, %v10475_v20 }
 0xdb0   :  { %8473 = vmatmul.mubr.msk.f32.gmra.mxu0 %vm157_vm1, %v10470_v37 }
 0xdb1   :  { %8475 = vmatprep.mubr.msk.f32.mxu0 %vm157_vm1, %v10475_v20 }
 0xdb2   :  { %8420 = vmatmul.mubr.msk.f32.gmra.mxu1 %vm157_vm1, %v10488_v56 }
 0xdb3   :  { %8422 = vmatprep.mubr.msk.f32.mxu1 %vm157_vm1, %v10493_v47 }
 0xdb4   :  { %8476 = vmatmul.mubr.msk.f32.gmra.mxu0 %vm157_vm1, %v10488_v56 }
 0xdb5   :  { %8478 = vmatprep.mubr.msk.f32.mxu0 %vm157_vm1, %v10493_v47 }
 0xdb6   :  { %8423 = vmatmul.mubr.msk.f32.gmra.mxu1 %vm157_vm1, %v4476_v4 }
 0xdb7   :  { %8425 = vmatprep.mubr.msk.f32.mxu1 %vm157_vm1, %v4477_v1 }
 0xdb8   :  { %8479 = vmatmul.mubr.msk.f32.gmra.mxu0 %vm157_vm1, %v4476_v4 }
 0xdb9   :  { %8481 = vmatprep.mubr.msk.f32.mxu0 %vm157_vm1, %v4477_v1 }
 0xdba   :  { %8426 = vmatmul.mubr.msk.f32.gmra.mxu1 %vm157_vm1, %v4478_v26 }
 0xdbb   :  { %8428 = vmatprep.mubr.msk.f32.mxu1 %vm157_vm1, %v4479_v29 }
 0xdbc   :  { %8482 = vmatmul.mubr.msk.f32.gmra.mxu0 %vm157_vm1, %v4478_v26 }
 0xdbd   :  { %8484 = vmatprep.mubr.msk.f32.mxu0 %vm157_vm1, %v4479_v29 }
 0xdbe   :  { %8429 = vmatmul.mubr.msk.f32.gmra.mxu1 %vm157_vm1, %v4480_v2 }
 0xdbf   :  { %8431 = vmatprep.mubr.msk.f32.mxu1 %vm157_vm1, %v4481_v48 }
 0xdc0   :  { %8485 = vmatmul.mubr.msk.f32.gmra.mxu0 %vm157_vm1, %v4480_v2 }
 0xdc1   :  { %8487 = vmatprep.mubr.msk.f32.mxu0 %vm157_vm1, %v4481_v48 }
 0xdc2   :  { %8432 = vmatmul.mubr.msk.f32.gmra.mxu1 %vm157_vm1, %v4482_v8 }
 0xdc3   :  { %8434 = vmatprep.mubr.msk.f32.mxu1 %vm157_vm1, %v4483_v12 }
 0xdc4   :  { %8488 = vmatmul.mubr.msk.f32.gmra.mxu0 %vm157_vm1, %v4482_v8 }
 0xdc5   :  { %8490 = vmatprep.mubr.msk.f32.mxu0 %vm157_vm1, %v4483_v12 }
 0xdc6   :  { %8435 = vmatmul.mubr.msk.f32.gmra.mxu1 %vm157_vm1, %v4484_v16 }
 0xdc7   :  { %8437 = vmatprep.mubr.msk.f32.mxu1 %vm157_vm1, %v4485_v59 }
 0xdc8   :  { %8491 = vmatmul.mubr.msk.f32.gmra.mxu0 %vm157_vm1, %v4484_v16 }
 0xdc9   :  { %8493 = vmatprep.mubr.msk.f32.mxu0 %vm157_vm1, %v4485_v59 }
 0xdca   :  { %8438 = vmatmul.mubr.msk.f32.gmra.mxu1 %vm157_vm1, %v4486_v21 }
 0xdcb   :  { %8504 = vmatprep.mubr.msk.f32.mxu1 %vm157_vm1, %v10309_v17 }
 0xdcc   :  { %8494 = vmatmul.mubr.msk.f32.gmra.mxu0 %vm157_vm1, %v4486_v21 }
 0xdce   :  { %8505 = vmatmul.mubr.msk.f32.vlgmr.msra.gmra.mxu1 %vm157_vm1, %v10324_v52  ;;  %v6037_v52 = vld [vmem:[%s11300_s3 + $0x4d8] sm:$0xff] }
 0xdcf   :  { %8507 = vmatprep.mubr.msk.f32.mxu1 %vm157_vm1, %v10330_v36  ;;  %8605 = vmatpush3.msra.mxu1 %v11322_v62 }
 0xdd0   :  { %8606 = vmatprep.subr.mxu1 %v11322_v62 }
 0xdd1   :  { %8607 = vmatpush3.msra.mxu1 %v11322_v62  ;;  %v6033_v62 = vld [vmem:[%s11300_s3 + $0x4b8] sm:$0xff] }
 0xdd2   :  { %8508 = vmatmul.mubr.msk.f32.gmra.mxu1 %vm157_vm1, %v10339_v42  ;;  %v6036_v42 = vld [vmem:[%s11300_s3 + $0x4d0] sm:$0xff] }
 0xdd3   :  { %8510 = vmatprep.mubr.msk.f32.mxu1 %vm157_vm1, %v10344_v32 }
 0xdd6   :  { %8511 = vmatmul.mubr.msk.f32.gmra.mxu1 %vm157_vm1, %v10357_v30 }
 0xdd7   :  { %8513 = vmatprep.mubr.msk.f32.mxu1 %vm157_vm1, %v10362_v50  ;;  %v6039_v50 = vld [vmem:[%s11300_s3 + $0x4e8] sm:$0xff] }
 0xdda   :  { %8514 = vmatmul.mubr.msk.f32.gmra.mxu1 %vm157_vm1, %v10376_v51 }
 0xddb   :  { %8516 = vmatprep.mubr.msk.f32.mxu1 %vm157_vm1, %v10382_v10 }
 0xdde   :  { %8517 = vmatmul.mubr.msk.f32.gmra.mxu1 %vm157_vm1, %v10398_v6 }
 0xddf   :  { %8519 = vmatprep.mubr.msk.f32.mxu1 %vm157_vm1, %v10403_v49  ;;  %v6038_v49 = vld [vmem:[%s11300_s3 + $0x4e0] sm:$0xff] }
 0xde2   :  { %8520 = vmatmul.mubr.msk.f32.gmra.mxu1 %vm157_vm1, %v10416_v58 }
 0xde3   :  { %8522 = vmatprep.mubr.msk.f32.mxu1 %vm157_vm1, %v10421_v39 }
 0xde6   :  { %8523 = vmatmul.mubr.msk.f32.gmra.mxu1 %vm157_vm1, %v10434_v15 }
 0xde7   :  { %8525 = vmatprep.mubr.msk.f32.mxu1 %vm157_vm1, %v10439_v46  ;;  %v6041_v46 = vld [vmem:[%s11300_s3 + $0x4f8] sm:$0xff] }
 0xdea   :  { %8526 = vmatmul.mubr.msk.f32.gmra.mxu1 %vm157_vm1, %v10452_v11 }
 0xdeb   :  { %8528 = vmatprep.mubr.msk.f32.mxu1 %vm157_vm1, %v10457_v25 }
 0xdee   :  { %8529 = vmatmul.mubr.msk.f32.gmra.mxu1 %vm157_vm1, %v10470_v37 }
 0xdef   :  { %8531 = vmatprep.mubr.msk.f32.mxu1 %vm157_vm1, %v10475_v20  ;;  %v6040_v20 = vld [vmem:[%s11300_s3 + $0x4f0] sm:$0xff] }
 0xdf2   :  { %8532 = vmatmul.mubr.msk.f32.gmra.mxu1 %vm157_vm1, %v10488_v56 }
 0xdf3   :  { %8534 = vmatprep.mubr.msk.f32.mxu1 %vm157_vm1, %v10493_v47 }
 0xdf6   :  { %8535 = vmatmul.mubr.msk.f32.gmra.mxu1 %vm157_vm1, %v4476_v4 }
 0xdf7   :  { %8537 = vmatprep.mubr.msk.f32.mxu1 %vm157_vm1, %v4477_v1 }
 0xdfa   :  { %8538 = vmatmul.mubr.msk.f32.gmra.mxu1 %vm157_vm1, %v4478_v26  ;;  %v6043_v26 = vld [vmem:[%s11300_s3 + $0x508] sm:$0xff] }
 0xdfb   :  { %8540 = vmatprep.mubr.msk.f32.mxu1 %vm157_vm1, %v4479_v29 }
 0xdfe   :  { %8541 = vmatmul.mubr.msk.f32.gmra.mxu1 %vm157_vm1, %v4480_v2 }
 0xdff   :  { %8543 = vmatprep.mubr.msk.f32.mxu1 %vm157_vm1, %v4481_v48 }
 0xe02   :  { %8544 = vmatmul.mubr.msk.f32.gmra.mxu1 %vm157_vm1, %v4482_v8 }
 0xe03   :  { %8546 = vmatprep.mubr.msk.f32.mxu1 %vm157_vm1, %v4483_v12  ;;  %v6042_v12 = vld [vmem:[%s11300_s3 + $0x500] sm:$0xff] }
 0xe06   :  { %8547 = vmatmul.mubr.msk.f32.gmra.mxu1 %vm157_vm1, %v4484_v16 }
 0xe07   :  { %8549 = vmatprep.mubr.msk.f32.mxu1 %vm157_vm1, %v4485_v59 }
 0xe0a   :  { %8550 = vmatmul.mubr.msk.f32.gmra.mxu1 %vm157_vm1, %v4486_v21 }
 0xe4d   :  { %v8394_v17 = vpop.f32.mrf.mxu1 }
 0xe4e   :  { %v6065_v61 = vmul.f32 %v8394_v17, %v6033_v62  ;;  %v6045_v17 = vld [vmem:[%s11300_s3 + $0x518] sm:$0xff] }
 0xe4f   :  { %v4649_v22 = vpop.f32.mrf.mxu1 }
 0xe50   :  { %v6098_v43 = vmul.f32 1.442695, %v6065_v61  ;;  %v6064_v28 = vmul.f32 %v6032_v24, %v4649_v22 }
 0xe52   :  { %8872 = vpow2.f32 %v6098_v43  ;;  %v6096_v57 = vmul.f32 1.442695, %v6064_v28  ;;  %v8397_v55 = vpop.f32.mrf.mxu1  ;;  %v6044_v28 = vld [vmem:[%s11300_s3 + $0x510] sm:$0xff] }
 0xe53   :  { %v6067_v7 = vmul.f32 %v8397_v55, %v6035_v63 }
 0xe54   :  { %8874 = vpow2.f32 %v6096_v57  ;;  %v4659_v60 = vpop.f32.mrf.mxu1 }
 0xe55   :  { %v6102_v33 = vmul.f32 1.442695, %v6067_v7  ;;  %v6066_v36 = vmul.f32 %v6034_v40, %v4659_v60  ;;  %v6047_v7 = vld [vmem:[%s11300_s3 + $0x528] sm:$0xff] }
 0xe56   :  { %v8400_v53 = vpop.f32.mrf.mxu1 }
 0xe57   :  { %8876 = vpow2.f32 %v6102_v33  ;;  %v6100_v32 = vmul.f32 1.442695, %v6066_v36  ;;  %v6069_v23 = vmul.f32 %v8400_v53, %v6037_v52  ;;  %v6046_v53 = vld [vmem:[%s11300_s3 + $0x520] sm:$0xff] }
 0xe58   :  { %v4669_v30 = vpop.f32.mrf.mxu1 }
 0xe59   :  { %8878 = vpow2.f32 %v6100_v32  ;;  %v6106_v51 = vmul.f32 1.442695, %v6069_v23  ;;  %v6068_v10 = vmul.f32 %v6036_v42, %v4669_v30 }
 0xe5a   :  { %v8403_v6 = vpop.f32.mrf.mxu1 }
 0xe5b   :  { %8880 = vpow2.f32 %v6106_v51  ;;  %v6104_v58 = vmul.f32 1.442695, %v6068_v10  ;;  %v6071_v39 = vmul.f32 %v8403_v6, %v6039_v50  ;;  %v6049_v50 = vld [vmem:[%s11300_s3 + $0x538] sm:$0xff] }
 0xe5c   :  { %v4679_v15 = vpop.f32.mrf.mxu1 }
 0xe5d   :  { %8882 = vpow2.f32 %v6104_v58  ;;  %v6110_v11 = vmul.f32 1.442695, %v6071_v39  ;;  %v6070_v25 = vmul.f32 %v6038_v49, %v4679_v15  ;;  %v6048_v58 = vld [vmem:[%s11300_s3 + $0x530] sm:$0xff] }
 0xe5e   :  { %v8406_v37 = vpop.f32.mrf.mxu1 }
 0xe5f   :  { %v8873_v56 = vpop.eup %8872  ;;  %8884 = vpow2.f32 %v6110_v11  ;;  %v6108_v47 = vmul.f32 1.442695, %v6070_v25  ;;  %v6073_v4 = vmul.f32 %v8406_v37, %v6041_v46  ;;  %v6051_v25 = vld [vmem:[%s11300_s3 + $0x548] sm:$0xff] }
 0xe60   :  { %6161 = vst.msk [vmem:[#allocation2 + $0x8] sm:$0xff] %vm806_vm2, %v8873_v56  ;;  %v4689_v1 = vpop.f32.mrf.mxu1 }
 0xe61   :  { %v8875_v29 = vpop.eup %8874  ;;  %8886 = vpow2.f32 %v6108_v47  ;;  %v6114_v2 = vmul.f32 1.442695, %v6073_v4  ;;  %v6072_v48 = vmul.f32 %v6040_v20, %v4689_v1  ;;  %v6050_v4 = vld [vmem:[%s11300_s3 + $0x540] sm:$0xff] }
 0xe62   :  { %6160 = vst.msk [vmem:[#allocation2] sm:$0xff] %vm806_vm2, %v8875_v29  ;;  %v8409_v8 = vpop.f32.mrf.mxu1 }
 0xe63   :  { %8888 = vpow2.f32 %v6114_v2  ;;  %v6112_v16 = vmul.f32 1.442695, %v6072_v48  ;;  %v6075_v59 = vmul.f32 %v8409_v8, %v6043_v26  ;;  %v6053_v48 = vld [vmem:[%s11300_s3 + $0x558] sm:$0xff] }
 0xe64   :  { %v8877_v21 = vpop.eup %8876  ;;  %v4699_v62 = vpop.f32.mrf.mxu1 }
 0xe65   :  { %6163 = vst.msk [vmem:[#allocation2 + $0x18] sm:$0xff] %vm806_vm2, %v8877_v21  ;;  %8890 = vpow2.f32 %v6112_v16  ;;  %v6118_v24 = vmul.f32 1.442695, %v6075_v59  ;;  %v6074_v61 = vmul.f32 %v6042_v12, %v4699_v62  ;;  %v6052_v21 = vld [vmem:[%s11300_s3 + $0x550] sm:$0xff] }
 0xe66   :  { %v8879_v22 = vpop.eup %8878  ;;  %v8412_v43 = vpop.f32.mrf.mxu1 }
 0xe67   :  { %6162 = vst.msk [vmem:[#allocation2 + $0x10] sm:$0xff] %vm806_vm2, %v8879_v22  ;;  %8892 = vpow2.f32 %v6118_v24  ;;  %v6116_v63 = vmul.f32 1.442695, %v6074_v61  ;;  %v6077_v57 = vmul.f32 %v8412_v43, %v6045_v17  ;;  %v6055_v22 = vld [vmem:[%s11300_s3 + $0x568] sm:$0xff] }
 0xe68   :  { %v8881_v55 = vpop.eup %8880  ;;  %v4709_v40 = vpop.f32.mrf.mxu1 }
 0xe69   :  { %6165 = vst.msk [vmem:[#allocation2 + $0x28] sm:$0xff] %vm806_vm2, %v8881_v55  ;;  %8894 = vpow2.f32 %v6116_v63  ;;  %v6122_v60 = vmul.f32 1.442695, %v6077_v57  ;;  %v6076_v52 = vmul.f32 %v6044_v28, %v4709_v40  ;;  %v6054_v55 = vld [vmem:[%s11300_s3 + $0x560] sm:$0xff] }
 0xe6a   :  { %v8883_v33 = vpop.eup %8882  ;;  %v8415_v36 = vpop.f32.mrf.mxu1 }
 0xe6b   :  { %6164 = vst.msk [vmem:[#allocation2 + $0x20] sm:$0xff] %vm806_vm2, %v8883_v33  ;;  %8896 = vpow2.f32 %v6122_v60  ;;  %v6120_v42 = vmul.f32 1.442695, %v6076_v52  ;;  %v6079_v32 = vmul.f32 %v8415_v36, %v6047_v7  ;;  %v6057_v33 = vld [vmem:[%s11300_s3 + $0x578] sm:$0xff] }
 0xe6c   :  { %v8885_v23 = vpop.eup %8884  ;;  %v4719_v30 = vpop.f32.mrf.mxu1 }
 0xe6d   :  { %6167 = vst.msk [vmem:[#allocation2 + $0x38] sm:$0xff] %vm806_vm2, %v8885_v23  ;;  %8898 = vpow2.f32 %v6120_v42  ;;  %v6126_v51 = vmul.f32 1.442695, %v6079_v32  ;;  %v6078_v10 = vmul.f32 %v6046_v53, %v4719_v30  ;;  %v6056_v23 = vld [vmem:[%s11300_s3 + $0x570] sm:$0xff] }
 0xe6e   :  { %v8887_v6 = vpop.eup %8886  ;;  %v8418_v49 = vpop.f32.mrf.mxu1 }
 0xe6f   :  { %6166 = vst.msk [vmem:[#allocation2 + $0x30] sm:$0xff] %vm806_vm2, %v8887_v6  ;;  %8900 = vpow2.f32 %v6126_v51  ;;  %v6124_v39 = vmul.f32 1.442695, %v6078_v10  ;;  %v6081_v15 = vmul.f32 %v8418_v49, %v6049_v50  ;;  %v6059_v6 = vld [vmem:[%s11300_s3 + $0x588] sm:$0xff] }
 0xe70   :  { %v8889_v46 = vpop.eup %8888  ;;  %v4729_v11 = vpop.f32.mrf.mxu1 }
 0xe71   :  { %6169 = vst.msk [vmem:[#allocation2 + $0x48] sm:$0xff] %vm806_vm2, %v8889_v46  ;;  %8902 = vpow2.f32 %v6124_v39  ;;  %v6130_v37 = vmul.f32 1.442695, %v6081_v15  ;;  %v6080_v20 = vmul.f32 %v6048_v58, %v4729_v11  ;;  %v6058_v46 = vld [vmem:[%s11300_s3 + $0x580] sm:$0xff] }
 0xe72   :  { %v8891_v56 = vpop.eup %8890  ;;  %v8421_v47 = vpop.f32.mrf.mxu1 }
 0xe73   :  { %6168 = vst.msk [vmem:[#allocation2 + $0x40] sm:$0xff] %vm806_vm2, %v8891_v56  ;;  %8904 = vpow2.f32 %v6130_v37  ;;  %v6128_v1 = vmul.f32 1.442695, %v6080_v20  ;;  %v6083_v26 = vmul.f32 %v8421_v47, %v6051_v25  ;;  %v6061_v56 = vld [vmem:[%s11300_s3 + $0x598] sm:$0xff] }
 0xe74   :  { %v8893_v29 = vpop.eup %8892  ;;  %v4739_v2 = vpop.f32.mrf.mxu1 }
 0xe75   :  { %6171 = vst.msk [vmem:[#allocation2 + $0x58] sm:$0xff] %vm806_vm2, %v8893_v29  ;;  %8906 = vpow2.f32 %v6128_v1  ;;  %v6134_v8 = vmul.f32 1.442695, %v6083_v26  ;;  %v6082_v12 = vmul.f32 %v6050_v4, %v4739_v2  ;;  %v6060_v29 = vld [vmem:[%s11300_s3 + $0x590] sm:$0xff] }
 0xe76   :  { %v8895_v16 = vpop.eup %8894  ;;  %v8424_v59 = vpop.f32.mrf.mxu1 }
 0xe77   :  { %6170 = vst.msk [vmem:[#allocation2 + $0x50] sm:$0xff] %vm806_vm2, %v8895_v16  ;;  %8908 = vpow2.f32 %v6134_v8  ;;  %v6132_v62 = vmul.f32 1.442695, %v6082_v12  ;;  %v6085_v17 = vmul.f32 %v8424_v59, %v6053_v48  ;;  %v6063_v16 = vld [vmem:[%s11300_s3 + $0x5a8] sm:$0xff] }
 0xe78   :  { %v8897_v24 = vpop.eup %8896  ;;  %v4749_v61 = vpop.f32.mrf.mxu1 }
 0xe79   :  { %6173 = vst.msk [vmem:[#allocation2 + $0x68] sm:$0xff] %vm806_vm2, %v8897_v24  ;;  %8910 = vpow2.f32 %v6132_v62  ;;  %v6138_v43 = vmul.f32 1.442695, %v6085_v17  ;;  %v6084_v28 = vmul.f32 %v6052_v21, %v4749_v61  ;;  %v6062_v24 = vld [vmem:[%s11300_s3 + $0x5a0] sm:$0xff] }
 0xe7a   :  { %v8899_v63 = vpop.eup %8898  ;;  %v8427_v57 = vpop.f32.mrf.mxu1 }
 0xe7b   :  { %6172 = vst.msk [vmem:[#allocation2 + $0x60] sm:$0xff] %vm806_vm2, %v8899_v63  ;;  %8912 = vpow2.f32 %v6138_v43  ;;  %v6136_v40 = vmul.f32 1.442695, %v6084_v28  ;;  %v6087_v7 = vmul.f32 %v8427_v57, %v6055_v22 }
 0xe7c   :  { %v8901_v60 = vpop.eup %8900  ;;  %v4759_v52 = vpop.f32.mrf.mxu1 }
 0xe7d   :  { %6175 = vst.msk [vmem:[#allocation2 + $0x78] sm:$0xff] %vm806_vm2, %v8901_v60  ;;  %8914 = vpow2.f32 %v6136_v40  ;;  %v6142_v36 = vmul.f32 1.442695, %v6087_v7  ;;  %v6086_v53 = vmul.f32 %v6054_v55, %v4759_v52  ;;  %v5262_v7 = vld [vmem:[%s11300_s3 + $0x100] sm:$0xff] }
 0xe7e   :  { %v8903_v42 = vpop.eup %8902  ;;  %v8430_v32 = vpop.f32.mrf.mxu1  ;;  %v5647_v60 = vld [vmem:[%s11300_s3 + $0x200] sm:$0xff] }
 0xe7f   :  { %6174 = vst.msk [vmem:[#allocation2 + $0x70] sm:$0xff] %vm806_vm2, %v8903_v42  ;;  %8916 = vpow2.f32 %v6142_v36  ;;  %v6140_v30 = vmul.f32 1.442695, %v6086_v53  ;;  %v6089_v50 = vmul.f32 %v8430_v32, %v6057_v33  ;;  %v5263_v33 = vld [vmem:[%s11300_s3 + $0x108] sm:$0xff] }
 0xe80   :  { %v8905_v51 = vpop.eup %8904  ;;  %v4769_v10 = vpop.f32.mrf.mxu1  ;;  %v5648_v36 = vld [vmem:[%s11300_s3 + $0x208] sm:$0xff] }
 0xe81   :  { %6177 = vst.msk [vmem:[#allocation2 + $0x88] sm:$0xff] %vm806_vm2, %v8905_v51  ;;  %8918 = vpow2.f32 %v6140_v30  ;;  %v6146_v49 = vmul.f32 1.442695, %v6089_v50  ;;  %v6088_v58 = vmul.f32 %v6056_v23, %v4769_v10 }
 0xe82   :  { %v8907_v39 = vpop.eup %8906  ;;  %v8433_v15 = vpop.f32.mrf.mxu1 }
 0xe83   :  { %6176 = vst.msk [vmem:[#allocation2 + $0x80] sm:$0xff] %vm806_vm2, %v8907_v39  ;;  %8920 = vpow2.f32 %v6146_v49  ;;  %v6144_v11 = vmul.f32 1.442695, %v6088_v58  ;;  %v6091_v25 = vmul.f32 %v8433_v15, %v6059_v6  ;;  %v5264_v6 = vld [vmem:[%s11300_s3 + $0x110] sm:$0xff]  ;;  %v5265_v58 = vld [vmem:[%s11300_s3 + $0x118] sm:$0xff] }
 0xe84   :  { %v8909_v37 = vpop.eup %8908  ;;  %v4779_v20 = vpop.f32.mrf.mxu1  ;;  %v5649_v49 = vld [vmem:[%s11300_s3 + $0x210] sm:$0xff]  ;;  %v5650_v39 = vld [vmem:[%s11300_s3 + $0x218] sm:$0xff] }
 0xe85   :  { %6179 = vst.msk [vmem:[#allocation2 + $0x98] sm:$0xff] %vm806_vm2, %v8909_v37  ;;  %8922 = vpow2.f32 %v6144_v11  ;;  %v6150_v47 = vmul.f32 1.442695, %v6091_v25  ;;  %v6090_v4 = vmul.f32 %v6058_v46, %v4779_v20 }
 0xe86   :  { %v8911_v1 = vpop.eup %8910  ;;  %v8436_v26 = vpop.f32.mrf.mxu1 }
 0xe87   :  { %6178 = vst.msk [vmem:[#allocation2 + $0x90] sm:$0xff] %vm806_vm2, %v8911_v1  ;;  %8924 = vpow2.f32 %v6150_v47  ;;  %v6148_v2 = vmul.f32 1.442695, %v6090_v4  ;;  %v6093_v48 = vmul.f32 %v8436_v26, %v6061_v56  ;;  %v5266_v4 = vld [vmem:[%s11300_s3 + $0x120] sm:$0xff]  ;;  %v5267_v26 = vld [vmem:[%s11300_s3 + $0x128] sm:$0xff] }
 0xe88   :  { %v8913_v8 = vpop.eup %8912  ;;  %v4789_v12 = vpop.f32.mrf.mxu1  ;;  %v5651_v1 = vld [vmem:[%s11300_s3 + $0x220] sm:$0xff] }
 0xe89   :  { %6181 = vst.msk [vmem:[#allocation2 + $0xa8] sm:$0xff] %vm806_vm2, %v8913_v8  ;;  %8926 = vpow2.f32 %v6148_v2  ;;  %v6154_v59 = vmul.f32 1.442695, %v6093_v48  ;;  %v6092_v21 = vmul.f32 %v6060_v29, %v4789_v12  ;;  %v5652_v29 = vld [vmem:[%s11300_s3 + $0x228] sm:$0xff] }
 0xe8a   :  { %v8915_v62 = vpop.eup %8914  ;;  %v8439_v17 = vpop.f32.mrf.mxu1 }
 0xe8b   :  { %6180 = vst.msk [vmem:[#allocation2 + $0xa0] sm:$0xff] %vm806_vm2, %v8915_v62  ;;  %8928 = vpow2.f32 %v6154_v59  ;;  %v6152_v61 = vmul.f32 1.442695, %v6092_v21  ;;  %v6095_v22 = vmul.f32 %v8439_v17, %v6063_v16  ;;  %v5268_v17 = vld [vmem:[%s11300_s3 + $0x130] sm:$0xff] }
 0xe8c   :  { %v8917_v43 = vpop.eup %8916  ;;  %v4799_v28 = vpop.f32.mrf.mxu1 }
 0xe8d   :  { %6183 = vst.msk [vmem:[#allocation2 + $0xb8] sm:$0xff] %vm806_vm2, %v8917_v43  ;;  %8930 = vpow2.f32 %v6152_v61  ;;  %v6158_v63 = vmul.f32 1.442695, %v6095_v22  ;;  %v6094_v57 = vmul.f32 %v6062_v24, %v4799_v28  ;;  %v5653_v24 = vld [vmem:[%s11300_s3 + $0x230] sm:$0xff]  ;;  %v5269_v61 = vld [vmem:[%s11300_s3 + $0x138] sm:$0xff] }
 0xe8e   :  { %v8919_v55 = vpop.eup %8918  ;;  %v8506_v40 = vpop.f32.mrf.mxu1  ;;  %v5654_v22 = vld [vmem:[%s11300_s3 + $0x238] sm:$0xff] }
 0xe8f   :  { %6182 = vst.msk [vmem:[#allocation2 + $0xb0] sm:$0xff] %vm806_vm2, %v8919_v55  ;;  %8932 = vpow2.f32 %v6158_v63  ;;  %v6156_v52 = vmul.f32 1.442695, %v6094_v57  ;;  %v5295_v50 = vmul.f32 %v8506_v40, %v5263_v33  ;;  %v5680_v51 = vmul.f32 %v8506_v40, %v5648_v36  ;;  %v5655_v33 = vld [vmem:[%s11300_s3 + $0x240] sm:$0xff]  ;;  %v5271_v36 = vld [vmem:[%s11300_s3 + $0x148] sm:$0xff] }
 0xe90   :  { %v8921_v53 = vpop.eup %8920  ;;  %v5103_v42 = vpop.f32.mrf.mxu1 }
 0xe91   :  { %6185 = vst.msk [vmem:[#allocation2 + $0xc8] sm:$0xff] %vm806_vm2, %v8921_v53  ;;  %8934 = vpow2.f32 %v6156_v52  ;;  %v5294_v32 = vmul.f32 %v5262_v7, %v5103_v42  ;;  %v5679_v23 = vmul.f32 %v5647_v60, %v5103_v42  ;;  %v5270_v52 = vld [vmem:[%s11300_s3 + $0x140] sm:$0xff]  ;;  %v5656_v53 = vld [vmem:[%s11300_s3 + $0x248] sm:$0xff] }
 0xe92   :  { %v8923_v30 = vpop.eup %8922  ;;  %v8509_v10 = vpop.f32.mrf.mxu1 }
 0xe93   :  { %6184 = vst.msk [vmem:[#allocation2 + $0xc0] sm:$0xff] %vm806_vm2, %v8923_v30  ;;  %8556 = vmatprep.mubr.msk.f32.mxu0 %vm1850_vm3, %v5294_v32  ;;  %8608 = vmatprep.mubr.msk.f32.mxu1 %vm1850_vm3, %v5679_v23  ;;  %v5297_v20 = vmul.f32 %v8509_v10, %v5265_v58  ;;  %v5682_v56 = vmul.f32 %v8509_v10, %v5650_v39  ;;  %v5272_v10 = vld [vmem:[%s11300_s3 + $0x150] sm:$0xff]  ;;  %v5658_v58 = vld [vmem:[%s11300_s3 + $0x258] sm:$0xff] }
 0xe94   :  { %v8925_v15 = vpop.eup %8924  ;;  %v5113_v46 = vpop.f32.mrf.mxu1  ;;  %8557 = vmatmul.mubr.msk.f32.vlgmr.msra.gmra.mxu0 %vm1850_vm3, %v5295_v50  ;;  %8609 = vmatmul.mubr.msk.f32.vlgmr.msra.gmra.mxu1 %vm1850_vm3, %v5680_v51 }
 0xe95   :  { %6187 = vst.msk [vmem:[#allocation2 + $0xd8] sm:$0xff] %vm806_vm2, %v8925_v15  ;;  %v5296_v11 = vmul.f32 %v5264_v6, %v5113_v46  ;;  %v5681_v25 = vmul.f32 %v5649_v49, %v5113_v46  ;;  %v5657_v6 = vld [vmem:[%s11300_s3 + $0x250] sm:$0xff]  ;;  %v5273_v49 = vld [vmem:[%s11300_s3 + $0x158] sm:$0xff] }
 0xe96   :  { %v8927_v37 = vpop.eup %8926  ;;  %v8512_v47 = vpop.f32.mrf.mxu1 }
 0xe97   :  { %6186 = vst.msk [vmem:[#allocation2 + $0xd0] sm:$0xff] %vm806_vm2, %v8927_v37  ;;  %8559 = vmatprep.mubr.msk.f32.mxu0 %vm1850_vm3, %v5296_v11  ;;  %8611 = vmatprep.mubr.msk.f32.mxu1 %vm1850_vm3, %v5681_v25  ;;  %v5299_v59 = vmul.f32 %v8512_v47, %v5267_v26  ;;  %v5684_v21 = vmul.f32 %v8512_v47, %v5652_v29  ;;  %v5275_v47 = vld [vmem:[%s11300_s3 + $0x168] sm:$0xff] }
 0xe98   :  { %v8929_v2 = vpop.eup %8928  ;;  %v5123_v48 = vpop.f32.mrf.mxu1  ;;  %8560 = vmatmul.mubr.msk.f32.gmra.mxu0 %vm1850_vm3, %v5297_v20  ;;  %8612 = vmatmul.mubr.msk.f32.gmra.mxu1 %vm1850_vm3, %v5682_v56  ;;  %v5274_v20 = vld [vmem:[%s11300_s3 + $0x160] sm:$0xff] }
 0xe99   :  { %6189 = vst.msk [vmem:[#allocation2 + $0xe8] sm:$0xff] %vm806_vm2, %v8929_v2  ;;  %v5298_v8 = vmul.f32 %v5266_v4, %v5123_v48  ;;  %v5683_v12 = vmul.f32 %v5651_v1, %v5123_v48  ;;  %v5659_v56 = vld [vmem:[%s11300_s3 + $0x260] sm:$0xff]  ;;  %v5660_v4 = vld [vmem:[%s11300_s3 + $0x268] sm:$0xff] }
 0xe9a   :  { %v8931_v16 = vpop.eup %8930  ;;  %v8515_v62 = vpop.f32.mrf.mxu1 }
 0xe9b   :  { %6188 = vst.msk [vmem:[#allocation2 + $0xe0] sm:$0xff] %vm806_vm2, %v8931_v16  ;;  %8562 = vmatprep.mubr.msk.f32.mxu0 %vm1850_vm3, %v5298_v8  ;;  %8614 = vmatprep.mubr.msk.f32.mxu1 %vm1850_vm3, %v5683_v12  ;;  %v5301_v40 = vmul.f32 %v8515_v62, %v5269_v61  ;;  %v5686_v7 = vmul.f32 %v8515_v62, %v5654_v22  ;;  %v5276_v12 = vld [vmem:[%s11300_s3 + $0x170] sm:$0xff] }
 0xe9c   :  { %v8933_v43 = vpop.eup %8932  ;;  %v5133_v28 = vpop.f32.mrf.mxu1  ;;  %8563 = vmatmul.mubr.msk.f32.gmra.mxu0 %vm1850_vm3, %v5299_v59  ;;  %8615 = vmatmul.mubr.msk.f32.gmra.mxu1 %vm1850_vm3, %v5684_v21  ;;  %v5661_v16 = vld [vmem:[%s11300_s3 + $0x270] sm:$0xff]  ;;  %v5277_v59 = vld [vmem:[%s11300_s3 + $0x178] sm:$0xff] }
 0xe9d   :  { %6191 = vst.msk [vmem:[#allocation2 + $0xf8] sm:$0xff] %vm806_vm2, %v8933_v43  ;;  %v5300_v63 = vmul.f32 %v5268_v17, %v5133_v28  ;;  %v5685_v57 = vmul.f32 %v5653_v24, %v5133_v28  ;;  %v5662_v21 = vld [vmem:[%s11300_s3 + $0x278] sm:$0xff]  ;;  %v5278_v28 = vld [vmem:[%s11300_s3 + $0x180] sm:$0xff] }
 0xe9e   :  { %v8935_v55 = vpop.eup %8934  ;;  %v8518_v60 = vpop.f32.mrf.mxu1 }
 0xe9f   :  { %6190 = vst.msk [vmem:[#allocation2 + $0xf0] sm:$0xff] %vm806_vm2, %v8935_v55  ;;  %8565 = vmatprep.mubr.msk.f32.mxu0 %vm1850_vm3, %v5300_v63  ;;  %8617 = vmatprep.mubr.msk.f32.mxu1 %vm1850_vm3, %v5685_v57  ;;  %v5303_v30 = vmul.f32 %v8518_v60, %v5271_v36  ;;  %v5688_v50 = vmul.f32 %v8518_v60, %v5656_v53  ;;  %v5663_v63 = vld [vmem:[%s11300_s3 + $0x280] sm:$0xff]  ;;  %v5279_v57 = vld [vmem:[%s11300_s3 + $0x188] sm:$0xff]  ;;  %v5280_v53 = vld [vmem:[%s11300_s3 + $0x190] sm:$0xff] }
 0xea0   :  { %v5143_v42 = vpop.f32.mrf.mxu1  ;;  %8566 = vmatmul.mubr.msk.f32.gmra.mxu0 %vm1850_vm3, %v5301_v40  ;;  %8618 = vmatmul.mubr.msk.f32.gmra.mxu1 %vm1850_vm3, %v5686_v7  ;;  %v5664_v55 = vld [vmem:[%s11300_s3 + $0x288] sm:$0xff] }
 0xea1   :  { %v5302_v32 = vmul.f32 %v5270_v52, %v5143_v42  ;;  %v5687_v23 = vmul.f32 %v5655_v33, %v5143_v42  ;;  %v5665_v42 = vld [vmem:[%s11300_s3 + $0x290] sm:$0xff] }
 0xea2   :  { %v8521_v51 = vpop.f32.mrf.mxu1 }
 0xea3   :  { %8568 = vmatprep.mubr.msk.f32.mxu0 %vm1850_vm3, %v5302_v32  ;;  %8620 = vmatprep.mubr.msk.f32.mxu1 %vm1850_vm3, %v5687_v23  ;;  %v5305_v11 = vmul.f32 %v8521_v51, %v5273_v49  ;;  %v5690_v25 = vmul.f32 %v8521_v51, %v5658_v58  ;;  %v5281_v32 = vld [vmem:[%s11300_s3 + $0x198] sm:$0xff]  ;;  %v5282_v58 = vld [vmem:[%s11300_s3 + $0x1a0] sm:$0xff] }
 0xea4   :  { %v5153_v39 = vpop.f32.mrf.mxu1  ;;  %8569 = vmatmul.mubr.msk.f32.gmra.mxu0 %vm1850_vm3, %v5303_v30  ;;  %8621 = vmatmul.mubr.msk.f32.gmra.mxu1 %vm1850_vm3, %v5688_v50  ;;  %v5666_v23 = vld [vmem:[%s11300_s3 + $0x298] sm:$0xff] }
 0xea5   :  { %v5304_v15 = vmul.f32 %v5272_v10, %v5153_v39  ;;  %v5689_v46 = vmul.f32 %v5657_v6, %v5153_v39  ;;  %v5667_v39 = vld [vmem:[%s11300_s3 + $0x2a0] sm:$0xff] }
 0xea6   :  { %v8524_v37 = vpop.f32.mrf.mxu1 }
 0xea7   :  { %8571 = vmatprep.mubr.msk.f32.mxu0 %vm1850_vm3, %v5304_v15  ;;  %8623 = vmatprep.mubr.msk.f32.mxu1 %vm1850_vm3, %v5689_v46  ;;  %v5307_v2 = vmul.f32 %v8524_v37, %v5275_v47  ;;  %v5692_v48 = vmul.f32 %v8524_v37, %v5660_v4  ;;  %v5283_v15 = vld [vmem:[%s11300_s3 + $0x1a8] sm:$0xff]  ;;  %v5284_v4 = vld [vmem:[%s11300_s3 + $0x1b0] sm:$0xff] }
 0xea8   :  { %v5163_v1 = vpop.f32.mrf.mxu1  ;;  %8572 = vmatmul.mubr.msk.f32.gmra.mxu0 %vm1850_vm3, %v5305_v11  ;;  %8624 = vmatmul.mubr.msk.f32.gmra.mxu1 %vm1850_vm3, %v5690_v25  ;;  %v5668_v46 = vld [vmem:[%s11300_s3 + $0x2a8] sm:$0xff] }
 0xea9   :  { %v5306_v26 = vmul.f32 %v5274_v20, %v5163_v1  ;;  %v5691_v29 = vmul.f32 %v5659_v56, %v5163_v1  ;;  %v5669_v1 = vld [vmem:[%s11300_s3 + $0x2b0] sm:$0xff] }
 0xeaa   :  { %v8527_v8 = vpop.f32.mrf.mxu1 }
 0xeab   :  { %8574 = vmatprep.mubr.msk.f32.mxu0 %vm1850_vm3, %v5306_v26  ;;  %8626 = vmatprep.mubr.msk.f32.mxu1 %vm1850_vm3, %v5691_v29  ;;  %v5309_v61 = vmul.f32 %v8527_v8, %v5277_v59  ;;  %v5694_v22 = vmul.f32 %v8527_v8, %v5662_v21  ;;  %v5285_v26 = vld [vmem:[%s11300_s3 + $0x1b8] sm:$0xff]  ;;  %v5286_v21 = vld [vmem:[%s11300_s3 + $0x1c0] sm:$0xff] }
 0xeac   :  { %v5173_v62 = vpop.f32.mrf.mxu1  ;;  %8575 = vmatmul.mubr.msk.f32.gmra.mxu0 %vm1850_vm3, %v5307_v2  ;;  %8627 = vmatmul.mubr.msk.f32.gmra.mxu1 %vm1850_vm3, %v5692_v48  ;;  %v5670_v29 = vld [vmem:[%s11300_s3 + $0x2b8] sm:$0xff] }
 0xead   :  { %v5308_v17 = vmul.f32 %v5276_v12, %v5173_v62  ;;  %v5693_v24 = vmul.f32 %v5661_v16, %v5173_v62  ;;  %v5671_v62 = vld [vmem:[%s11300_s3 + $0x2c0] sm:$0xff] }
 0xeae   :  { %v8530_v43 = vpop.f32.mrf.mxu1 }
 0xeaf   :  { %8577 = vmatprep.mubr.msk.f32.mxu0 %vm1850_vm3, %v5308_v17  ;;  %8629 = vmatprep.mubr.msk.f32.mxu1 %vm1850_vm3, %v5693_v24  ;;  %v5311_v52 = vmul.f32 %v8530_v43, %v5279_v57  ;;  %v5696_v33 = vmul.f32 %v8530_v43, %v5664_v55  ;;  %v5287_v17 = vld [vmem:[%s11300_s3 + $0x1c8] sm:$0xff]  ;;  %v5288_v55 = vld [vmem:[%s11300_s3 + $0x1d0] sm:$0xff] }
 0xeb0   :  { %v5183_v40 = vpop.f32.mrf.mxu1  ;;  %8578 = vmatmul.mubr.msk.f32.gmra.mxu0 %vm1850_vm3, %v5309_v61  ;;  %8630 = vmatmul.mubr.msk.f32.gmra.mxu1 %vm1850_vm3, %v5694_v22  ;;  %v5672_v24 = vld [vmem:[%s11300_s3 + $0x2c8] sm:$0xff] }
 0xeb1   :  { %v5310_v7 = vmul.f32 %v5278_v28, %v5183_v40  ;;  %v5695_v60 = vmul.f32 %v5663_v63, %v5183_v40  ;;  %v5673_v40 = vld [vmem:[%s11300_s3 + $0x2d0] sm:$0xff] }
 0xeb2   :  { %v8533_v36 = vpop.f32.mrf.mxu1 }
 0xeb3   :  { %8580 = vmatprep.mubr.msk.f32.mxu0 %vm1850_vm3, %v5310_v7  ;;  %8632 = vmatprep.mubr.msk.f32.mxu1 %vm1850_vm3, %v5695_v60  ;;  %v5313_v10 = vmul.f32 %v8533_v36, %v5281_v32  ;;  %v5698_v6 = vmul.f32 %v8533_v36, %v5666_v23  ;;  %v5289_v7 = vld [vmem:[%s11300_s3 + $0x1d8] sm:$0xff]  ;;  %v5290_v23 = vld [vmem:[%s11300_s3 + $0x1e0] sm:$0xff] }
 0xeb4   :  { %v5193_v30 = vpop.f32.mrf.mxu1  ;;  %8581 = vmatmul.mubr.msk.f32.gmra.mxu0 %vm1850_vm3, %v5311_v52  ;;  %8633 = vmatmul.mubr.msk.f32.gmra.mxu1 %vm1850_vm3, %v5696_v33  ;;  %v5674_v60 = vld [vmem:[%s11300_s3 + $0x2d8] sm:$0xff] }
 0xeb5   :  { %v5312_v50 = vmul.f32 %v5280_v53, %v5193_v30  ;;  %v5697_v51 = vmul.f32 %v5665_v42, %v5193_v30  ;;  %v5675_v30 = vld [vmem:[%s11300_s3 + $0x2e0] sm:$0xff] }
 0xeb6   :  { %v8536_v49 = vpop.f32.mrf.mxu1 }
 0xeb7   :  { %8583 = vmatprep.mubr.msk.f32.mxu0 %vm1850_vm3, %v5312_v50  ;;  %8635 = vmatprep.mubr.msk.f32.mxu1 %vm1850_vm3, %v5697_v51  ;;  %v5315_v20 = vmul.f32 %v8536_v49, %v5283_v15  ;;  %v5700_v56 = vmul.f32 %v8536_v49, %v5668_v46  ;;  %v5291_v50 = vld [vmem:[%s11300_s3 + $0x1e8] sm:$0xff]  ;;  %v5292_v46 = vld [vmem:[%s11300_s3 + $0x1f0] sm:$0xff] }
 0xeb8   :  { %v5203_v11 = vpop.f32.mrf.mxu1  ;;  %8584 = vmatmul.mubr.msk.f32.gmra.mxu0 %vm1850_vm3, %v5313_v10  ;;  %8636 = vmatmul.mubr.msk.f32.gmra.mxu1 %vm1850_vm3, %v5698_v6  ;;  %v5676_v51 = vld [vmem:[%s11300_s3 + $0x2e8] sm:$0xff] }
 0xeb9   :  { %v5314_v25 = vmul.f32 %v5282_v58, %v5203_v11  ;;  %v5699_v37 = vmul.f32 %v5667_v39, %v5203_v11  ;;  %v5677_v11 = vld [vmem:[%s11300_s3 + $0x2f0] sm:$0xff] }
 0xeba   :  { %v8539_v47 = vpop.f32.mrf.mxu1 }
 0xebb   :  { %8586 = vmatprep.mubr.msk.f32.mxu0 %vm1850_vm3, %v5314_v25  ;;  %8638 = vmatprep.mubr.msk.f32.mxu1 %vm1850_vm3, %v5699_v37  ;;  %v5317_v12 = vmul.f32 %v8539_v47, %v5285_v26  ;;  %v5702_v16 = vmul.f32 %v8539_v47, %v5670_v29  ;;  %v5293_v25 = vld [vmem:[%s11300_s3 + $0x1f8] sm:$0xff]  ;;  %v8450_v26 = vpop.f32.mrf.mxu0 }
 0xebc   :  { %v5213_v2 = vpop.f32.mrf.mxu1  ;;  %8587 = vmatmul.mubr.msk.f32.gmra.mxu0 %vm1850_vm3, %v5315_v20  ;;  %8639 = vmatmul.mubr.msk.f32.gmra.mxu1 %vm1850_vm3, %v5700_v56  ;;  %v5678_v37 = vld [vmem:[%s11300_s3 + $0x2f8] sm:$0xff] }
 0xebd   :  { %v5316_v48 = vmul.f32 %v5284_v4, %v5213_v2  ;;  %v5701_v8 = vmul.f32 %v5669_v1, %v5213_v2  ;;  %v4878_v29 = vpop.f32.mrf.mxu0 }
 0xebe   :  { %v8542_v59 = vpop.f32.mrf.mxu1 }
 0xebf   :  { %8589 = vmatprep.mubr.msk.f32.mxu0 %vm1850_vm3, %v5316_v48  ;;  %8641 = vmatprep.mubr.msk.f32.mxu1 %vm1850_vm3, %v5701_v8  ;;  %v5319_v28 = vmul.f32 %v8542_v59, %v5287_v17  ;;  %v5704_v63 = vmul.f32 %v8542_v59, %v5672_v24  ;;  %v8453_v2 = vpop.f32.mrf.mxu0 }
 0xec0   :  { %v5223_v61 = vpop.f32.mrf.mxu1  ;;  %8590 = vmatmul.mubr.msk.f32.gmra.mxu0 %vm1850_vm3, %v5317_v12  ;;  %8642 = vmatmul.mubr.msk.f32.gmra.mxu1 %vm1850_vm3, %v5702_v16 }
 0xec1   :  { %v5318_v22 = vmul.f32 %v5286_v21, %v5223_v61  ;;  %v5703_v43 = vmul.f32 %v5671_v62, %v5223_v61  ;;  %v4888_v48 = vpop.f32.mrf.mxu0 }
 0xec2   :  { %v8545_v57 = vpop.f32.mrf.mxu1 }
 0xec3   :  { %8592 = vmatprep.mubr.msk.f32.mxu0 %vm1850_vm3, %v5318_v22  ;;  %8644 = vmatprep.mubr.msk.f32.mxu1 %vm1850_vm3, %v5703_v43  ;;  %v5321_v53 = vmul.f32 %v8545_v57, %v5289_v7  ;;  %v5706_v42 = vmul.f32 %v8545_v57, %v5674_v60  ;;  %v8456_v8 = vpop.f32.mrf.mxu0 }
 0xec4   :  { %v5233_v52 = vpop.f32.mrf.mxu1  ;;  %8593 = vmatmul.mubr.msk.f32.gmra.mxu0 %vm1850_vm3, %v5319_v28  ;;  %8645 = vmatmul.mubr.msk.f32.gmra.mxu1 %vm1850_vm3, %v5704_v63 }
 0xec5   :  { %v5320_v33 = vmul.f32 %v5288_v55, %v5233_v52  ;;  %v5705_v36 = vmul.f32 %v5673_v40, %v5233_v52  ;;  %v4898_v12 = vpop.f32.mrf.mxu0 }
 0xec6   :  { %v8548_v32 = vpop.f32.mrf.mxu1 }
 0xec7   :  { %8595 = vmatprep.mubr.msk.f32.mxu0 %vm1850_vm3, %v5320_v33  ;;  %8647 = vmatprep.mubr.msk.f32.mxu1 %vm1850_vm3, %v5705_v36  ;;  %v5323_v58 = vmul.f32 %v8548_v32, %v5291_v50  ;;  %v5708_v39 = vmul.f32 %v8548_v32, %v5676_v51  ;;  %v11002_v16 = vpop.f32.mrf.mxu0 }
 0xec8   :  { %v5243_v10 = vpop.f32.mrf.mxu1  ;;  %8596 = vmatmul.mubr.msk.f32.gmra.mxu0 %vm1850_vm3, %v5321_v53  ;;  %8648 = vmatmul.mubr.msk.f32.gmra.mxu1 %vm1850_vm3, %v5706_v42 }
 0xec9   :  { %v5322_v6 = vmul.f32 %v5290_v23, %v5243_v10  ;;  %v5707_v49 = vmul.f32 %v5675_v30, %v5243_v10  ;;  %v11004_v59 = vpop.f32.mrf.mxu0  ;;  %v6417_v23 = vld [vmem:[%s11301_s4 + $0x8] sm:$0xff] }
 0xeca   :  { %v8551_v15 = vpop.f32.mrf.mxu1 }
 0xecb   :  { %8598 = vmatprep.mubr.msk.f32.mxu0 %vm1850_vm3, %v5322_v6  ;;  %8650 = vmatprep.mubr.msk.f32.mxu1 %vm1850_vm3, %v5707_v49  ;;  %v5325_v4 = vmul.f32 %v8551_v15, %v5293_v25  ;;  %v5710_v1 = vmul.f32 %v8551_v15, %v5678_v37  ;;  %v11006_v21 = vpop.f32.mrf.mxu0 }
 0xecc   :  { %v5253_v20 = vpop.f32.mrf.mxu1  ;;  %8599 = vmatmul.mubr.msk.f32.gmra.mxu0 %vm1850_vm3, %v5323_v58  ;;  %8651 = vmatmul.mubr.msk.f32.gmra.mxu1 %vm1850_vm3, %v5708_v39 }
 0xecd   :  { %v5324_v56 = vmul.f32 %v5292_v46, %v5253_v20  ;;  %v5709_v47 = vmul.f32 %v5677_v11, %v5253_v20  ;;  %v11008_v62 = vpop.f32.mrf.mxu0  ;;  %v6257_v20 = vld [vmem:[#allocation2 + $0x8] sm:$0xff] }
 0xecf   :  { %8601 = vmatprep.mubr.msk.f32.mxu0 %vm1850_vm3, %v5324_v56  ;;  %8653 = vmatprep.mubr.msk.f32.mxu1 %vm1850_vm3, %v5709_v47  ;;  %v11010_v17 = vpop.f32.mrf.mxu0 }
 0xed0   :  { %8602 = vmatmul.mubr.msk.f32.gmra.mxu0 %vm1850_vm3, %v5325_v4  ;;  %8654 = vmatmul.mubr.msk.f32.gmra.mxu1 %vm1850_vm3, %v5710_v1  ;;  %v6256_v1 = vld [vmem:[#allocation2] sm:$0xff] }
 0xed1   :  { %v11012_v24 = vpop.f32.mrf.mxu0  ;;  %6560 = vmatprep.mubr.f32.mxu0 %v6417_v23 }
 0xed3   :  { %v11014_v61 = vpop.f32.mrf.mxu0 }
 0xed5   :  { %v11016_v22 = vpop.f32.mrf.mxu0 }
 0xed7   :  { %v11018_v43 = vpop.f32.mrf.mxu0 }
 0xed9   :  { %v11020_v28 = vpop.f32.mrf.mxu0 }
 0xedb   :  { %v11022_v63 = vpop.f32.mrf.mxu0 }
 0xedd   :  { %v11024_v57 = vpop.f32.mrf.mxu0 }
 0xedf   :  { %v11026_v55 = vpop.f32.mrf.mxu0 }
 0xee1   :  { %v11028_v40 = vpop.f32.mrf.mxu0 }
 0xee3   :  { %v11030_v7 = vpop.f32.mrf.mxu0 }
 0xee5   :  { %v11032_v60 = vpop.f32.mrf.mxu0 }
 0xee7   :  { %v11034_v52 = vpop.f32.mrf.mxu0 }
 0xee9   :  { %v11036_v33 = vpop.f32.mrf.mxu0 }
 0xeeb   :  { %v11038_v36 = vpop.f32.mrf.mxu0 }
 0xeed   :  { %v11040_v53 = vpop.f32.mrf.mxu0 }
 0xeef   :  { %v11042_v42 = vpop.f32.mrf.mxu0 }
 0xef1   :  { %v11044_v32 = vpop.f32.mrf.mxu0 }
 0xef3   :  { %v11049_v30 = vpop.f32.mrf.mxu0 }
 0xef5   :  { %v11051_v50 = vpop.f32.mrf.mxu0 }
 0xef7   :  { %v11053_v51 = vpop.f32.mrf.mxu0 }
 0xef9   :  { %v11055_v10 = vpop.f32.mrf.mxu0 }
 0xf54   :  { %v8558_v6 = vpop.f32.mrf.mxu0  ;;  %v11057_v49 = vpop.f32.mrf.mxu1 }
 0xf55   :  { %v6193_v58 = vmul.f32 %v8558_v6, %v8450_v26  ;;  %v6259_v6 = vmul.f32 0.0, %v6257_v20 }
 0xf56   :  { %v5488_v39 = vpop.f32.mrf.mxu0  ;;  %v11059_v15 = vpop.f32.mrf.mxu1 }
 0xf57   :  { %6225 = vst.msk [vmem:[#allocation3 + $0x8] sm:$0xff] %vm806_vm2, %v6193_v58  ;;  %v6192_v46 = vmul.f32 %v5488_v39, %v4878_v29 }
 0xf58   :  { %v8561_v11 = vpop.f32.mrf.mxu0  ;;  %v11062_v25 = vpop.f32.mrf.mxu1 }
 0xf59   :  { %6224 = vst.msk [vmem:[#allocation3] sm:$0xff] %vm806_vm2, %v6192_v46  ;;  %v6195_v37 = vmul.f32 %v8561_v11, %v8453_v2  ;;  %v6258_v46 = vmul.f32 0.0, %v6256_v1 }
 0xf5a   :  { %v5498_v56 = vpop.f32.mrf.mxu0  ;;  %v11065_v47 = vpop.f32.mrf.mxu1 }
 0xf5b   :  { %6227 = vst.msk [vmem:[#allocation3 + $0x18] sm:$0xff] %vm806_vm2, %v6195_v37  ;;  %v6194_v4 = vmul.f32 %v5498_v56, %v4888_v48  ;;  %v6267_v37 = vld [vmem:[#allocation2 + $0x18] sm:$0xff] }
 0xf5c   :  { %v8564_v26 = vpop.f32.mrf.mxu0  ;;  %v11068_v23 = vpop.f32.mrf.mxu1 }
 0xf5d   :  { %6226 = vst.msk [vmem:[#allocation3 + $0x10] sm:$0xff] %vm806_vm2, %v6194_v4  ;;  %v6197_v29 = vmul.f32 %v8564_v26, %v8456_v8  ;;  %v6266_v26 = vld [vmem:[#allocation2 + $0x10] sm:$0xff] }
 0xf5e   :  { %v6261_v58 = vld [vmem:[#allocation3 + $0x8] sm:$0xff]  ;;  %v5508_v39 = vpop.f32.mrf.mxu0  ;;  %v11071_v27 = vpop.f32.mrf.mxu1 }
 0xf5f   :  { %v6263_v2 = vadd.f32 %v6261_v58, %v6259_v6  ;;  %6229 = vst.msk [vmem:[#allocation3 + $0x28] sm:$0xff] %vm806_vm2, %v6197_v29  ;;  %v6196_v11 = vmul.f32 %v5508_v39, %v4898_v12 }
 0xf60   :  { %v6260_v38 = vld [vmem:[#allocation3] sm:$0xff]  ;;  %v8567_v48 = vpop.f32.mrf.mxu0  ;;  %v11074_v56 = vpop.f32.mrf.mxu1 }
 0xf61   :  { %6265 = vst.msk [vmem:[#allocation4 + $0x8] sm:$0xff] %vm806_vm2, %v6263_v2  ;;  %v6262_v20 = vadd.f32 %v6260_v38, %v6258_v46  ;;  %v6269_v0 = vmul.f32 %v6267_v37, %v6263_v2  ;;  %6228 = vst.msk [vmem:[#allocation3 + $0x20] sm:$0xff] %vm806_vm2, %v6196_v11  ;;  %v6199_v8 = vmul.f32 %v8567_v48, %v11002_v16  ;;  %v6277_v38 = vld [vmem:[#allocation2 + $0x28] sm:$0xff] }
 0xf62   :  { %v6271_v4 = vld [vmem:[#allocation3 + $0x18] sm:$0xff]  ;;  %v5518_v6 = vpop.f32.mrf.mxu0  ;;  %v11079_v1 = vpop.f32.mrf.mxu1 }
 0xf63   :  { %6264 = vst.msk [vmem:[#allocation4] sm:$0xff] %vm806_vm2, %v6262_v20  ;;  %v6273_v12 = vadd.f32 %v6271_v4, %v6269_v0  ;;  %v6268_v29 = vmul.f32 %v6266_v26, %v6262_v20  ;;  %6231 = vst.msk [vmem:[#allocation3 + $0x38] sm:$0xff] %vm806_vm2, %v6199_v8  ;;  %v6198_v58 = vmul.f32 %v5518_v6, %v11004_v59  ;;  %v6276_v0 = vld [vmem:[#allocation2 + $0x20] sm:$0xff] }
 0xf64   :  { %v6270_v39 = vld [vmem:[#allocation3 + $0x10] sm:$0xff]  ;;  %v8570_v2 = vpop.f32.mrf.mxu0  ;;  %v11084_v46 = vpop.f32.mrf.mxu1 }
 0xf65   :  { %6275 = vst.msk [vmem:[#allocation4 + $0x18] sm:$0xff] %vm806_vm2, %v6273_v12  ;;  %v6272_v16 = vadd.f32 %v6270_v39, %v6268_v29  ;;  %v6279_v11 = vmul.f32 %v6277_v38, %v6273_v12  ;;  %6230 = vst.msk [vmem:[#allocation3 + $0x30] sm:$0xff] %vm806_vm2, %v6198_v58  ;;  %v6201_v37 = vmul.f32 %v8570_v2, %v11006_v21  ;;  %v6287_v29 = vld [vmem:[#allocation2 + $0x38] sm:$0xff] }
 0xf66   :  { %v6281_v48 = vld [vmem:[#allocation3 + $0x28] sm:$0xff]  ;;  %v5528_v20 = vpop.f32.mrf.mxu0  ;;  %v11089_v4 = vpop.f32.mrf.mxu1 }
 0xf67   :  { %6274 = vst.msk [vmem:[#allocation4 + $0x10] sm:$0xff] %vm806_vm2, %v6272_v16  ;;  %v6283_v59 = vadd.f32 %v6281_v48, %v6279_v11  ;;  %v6278_v8 = vmul.f32 %v6276_v0, %v6272_v16  ;;  %6233 = vst.msk [vmem:[#allocation3 + $0x48] sm:$0xff] %vm806_vm2, %v6201_v37  ;;  %v6200_v26 = vmul.f32 %v5528_v20, %v11008_v62  ;;  %v6286_v11 = vld [vmem:[#allocation2 + $0x30] sm:$0xff] }
 0xf68   :  { %v6280_v6 = vld [vmem:[#allocation3 + $0x20] sm:$0xff]  ;;  %v8573_v12 = vpop.f32.mrf.mxu0  ;;  %v11094_v39 = vpop.f32.mrf.mxu1 }
 0xf69   :  { %6285 = vst.msk [vmem:[#allocation4 + $0x28] sm:$0xff] %vm806_vm2, %v6283_v59  ;;  %v6282_v21 = vadd.f32 %v6280_v6, %v6278_v8  ;;  %v6289_v58 = vmul.f32 %v6287_v29, %v6283_v59  ;;  %6232 = vst.msk [vmem:[#allocation3 + $0x40] sm:$0xff] %vm806_vm2, %v6200_v26  ;;  %v6203_v38 = vmul.f32 %v8573_v12, %v11010_v17  ;;  %v6297_v8 = vld [vmem:[#allocation2 + $0x48] sm:$0xff] }
 0xf6a   :  { %v6291_v2 = vld [vmem:[#allocation3 + $0x38] sm:$0xff]  ;;  %v5538_v16 = vpop.f32.mrf.mxu0  ;;  %v11099_v48 = vpop.f32.mrf.mxu1 }
 0xf6b   :  { %6284 = vst.msk [vmem:[#allocation4 + $0x20] sm:$0xff] %vm806_vm2, %v6282_v21  ;;  %v6293_v62 = vadd.f32 %v6291_v2, %v6289_v58  ;;  %v6288_v37 = vmul.f32 %v6286_v11, %v6282_v21  ;;  %6235 = vst.msk [vmem:[#allocation3 + $0x58] sm:$0xff] %vm806_vm2, %v6203_v38  ;;  %v6202_v0 = vmul.f32 %v5538_v16, %v11012_v24  ;;  %v6296_v58 = vld [vmem:[#allocation2 + $0x40] sm:$0xff] }
 0xf6c   :  { %v6290_v20 = vld [vmem:[#allocation3 + $0x30] sm:$0xff]  ;;  %v8576_v59 = vpop.f32.mrf.mxu0  ;;  %v11104_v6 = vpop.f32.mrf.mxu1 }
 0xf6d   :  { %6295 = vst.msk [vmem:[#allocation4 + $0x38] sm:$0xff] %vm806_vm2, %v6293_v62  ;;  %v6292_v17 = vadd.f32 %v6290_v20, %v6288_v37  ;;  %v6299_v26 = vmul.f32 %v6297_v8, %v6293_v62  ;;  %6234 = vst.msk [vmem:[#allocation3 + $0x50] sm:$0xff] %vm806_vm2, %v6202_v0  ;;  %v6205_v29 = vmul.f32 %v8576_v59, %v11014_v61  ;;  %v6307_v37 = vld [vmem:[#allocation2 + $0x58] sm:$0xff] }
 0xf6e   :  { %v6301_v12 = vld [vmem:[#allocation3 + $0x48] sm:$0xff]  ;;  %v5548_v21 = vpop.f32.mrf.mxu0  ;;  %v11109_v2 = vpop.f32.mrf.mxu1 }
 0xf6f   :  { %6294 = vst.msk [vmem:[#allocation4 + $0x30] sm:$0xff] %vm806_vm2, %v6292_v17  ;;  %v6303_v24 = vadd.f32 %v6301_v12, %v6299_v26  ;;  %v6298_v38 = vmul.f32 %v6296_v58, %v6292_v17  ;;  %6237 = vst.msk [vmem:[#allocation3 + $0x68] sm:$0xff] %vm806_vm2, %v6205_v29  ;;  %v6204_v11 = vmul.f32 %v5548_v21, %v11016_v22  ;;  %v6306_v26 = vld [vmem:[#allocation2 + $0x50] sm:$0xff] }
 0xf70   :  { %v6300_v16 = vld [vmem:[#allocation3 + $0x40] sm:$0xff]  ;;  %v8579_v62 = vpop.f32.mrf.mxu0  ;;  %v11114_v20 = vpop.f32.mrf.mxu1 }
 0xf71   :  { %6305 = vst.msk [vmem:[#allocation4 + $0x48] sm:$0xff] %vm806_vm2, %v6303_v24  ;;  %v6302_v61 = vadd.f32 %v6300_v16, %v6298_v38  ;;  %v6309_v0 = vmul.f32 %v6307_v37, %v6303_v24  ;;  %6236 = vst.msk [vmem:[#allocation3 + $0x60] sm:$0xff] %vm806_vm2, %v6204_v11  ;;  %v6207_v8 = vmul.f32 %v8579_v62, %v11018_v43  ;;  %v6317_v38 = vld [vmem:[#allocation2 + $0x68] sm:$0xff] }
 0xf72   :  { %v6311_v59 = vld [vmem:[#allocation3 + $0x58] sm:$0xff]  ;;  %v5558_v17 = vpop.f32.mrf.mxu0  ;;  %v11119_v12 = vpop.f32.mrf.mxu1 }
 0xf73   :  { %6304 = vst.msk [vmem:[#allocation4 + $0x40] sm:$0xff] %vm806_vm2, %v6302_v61  ;;  %v6313_v22 = vadd.f32 %v6311_v59, %v6309_v0  ;;  %v6308_v29 = vmul.f32 %v6306_v26, %v6302_v61  ;;  %6239 = vst.msk [vmem:[#allocation3 + $0x78] sm:$0xff] %vm806_vm2, %v6207_v8  ;;  %v6206_v58 = vmul.f32 %v5558_v17, %v11020_v28  ;;  %v6316_v0 = vld [vmem:[#allocation2 + $0x60] sm:$0xff] }
 0xf74   :  { %v6310_v21 = vld [vmem:[#allocation3 + $0x50] sm:$0xff]  ;;  %v8582_v24 = vpop.f32.mrf.mxu0  ;;  %v11124_v16 = vpop.f32.mrf.mxu1 }
 0xf75   :  { %6315 = vst.msk [vmem:[#allocation4 + $0x58] sm:$0xff] %vm806_vm2, %v6313_v22  ;;  %v6312_v43 = vadd.f32 %v6310_v21, %v6308_v29  ;;  %v6319_v11 = vmul.f32 %v6317_v38, %v6313_v22  ;;  %6238 = vst.msk [vmem:[#allocation3 + $0x70] sm:$0xff] %vm806_vm2, %v6206_v58  ;;  %v6209_v37 = vmul.f32 %v8582_v24, %v11022_v63  ;;  %v6327_v29 = vld [vmem:[#allocation2 + $0x78] sm:$0xff] }
 0xf76   :  { %v6321_v62 = vld [vmem:[#allocation3 + $0x68] sm:$0xff]  ;;  %v5568_v61 = vpop.f32.mrf.mxu0  ;;  %v11129_v59 = vpop.f32.mrf.mxu1 }
 0xf77   :  { %6314 = vst.msk [vmem:[#allocation4 + $0x50] sm:$0xff] %vm806_vm2, %v6312_v43  ;;  %v6323_v28 = vadd.f32 %v6321_v62, %v6319_v11  ;;  %v6318_v8 = vmul.f32 %v6316_v0, %v6312_v43  ;;  %6241 = vst.msk [vmem:[#allocation3 + $0x88] sm:$0xff] %vm806_vm2, %v6209_v37  ;;  %v6208_v26 = vmul.f32 %v5568_v61, %v11024_v57  ;;  %v6326_v11 = vld [vmem:[#allocation2 + $0x70] sm:$0xff] }
 0xf78   :  { %v6320_v17 = vld [vmem:[#allocation3 + $0x60] sm:$0xff]  ;;  %v8585_v22 = vpop.f32.mrf.mxu0  ;;  %v11134_v21 = vpop.f32.mrf.mxu1 }
 0xf79   :  { %6325 = vst.msk [vmem:[#allocation4 + $0x68] sm:$0xff] %vm806_vm2, %v6323_v28  ;;  %v6322_v63 = vadd.f32 %v6320_v17, %v6318_v8  ;;  %v6329_v58 = vmul.f32 %v6327_v29, %v6323_v28  ;;  %6240 = vst.msk [vmem:[#allocation3 + $0x80] sm:$0xff] %vm806_vm2, %v6208_v26  ;;  %v6211_v38 = vmul.f32 %v8585_v22, %v11026_v55  ;;  %v6337_v8 = vld [vmem:[#allocation2 + $0x88] sm:$0xff] }
 0xf7a   :  { %v6331_v24 = vld [vmem:[#allocation3 + $0x78] sm:$0xff]  ;;  %v5578_v43 = vpop.f32.mrf.mxu0  ;;  %v11139_v62 = vpop.f32.mrf.mxu1 }
 0xf7b   :  { %6324 = vst.msk [vmem:[#allocation4 + $0x60] sm:$0xff] %vm806_vm2, %v6322_v63  ;;  %v6333_v57 = vadd.f32 %v6331_v24, %v6329_v58  ;;  %v6328_v37 = vmul.f32 %v6326_v11, %v6322_v63  ;;  %6243 = vst.msk [vmem:[#allocation3 + $0x98] sm:$0xff] %vm806_vm2, %v6211_v38  ;;  %v6210_v0 = vmul.f32 %v5578_v43, %v11028_v40  ;;  %v6336_v58 = vld [vmem:[#allocation2 + $0x80] sm:$0xff] }
 0xf7c   :  { %v6330_v61 = vld [vmem:[#allocation3 + $0x70] sm:$0xff]  ;;  %v8588_v28 = vpop.f32.mrf.mxu0  ;;  %v11144_v17 = vpop.f32.mrf.mxu1 }
 0xf7d   :  { %6335 = vst.msk [vmem:[#allocation4 + $0x78] sm:$0xff] %vm806_vm2, %v6333_v57  ;;  %v6332_v55 = vadd.f32 %v6330_v61, %v6328_v37  ;;  %v6339_v26 = vmul.f32 %v6337_v8, %v6333_v57  ;;  %6242 = vst.msk [vmem:[#allocation3 + $0x90] sm:$0xff] %vm806_vm2, %v6210_v0  ;;  %v6213_v29 = vmul.f32 %v8588_v28, %v11030_v7  ;;  %v6347_v37 = vld [vmem:[#allocation2 + $0x98] sm:$0xff]  ;;  %v6346_v28 = vld [vmem:[#allocation2 + $0x90] sm:$0xff] }
 0xf7e   :  { %v6341_v22 = vld [vmem:[#allocation3 + $0x88] sm:$0xff]  ;;  %v5588_v63 = vpop.f32.mrf.mxu0  ;;  %v11149_v24 = vpop.f32.mrf.mxu1 }
 0xf7f   :  { %6334 = vst.msk [vmem:[#allocation4 + $0x70] sm:$0xff] %vm806_vm2, %v6332_v55  ;;  %v6343_v40 = vadd.f32 %v6341_v22, %v6339_v26  ;;  %v6338_v38 = vmul.f32 %v6336_v58, %v6332_v55  ;;  %6245 = vst.msk [vmem:[#allocation3 + $0xa8] sm:$0xff] %vm806_vm2, %v6213_v29  ;;  %v6212_v11 = vmul.f32 %v5588_v63, %v11032_v60  ;;  %v6357_v58 = vld [vmem:[#allocation2 + $0xa8] sm:$0xff] }
 0xf80   :  { %v6340_v43 = vld [vmem:[#allocation3 + $0x80] sm:$0xff]  ;;  %v8591_v57 = vpop.f32.mrf.mxu0  ;;  %v11157_v14 = vpop.f32.mrf.mxu1 }
 0xf81   :  { %6345 = vst.msk [vmem:[#allocation4 + $0x88] sm:$0xff] %vm806_vm2, %v6343_v40  ;;  %v6342_v0 = vadd.f32 %v6340_v43, %v6338_v38  ;;  %v6349_v7 = vmul.f32 %v6347_v37, %v6343_v40  ;;  %6244 = vst.msk [vmem:[#allocation3 + $0xa0] sm:$0xff] %vm806_vm2, %v6212_v11  ;;  %v6215_v61 = vmul.f32 %v8591_v57, %v11034_v52  ;;  %v6356_v43 = vld [vmem:[#allocation2 + $0xa0] sm:$0xff] }
 0xf82   :  { %v6351_v8 = vld [vmem:[#allocation3 + $0x98] sm:$0xff]  ;;  %v5598_v55 = vpop.f32.mrf.mxu0  ;;  %v11165_v37 = vpop.f32.mrf.mxu1 }
 0xf83   :  { %6344 = vst.msk [vmem:[#allocation4 + $0x80] sm:$0xff] %vm806_vm2, %v6342_v0  ;;  %v6353_v26 = vadd.f32 %v6351_v8, %v6349_v7  ;;  %v6348_v60 = vmul.f32 %v6346_v28, %v6342_v0  ;;  %6247 = vst.msk [vmem:[#allocation3 + $0xb8] sm:$0xff] %vm806_vm2, %v6215_v61  ;;  %v6214_v29 = vmul.f32 %v5598_v55, %v11036_v33  ;;  %v6367_v8 = vld [vmem:[#allocation2 + $0xb8] sm:$0xff] }
 0xf84   :  { %v6350_v22 = vld [vmem:[#allocation3 + $0x90] sm:$0xff]  ;;  %v8594_v63 = vpop.f32.mrf.mxu0 }
 0xf85   :  { %6355 = vst.msk [vmem:[#allocation4 + $0x98] sm:$0xff] %vm806_vm2, %v6353_v26  ;;  %v6352_v40 = vadd.f32 %v6350_v22, %v6348_v60  ;;  %v6359_v52 = vmul.f32 %v6357_v58, %v6353_v26  ;;  %6246 = vst.msk [vmem:[#allocation3 + $0xb0] sm:$0xff] %vm806_vm2, %v6214_v29  ;;  %v6217_v38 = vmul.f32 %v8594_v63, %v11038_v36  ;;  %v6366_v29 = vld [vmem:[#allocation2 + $0xb0] sm:$0xff]  ;;  %v11173_v22 = vpop.f32.mrf.mxu1 }
 0xf86   :  { %v6361_v11 = vld [vmem:[#allocation3 + $0xa8] sm:$0xff]  ;;  %v5608_v57 = vpop.f32.mrf.mxu0 }
 0xf87   :  { %6354 = vst.msk [vmem:[#allocation4 + $0x90] sm:$0xff] %vm806_vm2, %v6352_v40  ;;  %v6363_v0 = vadd.f32 %v6361_v11, %v6359_v52  ;;  %v6358_v33 = vmul.f32 %v6356_v43, %v6352_v40  ;;  %6249 = vst.msk [vmem:[#allocation3 + $0xc8] sm:$0xff] %vm806_vm2, %v6217_v38  ;;  %v6216_v7 = vmul.f32 %v5608_v57, %v11040_v53  ;;  %v6377_v38 = vld [vmem:[#allocation2 + $0xc8] sm:$0xff] }
 0xf88   :  { %v6360_v61 = vld [vmem:[#allocation3 + $0xa0] sm:$0xff]  ;;  %v8597_v28 = vpop.f32.mrf.mxu0 }
 0xf89   :  { %6365 = vst.msk [vmem:[#allocation4 + $0xa8] sm:$0xff] %vm806_vm2, %v6363_v0  ;;  %v6362_v55 = vadd.f32 %v6360_v61, %v6358_v33  ;;  %v6369_v36 = vmul.f32 %v6367_v8, %v6363_v0  ;;  %6248 = vst.msk [vmem:[#allocation3 + $0xc0] sm:$0xff] %vm806_vm2, %v6216_v7  ;;  %v6219_v26 = vmul.f32 %v8597_v28, %v11042_v42  ;;  %v11181_v33 = vpop.f32.mrf.mxu1  ;;  %v6376_v7 = vld [vmem:[#allocation2 + $0xc0] sm:$0xff] }
 0xf8a   :  { %v6371_v60 = vld [vmem:[#allocation3 + $0xb8] sm:$0xff]  ;;  %v5618_v58 = vpop.f32.mrf.mxu0 }
 0xf8b   :  { %6364 = vst.msk [vmem:[#allocation4 + $0xa0] sm:$0xff] %vm806_vm2, %v6362_v55  ;;  %v6373_v63 = vadd.f32 %v6371_v60, %v6369_v36  ;;  %v6368_v53 = vmul.f32 %v6366_v29, %v6362_v55  ;;  %6251 = vst.msk [vmem:[#allocation3 + $0xd8] sm:$0xff] %vm806_vm2, %v6219_v26  ;;  %v6218_v40 = vmul.f32 %v5618_v58, %v11044_v32  ;;  %v6387_v36 = vld [vmem:[#allocation2 + $0xd8] sm:$0xff] }
 0xf8c   :  { %v6370_v52 = vld [vmem:[#allocation3 + $0xb0] sm:$0xff]  ;;  %v8600_v11 = vpop.f32.mrf.mxu0 }
 0xf8d   :  { %6375 = vst.msk [vmem:[#allocation4 + $0xb8] sm:$0xff] %vm806_vm2, %v6373_v63  ;;  %v6372_v43 = vadd.f32 %v6370_v52, %v6368_v53  ;;  %v6379_v42 = vmul.f32 %v6377_v38, %v6373_v63  ;;  %6250 = vst.msk [vmem:[#allocation3 + $0xd0] sm:$0xff] %vm806_vm2, %v6218_v40  ;;  %v6221_v57 = vmul.f32 %v8600_v11, %v11049_v30  ;;  %v11189_v63 = vpop.f32.mrf.mxu1  ;;  %v6386_v53 = vld [vmem:[#allocation2 + $0xd0] sm:$0xff] }
 0xf8e   :  { %v6381_v0 = vld [vmem:[#allocation3 + $0xc8] sm:$0xff]  ;;  %v5628_v61 = vpop.f32.mrf.mxu0 }
 0xf8f   :  { %6374 = vst.msk [vmem:[#allocation4 + $0xb0] sm:$0xff] %vm806_vm2, %v6372_v43  ;;  %v6383_v8 = vadd.f32 %v6381_v0, %v6379_v42  ;;  %v6378_v32 = vmul.f32 %v6376_v7, %v6372_v43  ;;  %6253 = vst.msk [vmem:[#allocation3 + $0xe8] sm:$0xff] %vm806_vm2, %v6221_v57  ;;  %v6220_v28 = vmul.f32 %v5628_v61, %v11051_v50  ;;  %v6397_v43 = vld [vmem:[#allocation2 + $0xe8] sm:$0xff]  ;;  %v6396_v7 = vld [vmem:[#allocation2 + $0xe0] sm:$0xff] }
 0xf90   :  { %v6380_v55 = vld [vmem:[#allocation3 + $0xc0] sm:$0xff]  ;;  %v8603_v26 = vpop.f32.mrf.mxu0 }
 0xf91   :  { %6385 = vst.msk [vmem:[#allocation4 + $0xc8] sm:$0xff] %vm806_vm2, %v6383_v8  ;;  %v6382_v60 = vadd.f32 %v6380_v55, %v6378_v32  ;;  %v6389_v30 = vmul.f32 %v6387_v36, %v6383_v8  ;;  %6252 = vst.msk [vmem:[#allocation3 + $0xe0] sm:$0xff] %vm806_vm2, %v6220_v28  ;;  %v6223_v29 = vmul.f32 %v8603_v26, %v11053_v51  ;;  %v6003_v51 = vpop.f32.mrf.mxu1  ;;  %v6407_v28 = vld [vmem:[#allocation2 + $0xf8] sm:$0xff] }
 0xf92   :  { %v6391_v58 = vld [vmem:[#allocation3 + $0xd8] sm:$0xff]  ;;  %v5638_v40 = vpop.f32.mrf.mxu0 }
 0xf93   :  { %6384 = vst.msk [vmem:[#allocation4 + $0xc0] sm:$0xff] %vm806_vm2, %v6382_v60  ;;  %v6393_v52 = vadd.f32 %v6391_v58, %v6389_v30  ;;  %v6388_v50 = vmul.f32 %v6386_v53, %v6382_v60  ;;  %6255 = vst.msk [vmem:[#allocation3 + $0xf8] sm:$0xff] %vm806_vm2, %v6223_v29  ;;  %v6222_v38 = vmul.f32 %v5638_v40, %v11055_v10  ;;  %v8652_v36 = vpop.f32.mrf.mxu1  ;;  %v6406_v60 = vld [vmem:[#allocation2 + $0xf0] sm:$0xff] }
 0xf94   :  { %v6390_v11 = vld [vmem:[#allocation3 + $0xd0] sm:$0xff] }
 0xf95   :  { %6395 = vst.msk [vmem:[#allocation4 + $0xd8] sm:$0xff] %vm806_vm2, %v6393_v52  ;;  %v6392_v42 = vadd.f32 %v6390_v11, %v6388_v50  ;;  %v6399_v57 = vmul.f32 %v6397_v43, %v6393_v52  ;;  %6254 = vst.msk [vmem:[#allocation3 + $0xf0] sm:$0xff] %vm806_vm2, %v6222_v38  ;;  %v6013_v40 = vpop.f32.mrf.mxu1  ;;  %v6439_v50 = vld [vmem:[#allocation4 + $0x78] sm:$0xff]  ;;  %v6438_v11 = vld [vmem:[#allocation4 + $0x70] sm:$0xff] }
 0xf96   :  { %v6401_v0 = vld [vmem:[#allocation3 + $0xe8] sm:$0xff] }
 0xf97   :  { %6394 = vst.msk [vmem:[#allocation4 + $0xd0] sm:$0xff] %vm806_vm2, %v6392_v42  ;;  %v6403_v61 = vadd.f32 %v6401_v0, %v6399_v57  ;;  %v6398_v8 = vmul.f32 %v6396_v7, %v6392_v42  ;;  %v8655_v52 = vpop.f32.mrf.mxu1  ;;  %v6471_v42 = vmul.f32 %v11114_v20, %v6439_v50 }
 0xf98   :  { %v6400_v32 = vld [vmem:[#allocation3 + $0xe0] sm:$0xff]  ;;  %v6449_v50 = vld [vmem:[#allocation4 + $0xc8] sm:$0xff] }
 0xf99   :  { %6405 = vst.msk [vmem:[#allocation4 + $0xe8] sm:$0xff] %vm806_vm2, %v6403_v61  ;;  %v6402_v10 = vadd.f32 %v6400_v32, %v6398_v8  ;;  %v6409_v55 = vmul.f32 %v6407_v28, %v6403_v61  ;;  %v6023_v0 = vpop.f32.mrf.mxu1  ;;  %v6437_v61 = vld [vmem:[#allocation4 + $0x68] sm:$0xff]  ;;  %v6470_v32 = vmul.f32 %v6438_v11, %v11119_v12 }
 0xf9a   :  { %v6411_v26 = vld [vmem:[#allocation3 + $0xf8] sm:$0xff]  ;;  %v6448_v11 = vld [vmem:[#allocation4 + $0xc0] sm:$0xff] }
 0xf9b   :  { %6404 = vst.msk [vmem:[#allocation4 + $0xe0] sm:$0xff] %vm806_vm2, %v6402_v10  ;;  %v6413_v30 = vadd.f32 %v6411_v26, %v6409_v55  ;;  %v6408_v29 = vmul.f32 %v6406_v60, %v6402_v10  ;;  %v6436_v10 = vld [vmem:[#allocation4 + $0x60] sm:$0xff]  ;;  %v6469_v26 = vmul.f32 %v11104_v6, %v6437_v61  ;;  %v6429_v61 = vld [vmem:[#allocation4 + $0x28] sm:$0xff] }
 0xf9c   :  { %v6410_v58 = vld [vmem:[#allocation3 + $0xf0] sm:$0xff]  ;;  %v6451_v60 = vld [vmem:[#allocation4 + $0xd8] sm:$0xff]  ;;  %v6468_v20 = vmul.f32 %v6436_v10, %v11109_v2  ;;  %v6481_v2 = vmul.f32 %v11173_v22, %v6449_v50  ;;  %v6445_v22 = vld [vmem:[#allocation4 + $0xa8] sm:$0xff] }
 0xf9d   :  { %6415 = vst.msk [vmem:[#allocation4 + $0xf8] sm:$0xff] %vm806_vm2, %v6413_v30  ;;  %v6412_v53 = vadd.f32 %v6410_v58, %v6408_v29  ;;  %v6435_v30 = vld [vmem:[#allocation4 + $0x58] sm:$0xff] }
 0xf9e   :  { %v6450_v58 = vld [vmem:[#allocation4 + $0xd0] sm:$0xff]  ;;  %v6467_v12 = vmul.f32 %v11094_v39, %v6435_v30  ;;  %v6480_v39 = vmul.f32 %v6448_v11, %v11181_v33  ;;  %v6444_v33 = vld [vmem:[#allocation4 + $0xa0] sm:$0xff]  ;;  %v6427_v10 = vld [vmem:[#allocation4 + $0x18] sm:$0xff] }
 0xf9f   :  { %6414 = vst.msk [vmem:[#allocation4 + $0xf0] sm:$0xff] %vm806_vm2, %v6412_v53  ;;  %v6434_v53 = vld [vmem:[#allocation4 + $0x50] sm:$0xff]  ;;  %v6425_v30 = vld [vmem:[#allocation4 + $0x8] sm:$0xff]  ;;  %v8716_v50 = vld [vmem:[#allocation5 + $0x118] sm:$0xff]  }
 0xfa0   :  { %v6453_v57 = vld [vmem:[#allocation4 + $0xe8] sm:$0xff]  ;;  %v6466_v6 = vmul.f32 %v6434_v53, %v11099_v48  ;;  %v6422_v53 = vld [vmem:[%s11301_s4 + $0x30] sm:$0xff] }
 0xfa1   :  { %v6485_v55 = vmul.f32 %v8652_v36, %v6453_v57  ;;  %v6433_v36 = vld [vmem:[#allocation4 + $0x48] sm:$0xff] }
 0xfa2   :  { %v6452_v28 = vld [vmem:[#allocation4 + $0xe0] sm:$0xff] }
 0xfa3   :  { %v6484_v29 = vmul.f32 %v6452_v28, %v6013_v40  ;;  %v6432_v40 = vld [vmem:[#allocation4 + $0x40] sm:$0xff]  ;;  %v6461_v28 = vmul.f32 %v11068_v23, %v6429_v61 }
 0xfa4   :  { %v6455_v38 = vld [vmem:[#allocation4 + $0xf8] sm:$0xff]  ;;  %v6464_v57 = vmul.f32 %v6432_v40, %v11089_v4  ;;  %v6477_v4 = vmul.f32 %v11144_v17, %v6445_v22  ;;  %v6441_v17 = vld [vmem:[#allocation4 + $0x88] sm:$0xff] }
 0xfa5   :  { %v6487_v43 = vmul.f32 %v8655_v52, %v6455_v38  ;;  %v6483_v52 = vmul.f32 %v11189_v63, %v6451_v60  ;;  %v6482_v38 = vmul.f32 %v6450_v58, %v6003_v51  ;;  %v6431_v63 = vld [vmem:[#allocation4 + $0x38] sm:$0xff]  ;;  %v6446_v51 = vld [vmem:[#allocation4 + $0xb0] sm:$0xff]  ;;  %v6459_v60 = vmul.f32 %v11062_v25, %v6427_v10 }
 0xfa6   :  { %v6454_v7 = vld [vmem:[#allocation4 + $0xf0] sm:$0xff]  ;;  %v6457_v58 = vmul.f32 %v11057_v49, %v6425_v30 }
 0xfa7   :  { %v6486_v8 = vmul.f32 %v6454_v7, %v6023_v0  ;;  %7806 = vmatprep.subr.mxu0 %v6487_v43  ;;  %v6465_v43 = vmul.f32 %v11084_v46, %v6433_v36  ;;  %v6430_v0 = vld [vmem:[#allocation4 + $0x30] sm:$0xff]  ;;  %v6463_v7 = vmul.f32 %v11074_v56, %v6431_v63  ;;  %v6478_v46 = vmul.f32 %v6446_v51, %v11165_v37 }
 0xfa8   :  { %7807 = vmatpush3.msra.mxu0 %v6471_v42  ;;  %v6447_v42 = vld [vmem:[#allocation4 + $0xb8] sm:$0xff]  ;;  %v6476_v56 = vmul.f32 %v6444_v33, %v11149_v24  ;;  %v6442_v37 = vld [vmem:[#allocation4 + $0x90] sm:$0xff]  ;;  %v6440_v24 = vld [vmem:[#allocation4 + $0x80] sm:$0xff] }
 0xfa9   :  { %7808 = vmatprep.subr.mxu0 %v6486_v8  ;;  %v6479_v48 = vmul.f32 %v11157_v14, %v6447_v42  ;;  %v6462_v8 = vmul.f32 %v6430_v0, %v11079_v1  ;;  %v6443_v14 = vld [vmem:[#allocation4 + $0x98] sm:$0xff]  ;;  %v6474_v23 = vmul.f32 %v6442_v37, %v11139_v62  ;;  %v6416_v62 = vld [vmem:[%s11301_s4] sm:$0xff]  ;;  %v6418_v49 = vld [vmem:[%s11301_s4 + $0x10] sm:$0xff] }
 0xfaa   :  { %7809 = vmatpush3.msra.mxu0 %v6470_v32  ;;  %v6428_v32 = vld [vmem:[#allocation4 + $0x20] sm:$0xff]  ;;  %v6475_v1 = vmul.f32 %v11134_v21, %v6443_v14  ;;  %v6472_v21 = vmul.f32 %v6440_v24, %v11129_v59  ;;  %v6423_v59 = vld [vmem:[%s11301_s4 + $0x38] sm:$0xff]  ;;  %v8717_v36 = vld [vmem:[#allocation5 + $0x110] sm:$0xff]  }
 0xfab   :  { %7810 = vmatprep.subr.mxu0 %v6485_v55  ;;  %v6460_v55 = vmul.f32 %v6428_v32, %v11071_v27  ;;  %v6473_v27 = vmul.f32 %v11124_v16, %v6441_v17  ;;  %v6420_v16 = vld [vmem:[%s11301_s4 + $0x20] sm:$0xff] }
 0xfac   :  { %7811 = vmatpush3.msra.mxu0 %v6469_v26  ;;  %v6426_v26 = vld [vmem:[#allocation4 + $0x10] sm:$0xff] }
 0xfad   :  { %7812 = vmatprep.subr.mxu0 %v6484_v29  ;;  %v6458_v29 = vmul.f32 %v6426_v26, %v11065_v47  ;;  %v6419_v47 = vld [vmem:[%s11301_s4 + $0x18] sm:$0xff] }
 0xfae   :  { %7813 = vmatpush3.msra.mxu0 %v6468_v20  ;;  %v6424_v20 = vld [vmem:[#allocation4] sm:$0xff] }
 0xfaf   :  { %7814 = vmatprep.subr.mxu0 %v6483_v52  ;;  %v6456_v25 = vmul.f32 %v6424_v20, %v11059_v15  ;;  %v6421_v15 = vld [vmem:[%s11301_s4 + $0x28] sm:$0xff] }
 0xfb0   :  { %7815 = vmatpush3.msra.mxu0 %v6467_v12  ;;  %v8714_v52 = vld [vmem:[#allocation5 + $0x128] sm:$0xff]   ;;  %v8715_v12 = vld [vmem:[#allocation5 + $0x120] sm:$0xff]  }
 0xfb1   :  { %7816 = vmatprep.subr.mxu0 %v6482_v38  ;;  %v11252_v38 = vld [vmem:[%s11300_s3 + $0x5b8] sm:$0xff] }
 0xfb2   :  { %7817 = vmatpush3.msra.mxu0 %v6466_v6  ;;  %v3697_v6 = vrot.slane %v11252_v38, %v9165_v19 }
 0xfb3   :  { %7818 = vmatprep.subr.mxu0 %v6481_v2 }
 0xfb4   :  { %7819 = vmatpush3.msra.mxu0 %v6465_v43  ;;  %v3745_v11 = vadd.f32 %v10275_v9, %v3697_v6  ;;  %v3748_v40 = vadd.f32 %v10279_v34, %v3697_v6  ;;  %v3753_v42 = vadd.f32 %v10273_v18, %v3697_v6  ;;  %v3756_v63 = vadd.f32 %v10277_v44, %v3697_v6 }
 0xfb5   :  { %7820 = vmatprep.subr.mxu0 %v6480_v39  ;;  %v11328_v44 = vsub.s32 5, %v9043_v13 }
 0xfb6   :  { %7821 = vmatpush3.msra.mxu0 %v6464_v57  ;;  %v7256_v2 = vmul.f32 -1.442695, %v3745_v11  ;;  %v7257_v43 = vmul.f32 -1.442695, %v3748_v40  ;;  %v7258_v39 = vmul.f32 -1.442695, %v3753_v42 }
 0xfb7   :  { %7822 = vmatprep.subr.mxu0 %v6479_v48  ;;  %v7259_v57 = vmul.f32 -1.442695, %v3756_v63 }
 0xfb8   :  { %7823 = vmatpush3.msra.mxu0 %v6463_v7  ;;  %8936 = vpow2.f32 %v7256_v2 }
 0xfb9   :  { %7824 = vmatprep.subr.mxu0 %v6478_v46  ;;  %8938 = vpow2.f32 %v7257_v43  ;;  %v6491_v46 = vrot.slane %v11252_v38, %v11328_v44 }
 0xfba   :  { %7825 = vmatpush3.msra.mxu0 %v6462_v8  ;;  %8940 = vpow2.f32 %v7258_v39 }
 0xfbb   :  { %7826 = vmatprep.subr.mxu0 %v6477_v4  ;;  %8942 = vpow2.f32 %v7259_v57  ;;  %v6492_v4 = vmul.f32 %v6491_v46, %v10292_v41 }
 0xfbc   :  { %7827 = vmatpush3.msra.mxu0 %v6461_v28 }
 0xfbd   :  { %7828 = vmatprep.subr.mxu0 %v6476_v56  ;;  %v6493_v56 = vmul.f32 %v6491_v46, %v10290_v35 }
 0xfbe   :  { %7829 = vmatpush3.msra.mxu0 %v6460_v55 }
 0xfbf   :  { %7830 = vmatprep.subr.mxu0 %v6475_v1 }
 0xfc0   :  { %7831 = vmatpush3.msra.mxu0 %v6459_v60 }
 0xfc1   :  { %7832 = vmatprep.subr.mxu0 %v6474_v23 }
 0xfc2   :  { %7833 = vmatpush3.msra.mxu0 %v6458_v29 }
 0xfc3   :  { %7834 = vmatprep.subr.mxu0 %v6473_v27 }
 0xfc4   :  { %7835 = vmatpush3.msra.mxu0 %v6457_v58  ;;  %v6494_v58 = vmul.f32 %v6491_v46, %v10298_v54  ;;  %v8719_v54 = vld [vmem:[#allocation5 + $0x130] sm:$0xff]  }
 0xfc5   :  { %7836 = vmatprep.subr.mxu0 %v6472_v21  ;;  %v8937_v51 = vpop.eup %8936 }
 0xfc6   :  { %7837 = vmatpush3.msra.mxu0 %v6456_v25  ;;  %v8939_v0 = vpop.eup %8938  ;;  %v6593_v48 = vadd.f32 1.0, %v8937_v51 }
 0xfc7   :  { %6561 = vmatmul.mubr.f32.vlgmr.msra.gmra.mxu0 %v6416_v62  ;;  %8656 = vmatprep.subr.bf16.mxu0 %v8714_v52  ;;  %v6594_v19 = vadd.f32 1.0, %v8939_v0  ;;  %v8941_v9 = vpop.eup %8940  ;;  %v6495_v62 = vmul.f32 %v6491_v46, %v10296_v5 }
 0xfc8   :  { %6565 = vmatprep.mubr.f32.mxu0 %v6419_v47  ;;  %8657 = vmatpush3.bf16.msra.mxu0 %v8714_v52  ;;  %8944 = vrcp.f32 %v6593_v48  ;;  %v8943_v34 = vpop.eup %8942  ;;  %v6595_v7 = vadd.f32 1.0, %v8941_v9  ;;  %v8718_v52 = vld [vmem:[#allocation5 + $0x138] sm:$0xff]  }
 0xfc9   :  { %8658 = vmatprep.subr.bf16.mxu0 %v8715_v12  ;;  %8946 = vrcp.f32 %v6594_v19  ;;  %v6596_v22 = vadd.f32 1.0, %v8943_v34 }
 0xfca   :  { %8948 = vrcp.f32 %v6595_v7 }
 0xfcb   :  { %6566 = vmatmul.mubr.f32.gmra.mxu0 %v6418_v49  ;;  %8950 = vrcp.f32 %v6596_v22 }
 0xfcc   :  { %6570 = vmatprep.mubr.f32.mxu0 %v6421_v15  ;;  %8659 = vmatpush3.bf16.msra.mxu0 %v8715_v12 }
 0xfcd   :  { %8660 = vmatprep.subr.bf16.mxu0 %v8716_v50 }
 0xfcf   :  { %6571 = vmatmul.mubr.f32.gmra.mxu0 %v6420_v16 }
 0xfd0   :  { %6575 = vmatprep.mubr.f32.mxu0 %v6423_v59  ;;  %8661 = vmatpush3.bf16.msra.mxu0 %v8716_v50 }
 0xfd1   :  { %8662 = vmatprep.subr.bf16.mxu0 %v8717_v36 }
 0xfd3   :  { %6576 = vmatmul.mubr.f32.gmra.mxu0 %v6422_v53 }
 0xfd4   :  { %8663 = vmatpush3.bf16.msra.mxu0 %v8717_v36 }
 0xfd5   :  { %v8945_v32 = vpop.eup %8944  ;;  %8668 = vmatprep.subr.bf16.mxu0 %v8718_v52 }
 0xfd6   :  { %v8947_v28 = vpop.eup %8946  ;;  %v6605_v26 = vmul.f32 %v8945_v32, %v3745_v11 }
 0xfd7   :  { %v6606_v1 = vmul.f32 %v8947_v28, %v3748_v40  ;;  %v8949_v20 = vpop.eup %8948  ;;  %v11329_v40 = vsub.s32 6, %v9043_v13 }
 0xfd8   :  { %v8951_v41 = vpop.eup %8950  ;;  %v6607_v47 = vmul.f32 %v8949_v20, %v3753_v42  ;;  %v11330_v42 = vld [vmem:[#allocation9_spill] sm:$0xff] }
 0xfd9   :  { %v6608_v49 = vmul.f32 %v8951_v41, %v3756_v63  ;;  %v6709_v2 = vrot.slane %v11252_v38, %v11329_v40 }
0x1087   :  { %v7838_v18 = vpop.f32.mrf.mxu0 }
0x1089   :  { %v7839_v61 = vpop.f32.mrf.mxu0 }
0x108a   :  { %v7840_v8 = vadd.f32 %v7839_v61, %v7838_v18 }
0x108b   :  { %v7841_v33 = vpop.f32.mrf.mxu0 }
0x108c   :  { %v6563_v10 = vadd.f32 %v7840_v8, %v6492_v4 }
0x108d   :  { %v7842_v14 = vpop.f32.mrf.mxu0 }
0x108e   :  { %v7843_v55 = vadd.f32 %v7842_v14, %v7841_v33  ;;  %v6609_v30 = vmul.f32 %v6605_v26, %v6563_v10 }
0x108f   :  { %v7844_v37 = vpop.f32.mrf.mxu0 }
0x1090   :  { %v6568_v60 = vadd.f32 %v7843_v55, %v6493_v56 }
0x1091   :  { %v7845_v17 = vpop.f32.mrf.mxu0 }
0x1092   :  { %v6610_v23 = vmul.f32 %v6606_v1, %v6568_v60  ;;  %v7846_v29 = vadd.f32 %v7845_v17, %v7844_v37 }
0x1093   :  { %v7847_v24 = vpop.f32.mrf.mxu0 }
0x1094   :  { %v6621_v27 = vpack.c.bf16 %v6610_v23, %v6609_v30  ;;  %v6573_v25 = vadd.f32 %v7846_v29, %v6494_v58 }
0x1095   :  { %v7848_v21 = vpop.f32.mrf.mxu0 }
0x1096   :  { %v7849_v35 = vadd.f32 %v7848_v21, %v7847_v24  ;;  %8664 = vmatprep.mubr.msk.bf16.mxu0 %vm806_vm2, %v6621_v27  ;;  %v6611_v16 = vmul.f32 %v6607_v47, %v6573_v25 }
0x1098   :  { %v6578_v15 = vadd.f32 %v7849_v35, %v6495_v62 }
0x109a   :  { %v6612_v59 = vmul.f32 %v6608_v49, %v6578_v15 }
0x109c   :  { %v6622_v53 = vpack.c.bf16 %v6612_v59, %v6611_v16 }
0x109e   :  { %8665 = vmatmul.mubr.msk.bf16.vlgmr.msra.gmra.mxu0 %vm806_vm2, %v6622_v53 }
0x109f   :  { %8669 = vmatpush3.bf16.msra.mxu0 %v8718_v52 }
0x10a0   :  { %8670 = vmatprep.subr.bf16.mxu0 %v8719_v54 }
0x10a3   :  { %8671 = vmatpush3.bf16.msra.mxu0 %v8719_v54 }
0x115e   :  { %v8666_v12 = vpop.f32.mrf.mxu0 }
0x115f   :  { %v6704_v11 = vadd.f32 %v8666_v12, %v10197_v31 }
0x1160   :  { %v6687_v50 = vpop.f32.mrf.mxu0 }
0x1161   :  { %v6702_v36 = vadd.f32 %v6687_v50, %v10193_v45  ;;  %v6712_v0 = vadd.f32 %v6709_v2, %v6704_v11 }
0x1162   :  { %v8667_v5 = vpop.f32.mrf.mxu0 }
0x1163   :  { %v6705_v6 = vadd.f32 %v8667_v5, %v10191_v3  ;;  %v6710_v57 = vadd.f32 %v6709_v2, %v6702_v36  ;;  %v11331_v3 = vsub.s32 7, %v9043_v13 }
0x1164   :  { %v6690_v43 = vpop.f32.mrf.mxu0 }
0x1165   :  { %v6703_v63 = vadd.f32 %v6690_v43, %v11330_v42  ;;  %v6713_v39 = vadd.f32 %v6709_v2, %v6705_v6  ;;  %v6723_v45 = vrot.slane %v11252_v38, %v11331_v3 }
0x1167   :  { %v6711_v51 = vadd.f32 %v6709_v2, %v6703_v63  ;;  %v6719_v19 = vpack.c.bf16 %v6713_v39, %v6712_v0 }
0x1169   :  { %v6718_v48 = vpack.c.bf16 %v6711_v51, %v6710_v57 }
0x116b   :  { %8672 = vmatprep.mubr.msk.bf16.mxu0 %vm157_vm1, %v6718_v48 }
0x116c   :  { %8673 = vmatmul.mubr.msk.bf16.vlgmr.msra.gmra.mxu0 %vm157_vm1, %v6719_v19 }
0x122c   :  { %v8674_v31 = vpop.f32.mrf.mxu0 }
0x122d   :  { %v6785_v9 = vadd.f32 %v8674_v31, %v6723_v45 }
0x122e   :  { %v6776_v34 = vpop.f32.mrf.mxu0 }
0x122f   :  { %v7272_v7 = vmul.f32 -1.442695, %v6785_v9  ;;  %v6777_v22 = vadd.f32 %v6776_v34, %v6723_v45 }
0x1230   :  { %v8675_v18 = vpop.f32.mrf.mxu0 }
0x1231   :  { %8952 = vpow2.f32 %v7272_v7  ;;  %v7270_v61 = vmul.f32 -1.442695, %v6777_v22  ;;  %v6788_v44 = vadd.f32 %v8675_v18, %v6723_v45 }
0x1232   :  { %v6779_v46 = vpop.f32.mrf.mxu0 }
0x1233   :  { %8954 = vpow2.f32 %v7270_v61  ;;  %v7273_v8 = vmul.f32 -1.442695, %v6788_v44  ;;  %v6780_v33 = vadd.f32 %v6779_v46, %v6723_v45 }
0x1235   :  { %8956 = vpow2.f32 %v7273_v8  ;;  %v7271_v32 = vmul.f32 -1.442695, %v6780_v33 }
0x1237   :  { %8958 = vpow2.f32 %v7271_v32 }
0x123e   :  { %v8953_v4 = vpop.eup %8952 }
0x123f   :  { %v6805_v13 = vadd.f32 1.0, %v8953_v4 }
0x1240   :  { %v8955_v28 = vpop.eup %8954 }
0x1241   :  { %8960 = vrcp.f32 %v6805_v13  ;;  %v6803_v38 = vadd.f32 1.0, %v8955_v28 }
0x1242   :  { %v8957_v14 = vpop.eup %8956 }
0x1243   :  { %8962 = vrcp.f32 %v6803_v38  ;;  %v6806_v10 = vadd.f32 1.0, %v8957_v14 }
0x1244   :  { %v8959_v56 = vpop.eup %8958 }
0x1245   :  { %8964 = vrcp.f32 %v6806_v10  ;;  %v6804_v55 = vadd.f32 1.0, %v8959_v56 }
0x1247   :  { %8966 = vrcp.f32 %v6804_v55 }
0x124e   :  { %v8961_v37 = vpop.eup %8960 }
0x124f   :  { %6817 = vst.msk [vmem:[%s11302_s5 + $0x10] sm:$0xff] %vm71_vm0, %v8961_v37 }
0x1250   :  { %v8963_v26 = vpop.eup %8962 }
0x1251   :  { %6815 = vst.msk [vmem:[%s11302_s5] sm:$0xff] %vm71_vm0, %v8963_v26 }
0x1252   :  { %v8965_v1 = vpop.eup %8964 }
0x1253   :  { %6818 = vst.msk [vmem:[%s11302_s5 + $0x18] sm:$0xff] %vm71_vm0, %v8965_v1 }
0x1254   :  { %v8967_v60 = vpop.eup %8966 }
0x1255   :  { %6816 = vst.msk [vmem:[%s11302_s5 + $0x8] sm:$0xff] %vm71_vm0, %v8967_v60 }
0x1256   :  { %6823 = vsyncpa [#allocation6], 1 }

</bundles_post_ra>
